<compile_context>
chip_gen: v7x
topology: tpu7x:2x2x1
jax: 0.10.0
libtpu: 0.0.40
codegen_flags: <defaults>
</compile_context>

<pallas_src>
import functools

import jax
import jax.numpy as jnp
from jax.experimental import pallas as pl
from jax.experimental.pallas import tpu as pltpu


def _round_up(x, m):
    return (x + m - 1) // m * m


def _choose_time_block(T, Bp, Ep, Hp, *, max_tb=128, budget_bytes=20 * 1024 * 1024):
    """Timesteps per grid step: largest Tb (<= max_tb) whose streamed bf16 x block
    (double-buffered) plus the per-block f32 gate scratch fit the VMEM budget.
    No divisor-of-T requirement: a partial tail block is masked in-kernel."""
    per_tb = 2 * Bp * Ep * 2 + Bp * 4 * Hp * 4
    return max(1, min(T, max_tb, budget_bytes // per_tb))


def _lstm_kernel(x_ref, wih1_ref, b1_ref, whh1_ref, w2_ref, b2_ref, out_ref,
                 gx1_ref, h1_ref, c1_ref, h2_ref, c2_ref, *,
                 hidden_pad, t_block, t_total):
    """One grid step == one block of timesteps (whole batch).

    x_ref   : (Tb*Bp, Ep)  bf16  embedded inputs, time-major rows (t*Bp + b)
    wih1_ref: (Ep, 4*Hp)   bf16  layer-1 input-projection weights (resident)
    b1_ref  : (1, 4*Hp)    f32   layer-1 bias (b_ih1 + b_hh1)
    whh1_ref: (Hp, 4*Hp)   bf16  layer-1 recurrent weights (resident)
    w2_ref  : (2*Hp, 4*Hp) bf16  layer-2 fused [W_ih2; W_hh2] (resident)
    b2_ref  : (1, 4*Hp)    f32   layer-2 bias
    out_ref : (Bp, Hp)     f32   last-timestep h2 (written at last grid step only)
    gx1_ref : (Tb*Bp, 4Hp) f32   per-block layer-1 input-projection gates (scratch)
    h*/c*   : (Bp, Hp)           cross-grid-step recurrent state carry (scratch)
    """
    f32, bf16 = jnp.float32, jnp.bfloat16
    Hp = hidden_pad
    Tb = t_block
    Bp = out_ref.shape[0]
    blk = pl.program_id(0)

    @pl.when(blk == 0)
    def _init():
        h1_ref[...] = jnp.zeros_like(h1_ref)
        c1_ref[...] = jnp.zeros_like(c1_ref)
        h2_ref[...] = jnp.zeros_like(h2_ref)
        c2_ref[...] = jnp.zeros_like(c2_ref)

    # Layer-1 input projection for the whole time block: one big MXU matmul,
    # off the serial recurrence chain (replaces the old HBM-materialized gx1).
    gx1_ref[...] = (jnp.dot(x_ref[...], wih1_ref[...],
                            preferred_element_type=f32) + b1_ref[...])

    # Hoist the (Bp, 4Hp) bias broadcast out of the unrolled loop.
    b2b = jnp.broadcast_to(b2_ref[...], (Bp, 4 * Hp))

    def gates_to_hc(gates, c_prev):
        # PyTorch nn.LSTM gate order [i, f, g, o]; every slice is 128-lane aligned.
        # TODO(synk): on v6e/v7x cast pre-activations to bf16 for ~2x EUP throughput
        # at large batch (keep f32 on v5e, which has no bf16 EUP).
        i_g = jax.nn.sigmoid(gates[:, 0 * Hp:1 * Hp])
        f_g = jax.nn.sigmoid(gates[:, 1 * Hp:2 * Hp])
        g_g = jnp.tanh(gates[:, 2 * Hp:3 * Hp])
        o_g = jax.nn.sigmoid(gates[:, 3 * Hp:4 * Hp])
        c_new = f_g * c_prev + i_g * g_g
        h_new = o_g * jnp.tanh(c_new)
        return h_new, c_new

    has_tail = (t_total % Tb) != 0   # static Python bool

    def step(t, carry):
        h1, c1, h2, c2 = carry                       # h: bf16, c: f32, vreg-resident
        row = pl.multiple_of(t * Bp, 8)
        gx = gx1_ref[pl.ds(row, Bp), :]              # (Bp, 4Hp) f32
        # --- layer 1: only the recurrent matmul sits on the serial chain ---
        g1 = gx + jnp.dot(h1, whh1_ref[...], preferred_element_type=f32)
        h1n_f, c1n = gates_to_hc(g1, c1)
        h1n = h1n_f.astype(bf16)
        # --- layer 2: single fused matmul over concat([h1_t, h2_{t-1}]) ---
        xh = jnp.concatenate([h1n, h2], axis=-1)     # lane-aligned vreg placement
        g2 = jnp.dot(xh, w2_ref[...], preferred_element_type=f32) + b2b
        h2n_f, c2n = gates_to_hc(g2, c2)
        h2n = h2n_f.astype(bf16)
        if has_tail:
            # Freeze state on padded trailing timesteps of the last block.
            valid = (blk * Tb + t) < t_total
            h1n = jnp.where(valid, h1n, h1)
            c1n = jnp.where(valid, c1n, c1)
            h2n = jnp.where(valid, h2n, h2)
            c2n = jnp.where(valid, c2n, c2)
        return h1n, c1n, h2n, c2n

    carry0 = (h1_ref[...], c1_ref[...], h2_ref[...], c2_ref[...])
    unroll = Tb if Tb <= 8 else 8
    h1f, c1f, h2f, c2f = jax.lax.fori_loop(0, Tb, step, carry0, unroll=unroll)

    # Spill state to VMEM only at block exit (cross-grid-step carry).
    # TODO(synk): for very large Bp (carries exceed the 64-vreg file) switch back to
    # a scratch-resident state path.
    h1_ref[...] = h1f
    c1_ref[...] = c1f
    h2_ref[...] = h2f
    c2_ref[...] = c2f

    @pl.when(blk == pl.num_programs(0) - 1)
    def _final():
        out_ref[...] = h2f.astype(f32)


def lstm_model_forward(tokens, params, *, hidden_dim, num_classes):
    """tokens: (B, T) int32 -> logits (B, num_classes) float32."""
    del num_classes  # implied by params["w_fc"]
    B, T = tokens.shape
    H = hidden_dim
    emb = params["embedding"]                         # (V, E)
    E = emb.shape[1]
    f32, bf16 = jnp.float32, jnp.bfloat16

    Hp = _round_up(max(H, 128), 128)                  # lane-aligned gate blocks
    Ep = _round_up(max(E, 128), 128)                  # lane-aligned input features
    # TODO(synk): for best MXU utilization batch more sequences per call (Bp -> 128+);
    # on v7x additionally add a leading "parallel" batch-block grid axis (init/final
    # re-keyed to the time axis) so both TensorCores run independent batch shards.
    Bp = _round_up(max(B, 8), 8)                      # sublane-aligned batch
    Tb = _choose_time_block(T, Bp, Ep, Hp)            # timesteps per grid step
    n_blocks = -(-T // Tb)
    Tp = n_blocks * Tb

    def pad_gate_cols(w):                             # (in, 4H) -> (in, 4Hp)
        return jnp.pad(w.reshape(w.shape[0], 4, H),
                       ((0, 0), (0, 0), (0, Hp - H))).reshape(w.shape[0], 4 * Hp)

    def pad_rows(w, rows):                            # (r, X) -> (rows, X)
        return jnp.pad(w, ((0, rows - w.shape[0]), (0, 0)))

    def pad_bias(b):                                  # (4H,) -> (1, 4Hp)
        return jnp.pad(b.reshape(4, H), ((0, 0), (0, Hp - H))).reshape(1, 4 * Hp)

    # ----- weight prep (glue); PyTorch stores (4H, in) / (C, H) -----
    wih1 = pad_rows(pad_gate_cols(params["w_ih1"].T), Ep).astype(bf16)   # (Ep, 4Hp)
    whh1 = pad_rows(pad_gate_cols(params["w_hh1"].T), Hp).astype(bf16)   # (Hp, 4Hp)
    b1 = pad_bias(params["b_ih1"] + params["b_hh1"]).astype(f32)         # (1, 4Hp)
    wih2 = pad_rows(pad_gate_cols(params["w_ih2"].T), Hp)                # (Hp, 4Hp)
    whh2 = pad_rows(pad_gate_cols(params["w_hh2"].T), Hp)                # (Hp, 4Hp)
    w2 = jnp.concatenate([wih2, whh2], axis=0).astype(bf16)              # (2Hp, 4Hp)
    b2 = pad_bias(params["b_ih2"] + params["b_hh2"]).astype(f32)         # (1, 4Hp)

    # ----- embedding lookup (glue gather); stream bf16 embedded inputs to the
    # kernel instead of an f32 (T, Bp, 4Hp) gate tensor (~10x fewer HBM bytes). -----
    x = jnp.take(emb, tokens, axis=0)                 # (B, T, E) f32
    x = jnp.transpose(x, (1, 0, 2))                   # (T, B, E) time-major
    x = jnp.pad(x, ((0, Tp - T), (0, Bp - B), (0, Ep - E)))  # (Tp, Bp, Ep)
    x = x.reshape(Tp * Bp, Ep).astype(bf16)           # 2D, lane-dense, bf16

    kernel = functools.partial(_lstm_kernel, hidden_pad=Hp, t_block=Tb, t_total=T)

    h_last = pl.pallas_call(
        kernel,
        out_shape=jax.ShapeDtypeStruct((Bp, Hp), f32),
        grid_spec=pltpu.PrefetchScalarGridSpec(
            num_scalar_prefetch=0,
            grid=(n_blocks,),
            in_specs=[
                pl.BlockSpec((Tb * Bp, Ep), lambda i: (i, 0)),      # x block (streamed)
                pl.BlockSpec((Ep, 4 * Hp), lambda i: (0, 0)),       # wih1 (resident)
                pl.BlockSpec((1, 4 * Hp), lambda i: (0, 0)),        # b1
                pl.BlockSpec((Hp, 4 * Hp), lambda i: (0, 0)),       # whh1 (resident)
                pl.BlockSpec((2 * Hp, 4 * Hp), lambda i: (0, 0)),   # fused w2
                pl.BlockSpec((1, 4 * Hp), lambda i: (0, 0)),        # b2
            ],
            out_specs=pl.BlockSpec((Bp, Hp), lambda i: (0, 0)),
            scratch_shapes=[
                pltpu.VMEM((Tb * Bp, 4 * Hp), f32),   # per-block layer-1 gates
                pltpu.VMEM((Bp, Hp), bf16),           # h1 cross-block carry
                pltpu.VMEM((Bp, Hp), f32),            # c1
                pltpu.VMEM((Bp, Hp), bf16),           # h2
                pltpu.VMEM((Bp, Hp), f32),            # c2
            ],
        ),
        compiler_params=pltpu.CompilerParams(
            dimension_semantics=("arbitrary",),       # sequential recurrence over time
            vmem_limit_bytes=48 * 1024 * 1024),       # fits all gens incl. v7x (64 MiB)
    )(x, wih1, b1, whh1, w2, b2)

    # ----- final FC (glue): tiny (H -> C) linear kept out of the kernel so the
    # kernel output stays lane-dense. -----
    h_last = h_last[:B, :H]
    return h_last @ params["w_fc"].T + params["b_fc"]


def init_params(key, vocab_size, embedding_dim, hidden_dim, num_classes):
    """Deterministic synthetic init mimicking PyTorch shapes (nn.Embedding/LSTM/Linear)."""
    E, H, C = embedding_dim, hidden_dim, num_classes
    ks = jax.random.split(key, 12)
    u = lambda k, shape, bound: jax.random.uniform(
        k, shape, jnp.float32, -bound, bound)
    bh = 1.0 / jnp.sqrt(H)
    return {
        "embedding": jax.random.normal(ks[0], (vocab_size, E), jnp.float32),
        "w_ih1": u(ks[1], (4 * H, E), bh),
        "w_hh1": u(ks[2], (4 * H, H), bh),
        "b_ih1": u(ks[3], (4 * H,), bh),
        "b_hh1": u(ks[4], (4 * H,), bh),
        "w_ih2": u(ks[5], (4 * H, H), bh),
        "w_hh2": u(ks[6], (4 * H, H), bh),
        "b_ih2": u(ks[7], (4 * H,), bh),
        "b_hh2": u(ks[8], (4 * H,), bh),
        "w_fc": u(ks[9], (C, H), 1.0 / jnp.sqrt(H)),
        "b_fc": u(ks[10], (C,), 1.0 / jnp.sqrt(H)),
    }


def _reference_forward(tokens, params, hidden_dim):
    """Pure-JAX f32 reference (lax.scan) for a sanity check."""
    H = hidden_dim
    emb = jnp.take(params["embedding"], tokens, axis=0)  # (B, T, E)

    def run_lstm(xs, w_ih, w_hh, b_ih, b_hh):
        B = xs.shape[0]
        def step(carry, x_t):
            h, c = carry
            gates = x_t @ w_ih.T + h @ w_hh.T + b_ih + b_hh
            i, f, g, o = jnp.split(gates, 4, axis=-1)
            c = jax.nn.sigmoid(f) * c + jax.nn.sigmoid(i) * jnp.tanh(g)
            h = jax.nn.sigmoid(o) * jnp.tanh(c)
            return (h, c), h
        init = (jnp.zeros((B, H), jnp.float32), jnp.zeros((B, H), jnp.float32))
        _, hs = jax.lax.scan(step, init, jnp.transpose(xs, (1, 0, 2)))
        return jnp.transpose(hs, (1, 0, 2))

    o1 = run_lstm(emb, params["w_ih1"], params["w_hh1"],
                  params["b_ih1"], params["b_hh1"])
    o2 = run_lstm(o1, params["w_ih2"], params["w_hh2"],
                  params["b_ih2"], params["b_hh2"])
    last = o2[:, -1, :]
    return last @ params["w_fc"].T + params["b_fc"]


if __name__ == "__main__":
    # Small shapes consistent with the module: embedding_dim=100, hidden_dim=64,
    # num_classes=3 (len(set(labels))), synthetic vocab, batch=2, seq=8.
    vocab_size = 50
    embedding_dim = 100
    hidden_dim = 64
    num_classes = 3
    batch, seq = 2, 8

    key = jax.random.PRNGKey(0)
    pkey, tkey = jax.random.split(key)
    params = init_params(pkey, vocab_size, embedding_dim, hidden_dim, num_classes)
    tokens = jax.random.randint(tkey, (batch, seq), 0, vocab_size, dtype=jnp.int32)

    logits = lstm_model_forward(tokens, params,
                                hidden_dim=hidden_dim, num_classes=num_classes)
    logits = jax.block_until_ready(logits)

    ref = _reference_forward(tokens, params, hidden_dim)
    assert logits.shape == (batch, num_classes)
    # bf16 matmul inputs (f32 accumulation) -> tolerance loosened vs. the f32 reference.
    assert jnp.allclose(logits, ref, atol=2e-2, rtol=2e-2), "mismatch vs reference"

    print("KERNEL_OK")
</pallas_src>

<mosaic_0001>
module attributes {stable_mosaic.version = 11 : i64} {
  func.func @_lstm_kernel(%arg0: i32, %arg1: memref<64x128xbf16, #tpu.memory_space<vmem>>, %arg2: memref<128x512xbf16, #tpu.memory_space<vmem>>, %arg3: memref<1x512xf32, #tpu.memory_space<vmem>>, %arg4: memref<128x512xbf16, #tpu.memory_space<vmem>>, %arg5: memref<256x512xbf16, #tpu.memory_space<vmem>>, %arg6: memref<1x512xf32, #tpu.memory_space<vmem>>, %arg7: memref<8x128xf32, #tpu.memory_space<vmem>>, %arg8: memref<64x512xf32, #tpu.memory_space<vmem>>, %arg9: memref<8x128xbf16, #tpu.memory_space<vmem>>, %arg10: memref<8x128xf32, #tpu.memory_space<vmem>>, %arg11: memref<8x128xbf16, #tpu.memory_space<vmem>>, %arg12: memref<8x128xf32, #tpu.memory_space<vmem>>) attributes {dimension_semantics = [#tpu.dimension_semantics<arbitrary>], iteration_bounds = array<i64: 1>, scalar_prefetch = 0 : i64, scratch_operands = 5 : i64, tpu.core_type = #tpu.core_type<tc>, window_params = [{transform_indices = @transform_0, window_bounds = array<i64: 64, 128>}, {pipeline_mode = #tpu.pipeline_mode<synchronous>, transform_indices = @transform_1, window_bounds = array<i64: 128, 512>}, {pipeline_mode = #tpu.pipeline_mode<synchronous>, transform_indices = @transform_2, window_bounds = array<i64: 1, 512>}, {pipeline_mode = #tpu.pipeline_mode<synchronous>, transform_indices = @transform_3, window_bounds = array<i64: 128, 512>}, {pipeline_mode = #tpu.pipeline_mode<synchronous>, transform_indices = @transform_4, window_bounds = array<i64: 256, 512>}, {pipeline_mode = #tpu.pipeline_mode<synchronous>, transform_indices = @transform_5, window_bounds = array<i64: 1, 512>}, {pipeline_mode = #tpu.pipeline_mode<synchronous>, transform_indices = @transform_6, window_bounds = array<i64: 8, 128>}]} {
    %c0_i32 = arith.constant 0 : i32
    %0 = arith.cmpi eq, %arg0, %c0_i32 : i32
    %1 = arith.extui %0 : i1 to i32
    %c0_i32_0 = arith.constant 0 : i32
    %2 = arith.cmpi ne, %1, %c0_i32_0 : i32
    scf.if %2 {
      %cst_141 = arith.constant 0.000000e+00 : bf16
      %528 = vector.broadcast %cst_141 : bf16 to vector<8x128xbf16>
      %c0_142 = arith.constant 0 : index
      %c0_143 = arith.constant 0 : index
      %529 = vector.load %arg9[%c0_142, %c0_143] : memref<8x128xbf16, #tpu.memory_space<vmem>>, vector<8x128xbf16>
      tpu.vector_store %arg9[%c0_142, %c0_143], %528 {strides = array<i32>} : memref<8x128xbf16, #tpu.memory_space<vmem>>, vector<8x128xbf16>,
      %cst_144 = arith.constant 0.000000e+00 : f32
      %530 = vector.broadcast %cst_144 : f32 to vector<8x128xf32>
      %c0_145 = arith.constant 0 : index
      %c0_146 = arith.constant 0 : index
      %531 = vector.load %arg10[%c0_145, %c0_146] : memref<8x128xf32, #tpu.memory_space<vmem>>, vector<8x128xf32>
      tpu.vector_store %arg10[%c0_145, %c0_146], %530 {strides = array<i32>} : memref<8x128xf32, #tpu.memory_space<vmem>>, vector<8x128xf32>,
      %cst_147 = arith.constant 0.000000e+00 : bf16
      %532 = vector.broadcast %cst_147 : bf16 to vector<8x128xbf16>
      %c0_148 = arith.constant 0 : index
      %c0_149 = arith.constant 0 : index
      %533 = vector.load %arg11[%c0_148, %c0_149] : memref<8x128xbf16, #tpu.memory_space<vmem>>, vector<8x128xbf16>
      tpu.vector_store %arg11[%c0_148, %c0_149], %532 {strides = array<i32>} : memref<8x128xbf16, #tpu.memory_space<vmem>>, vector<8x128xbf16>,
      %cst_150 = arith.constant 0.000000e+00 : f32
      %534 = vector.broadcast %cst_150 : f32 to vector<8x128xf32>
      %c0_151 = arith.constant 0 : index
      %c0_152 = arith.constant 0 : index
      %535 = vector.load %arg12[%c0_151, %c0_152] : memref<8x128xf32, #tpu.memory_space<vmem>>, vector<8x128xf32>
      tpu.vector_store %arg12[%c0_151, %c0_152], %534 {strides = array<i32>} : memref<8x128xf32, #tpu.memory_space<vmem>>, vector<8x128xf32>,
    } else {
    }
    %c0 = arith.constant 0 : index
    %c0_1 = arith.constant 0 : index
    %3 = vector.load %arg1[%c0, %c0_1] : memref<64x128xbf16, #tpu.memory_space<vmem>>, vector<64x128xbf16>
    %c0_2 = arith.constant 0 : index
    %c0_3 = arith.constant 0 : index
    %4 = vector.load %arg2[%c0_2, %c0_3] : memref<128x512xbf16, #tpu.memory_space<vmem>>, vector<128x512xbf16>
    %cst = arith.constant dense<0.000000e+00> : vector<64x512xf32>
    %5 = tpu.matmul %3, %4, %cst {dimension_numbers = #tpu.dot_dimension_numbers<[1], [0], [0], [1], [0, 0, 1, 1], [], []>} : vector<64x128xbf16>, vector<128x512xbf16>, vector<64x512xf32> -> vector<64x512xf32>
    %c0_4 = arith.constant 0 : index
    %c0_5 = arith.constant 0 : index
    %6 = vector.load %arg3[%c0_4, %c0_5] : memref<1x512xf32, #tpu.memory_space<vmem>>, vector<1x512xf32>
    %7 = vector.broadcast %6 : vector<1x512xf32> to vector<64x512xf32>
    %8 = arith.addf %5, %7 : vector<64x512xf32>
    %c0_6 = arith.constant 0 : index
    %c0_7 = arith.constant 0 : index
    %9 = vector.load %arg8[%c0_6, %c0_7] : memref<64x512xf32, #tpu.memory_space<vmem>>, vector<64x512xf32>
    tpu.vector_store %arg8[%c0_6, %c0_7], %8 {strides = array<i32>} : memref<64x512xf32, #tpu.memory_space<vmem>>, vector<64x512xf32>,
    %c0_8 = arith.constant 0 : index
    %c0_9 = arith.constant 0 : index
    %10 = vector.load %arg6[%c0_8, %c0_9] : memref<1x512xf32, #tpu.memory_space<vmem>>, vector<1x512xf32>
    %11 = vector.shape_cast %10 : vector<1x512xf32> to vector<1x512xf32>
    %12 = vector.broadcast %11 : vector<1x512xf32> to vector<8x512xf32>
    %c0_10 = arith.constant 0 : index
    %c0_11 = arith.constant 0 : index
    %13 = vector.load %arg9[%c0_10, %c0_11] : memref<8x128xbf16, #tpu.memory_space<vmem>>, vector<8x128xbf16>
    %c0_12 = arith.constant 0 : index
    %c0_13 = arith.constant 0 : index
    %14 = vector.load %arg10[%c0_12, %c0_13] : memref<8x128xf32, #tpu.memory_space<vmem>>, vector<8x128xf32>
    %c0_14 = arith.constant 0 : index
    %c0_15 = arith.constant 0 : index
    %15 = vector.load %arg11[%c0_14, %c0_15] : memref<8x128xbf16, #tpu.memory_space<vmem>>, vector<8x128xbf16>
    %c0_16 = arith.constant 0 : index
    %c0_17 = arith.constant 0 : index
    %16 = vector.load %arg12[%c0_16, %c0_17] : memref<8x128xf32, #tpu.memory_space<vmem>>, vector<8x128xf32>
    %c0_i32_18 = arith.constant 0 : i32
    %c8_i32 = arith.constant 8 : i32
    %17 = arith.muli %c0_i32_18, %c8_i32 : i32
    %18 = tpu.assume_multiple %17, 8 : i32
    %19 = arith.index_cast %18 : i32 to index
    %c0_19 = arith.constant 0 : index
    %20 = vector.load %arg8[%19, %c0_19] : memref<64x512xf32, #tpu.memory_space<vmem>>, vector<8x512xf32>
    %c0_20 = arith.constant 0 : index
    %c0_21 = arith.constant 0 : index
    %21 = vector.load %arg4[%c0_20, %c0_21] : memref<128x512xbf16, #tpu.memory_space<vmem>>, vector<128x512xbf16>
    %cst_22 = arith.constant dense<0.000000e+00> : vector<8x512xf32>
    %22 = tpu.matmul %13, %21, %cst_22 {dimension_numbers = #tpu.dot_dimension_numbers<[1], [0], [0], [1], [0, 0, 1, 1], [], []>} : vector<8x128xbf16>, vector<128x512xbf16>, vector<8x512xf32> -> vector<8x512xf32>
    %23 = arith.addf %20, %22 : vector<8x512xf32>
    %24 = vector.extract_strided_slice %23 {offsets = [0, 0], sizes = [8, 128], strides = [1, 1]} : vector<8x512xf32> to vector<8x128xf32>
    %25 = arith.negf %24 : vector<8x128xf32>
    %26 = math.exp %25 : vector<8x128xf32>
    %cst_23 = arith.constant 1.000000e+00 : f32
    %27 = vector.broadcast %cst_23 : f32 to vector<8x128xf32>
    %28 = arith.addf %27, %26 : vector<8x128xf32>
    %29 = arith.divf %27, %28 : vector<8x128xf32>
    %30 = vector.extract_strided_slice %23 {offsets = [0, 128], sizes = [8, 128], strides = [1, 1]} : vector<8x512xf32> to vector<8x128xf32>
    %31 = arith.negf %30 : vector<8x128xf32>
    %32 = math.exp %31 : vector<8x128xf32>
    %cst_24 = arith.constant 1.000000e+00 : f32
    %33 = vector.broadcast %cst_24 : f32 to vector<8x128xf32>
    %34 = arith.addf %33, %32 : vector<8x128xf32>
    %35 = arith.divf %33, %34 : vector<8x128xf32>
    %36 = vector.extract_strided_slice %23 {offsets = [0, 256], sizes = [8, 128], strides = [1, 1]} : vector<8x512xf32> to vector<8x128xf32>
    %37 = math.tanh %36 : vector<8x128xf32>
    %38 = vector.extract_strided_slice %23 {offsets = [0, 384], sizes = [8, 128], strides = [1, 1]} : vector<8x512xf32> to vector<8x128xf32>
    %39 = arith.negf %38 : vector<8x128xf32>
    %40 = math.exp %39 : vector<8x128xf32>
    %cst_25 = arith.constant 1.000000e+00 : f32
    %41 = vector.broadcast %cst_25 : f32 to vector<8x128xf32>
    %42 = arith.addf %41, %40 : vector<8x128xf32>
    %43 = arith.divf %41, %42 : vector<8x128xf32>
    %44 = arith.mulf %35, %14 : vector<8x128xf32>
    %45 = arith.mulf %29, %37 : vector<8x128xf32>
    %46 = arith.addf %44, %45 : vector<8x128xf32>
    %47 = math.tanh %46 : vector<8x128xf32>
    %48 = arith.mulf %43, %47 : vector<8x128xf32>
    %49 = arith.truncf %48 : vector<8x128xf32> to vector<8x128xbf16>
    %50 = tpu.concatenate %49, %15 in 1 : vector<8x128xbf16>, vector<8x128xbf16> -> vector<8x256xbf16>
    %c0_26 = arith.constant 0 : index
    %c0_27 = arith.constant 0 : index
    %51 = vector.load %arg5[%c0_26, %c0_27] : memref<256x512xbf16, #tpu.memory_space<vmem>>, vector<256x512xbf16>
    %cst_28 = arith.constant dense<0.000000e+00> : vector<8x512xf32>
    %52 = tpu.matmul %50, %51, %cst_28 {dimension_numbers = #tpu.dot_dimension_numbers<[1], [0], [0], [1], [0, 0, 1, 1], [], []>} : vector<8x256xbf16>, vector<256x512xbf16>, vector<8x512xf32> -> vector<8x512xf32>
    %53 = arith.addf %52, %12 : vector<8x512xf32>
    %54 = vector.extract_strided_slice %53 {offsets = [0, 0], sizes = [8, 128], strides = [1, 1]} : vector<8x512xf32> to vector<8x128xf32>
    %55 = arith.negf %54 : vector<8x128xf32>
    %56 = math.exp %55 : vector<8x128xf32>
    %cst_29 = arith.constant 1.000000e+00 : f32
    %57 = vector.broadcast %cst_29 : f32 to vector<8x128xf32>
    %58 = arith.addf %57, %56 : vector<8x128xf32>
    %59 = arith.divf %57, %58 : vector<8x128xf32>
    %60 = vector.extract_strided_slice %53 {offsets = [0, 128], sizes = [8, 128], strides = [1, 1]} : vector<8x512xf32> to vector<8x128xf32>
    %61 = arith.negf %60 : vector<8x128xf32>
    %62 = math.exp %61 : vector<8x128xf32>
    %cst_30 = arith.constant 1.000000e+00 : f32
    %63 = vector.broadcast %cst_30 : f32 to vector<8x128xf32>
    %64 = arith.addf %63, %62 : vector<8x128xf32>
    %65 = arith.divf %63, %64 : vector<8x128xf32>
    %66 = vector.extract_strided_slice %53 {offsets = [0, 256], sizes = [8, 128], strides = [1, 1]} : vector<8x512xf32> to vector<8x128xf32>
    %67 = math.tanh %66 : vector<8x128xf32>
    %68 = vector.extract_strided_slice %53 {offsets = [0, 384], sizes = [8, 128], strides = [1, 1]} : vector<8x512xf32> to vector<8x128xf32>
    %69 = arith.negf %68 : vector<8x128xf32>
    %70 = math.exp %69 : vector<8x128xf32>
    %cst_31 = arith.constant 1.000000e+00 : f32
    %71 = vector.broadcast %cst_31 : f32 to vector<8x128xf32>
    %72 = arith.addf %71, %70 : vector<8x128xf32>
    %73 = arith.divf %71, %72 : vector<8x128xf32>
    %74 = arith.mulf %65, %16 : vector<8x128xf32>
    %75 = arith.mulf %59, %67 : vector<8x128xf32>
    %76 = arith.addf %74, %75 : vector<8x128xf32>
    %77 = math.tanh %76 : vector<8x128xf32>
    %78 = arith.mulf %73, %77 : vector<8x128xf32>
    %79 = arith.truncf %78 : vector<8x128xf32> to vector<8x128xbf16>
    %c1_i32 = arith.constant 1 : i32
    %c8_i32_32 = arith.constant 8 : i32
    %80 = arith.muli %c1_i32, %c8_i32_32 : i32
    %81 = tpu.assume_multiple %80, 8 : i32
    %82 = arith.index_cast %81 : i32 to index
    %c0_33 = arith.constant 0 : index
    %83 = vector.load %arg8[%82, %c0_33] : memref<64x512xf32, #tpu.memory_space<vmem>>, vector<8x512xf32>
    %c0_34 = arith.constant 0 : index
    %c0_35 = arith.constant 0 : index
    %84 = vector.load %arg4[%c0_34, %c0_35] : memref<128x512xbf16, #tpu.memory_space<vmem>>, vector<128x512xbf16>
    %cst_36 = arith.constant dense<0.000000e+00> : vector<8x512xf32>
    %85 = tpu.matmul %49, %84, %cst_36 {dimension_numbers = #tpu.dot_dimension_numbers<[1], [0], [0], [1], [0, 0, 1, 1], [], []>} : vector<8x128xbf16>, vector<128x512xbf16>, vector<8x512xf32> -> vector<8x512xf32>
    %86 = arith.addf %83, %85 : vector<8x512xf32>
    %87 = vector.extract_strided_slice %86 {offsets = [0, 0], sizes = [8, 128], strides = [1, 1]} : vector<8x512xf32> to vector<8x128xf32>
    %88 = arith.negf %87 : vector<8x128xf32>
    %89 = math.exp %88 : vector<8x128xf32>
    %cst_37 = arith.constant 1.000000e+00 : f32
    %90 = vector.broadcast %cst_37 : f32 to vector<8x128xf32>
    %91 = arith.addf %90, %89 : vector<8x128xf32>
    %92 = arith.divf %90, %91 : vector<8x128xf32>
    %93 = vector.extract_strided_slice %86 {offsets = [0, 128], sizes = [8, 128], strides = [1, 1]} : vector<8x512xf32> to vector<8x128xf32>
    %94 = arith.negf %93 : vector<8x128xf32>
    %95 = math.exp %94 : vector<8x128xf32>
    %cst_38 = arith.constant 1.000000e+00 : f32
    %96 = vector.broadcast %cst_38 : f32 to vector<8x128xf32>
    %97 = arith.addf %96, %95 : vector<8x128xf32>
    %98 = arith.divf %96, %97 : vector<8x128xf32>
    %99 = vector.extract_strided_slice %86 {offsets = [0, 256], sizes = [8, 128], strides = [1, 1]} : vector<8x512xf32> to vector<8x128xf32>
    %100 = math.tanh %99 : vector<8x128xf32>
    %101 = vector.extract_strided_slice %86 {offsets = [0, 384], sizes = [8, 128], strides = [1, 1]} : vector<8x512xf32> to vector<8x128xf32>
    %102 = arith.negf %101 : vector<8x128xf32>
    %103 = math.exp %102 : vector<8x128xf32>
    %cst_39 = arith.constant 1.000000e+00 : f32
    %104 = vector.broadcast %cst_39 : f32 to vector<8x128xf32>
    %105 = arith.addf %104, %103 : vector<8x128xf32>
    %106 = arith.divf %104, %105 : vector<8x128xf32>
    %107 = arith.mulf %98, %46 : vector<8x128xf32>
    %108 = arith.mulf %92, %100 : vector<8x128xf32>
    %109 = arith.addf %107, %108 : vector<8x128xf32>
    %110 = math.tanh %109 : vector<8x128xf32>
    %111 = arith.mulf %106, %110 : vector<8x128xf32>
    %112 = arith.truncf %111 : vector<8x128xf32> to vector<8x128xbf16>
    %113 = tpu.concatenate %112, %79 in 1 : vector<8x128xbf16>, vector<8x128xbf16> -> vector<8x256xbf16>
    %c0_40 = arith.constant 0 : index
    %c0_41 = arith.constant 0 : index
    %114 = vector.load %arg5[%c0_40, %c0_41] : memref<256x512xbf16, #tpu.memory_space<vmem>>, vector<256x512xbf16>
    %cst_42 = arith.constant dense<0.000000e+00> : vector<8x512xf32>
    %115 = tpu.matmul %113, %114, %cst_42 {dimension_numbers = #tpu.dot_dimension_numbers<[1], [0], [0], [1], [0, 0, 1, 1], [], []>} : vector<8x256xbf16>, vector<256x512xbf16>, vector<8x512xf32> -> vector<8x512xf32>
    %116 = arith.addf %115, %12 : vector<8x512xf32>
    %117 = vector.extract_strided_slice %116 {offsets = [0, 0], sizes = [8, 128], strides = [1, 1]} : vector<8x512xf32> to vector<8x128xf32>
    %118 = arith.negf %117 : vector<8x128xf32>
    %119 = math.exp %118 : vector<8x128xf32>
    %cst_43 = arith.constant 1.000000e+00 : f32
    %120 = vector.broadcast %cst_43 : f32 to vector<8x128xf32>
    %121 = arith.addf %120, %119 : vector<8x128xf32>
    %122 = arith.divf %120, %121 : vector<8x128xf32>
    %123 = vector.extract_strided_slice %116 {offsets = [0, 128], sizes = [8, 128], strides = [1, 1]} : vector<8x512xf32> to vector<8x128xf32>
    %124 = arith.negf %123 : vector<8x128xf32>
    %125 = math.exp %124 : vector<8x128xf32>
    %cst_44 = arith.constant 1.000000e+00 : f32
    %126 = vector.broadcast %cst_44 : f32 to vector<8x128xf32>
    %127 = arith.addf %126, %125 : vector<8x128xf32>
    %128 = arith.divf %126, %127 : vector<8x128xf32>
    %129 = vector.extract_strided_slice %116 {offsets = [0, 256], sizes = [8, 128], strides = [1, 1]} : vector<8x512xf32> to vector<8x128xf32>
    %130 = math.tanh %129 : vector<8x128xf32>
    %131 = vector.extract_strided_slice %116 {offsets = [0, 384], sizes = [8, 128], strides = [1, 1]} : vector<8x512xf32> to vector<8x128xf32>
    %132 = arith.negf %131 : vector<8x128xf32>
    %133 = math.exp %132 : vector<8x128xf32>
    %cst_45 = arith.constant 1.000000e+00 : f32
    %134 = vector.broadcast %cst_45 : f32 to vector<8x128xf32>
    %135 = arith.addf %134, %133 : vector<8x128xf32>
    %136 = arith.divf %134, %135 : vector<8x128xf32>
    %137 = arith.mulf %128, %76 : vector<8x128xf32>
    %138 = arith.mulf %122, %130 : vector<8x128xf32>
    %139 = arith.addf %137, %138 : vector<8x128xf32>
    %140 = math.tanh %139 : vector<8x128xf32>
    %141 = arith.mulf %136, %140 : vector<8x128xf32>
    %142 = arith.truncf %141 : vector<8x128xf32> to vector<8x128xbf16>
    %c2_i32 = arith.constant 2 : i32
    %c8_i32_46 = arith.constant 8 : i32
    %143 = arith.muli %c2_i32, %c8_i32_46 : i32
    %144 = tpu.assume_multiple %143, 8 : i32
    %145 = arith.index_cast %144 : i32 to index
    %c0_47 = arith.constant 0 : index
    %146 = vector.load %arg8[%145, %c0_47] : memref<64x512xf32, #tpu.memory_space<vmem>>, vector<8x512xf32>
    %c0_48 = arith.constant 0 : index
    %c0_49 = arith.constant 0 : index
    %147 = vector.load %arg4[%c0_48, %c0_49] : memref<128x512xbf16, #tpu.memory_space<vmem>>, vector<128x512xbf16>
    %cst_50 = arith.constant dense<0.000000e+00> : vector<8x512xf32>
    %148 = tpu.matmul %112, %147, %cst_50 {dimension_numbers = #tpu.dot_dimension_numbers<[1], [0], [0], [1], [0, 0, 1, 1], [], []>} : vector<8x128xbf16>, vector<128x512xbf16>, vector<8x512xf32> -> vector<8x512xf32>
    %149 = arith.addf %146, %148 : vector<8x512xf32>
    %150 = vector.extract_strided_slice %149 {offsets = [0, 0], sizes = [8, 128], strides = [1, 1]} : vector<8x512xf32> to vector<8x128xf32>
    %151 = arith.negf %150 : vector<8x128xf32>
    %152 = math.exp %151 : vector<8x128xf32>
    %cst_51 = arith.constant 1.000000e+00 : f32
    %153 = vector.broadcast %cst_51 : f32 to vector<8x128xf32>
    %154 = arith.addf %153, %152 : vector<8x128xf32>
    %155 = arith.divf %153, %154 : vector<8x128xf32>
    %156 = vector.extract_strided_slice %149 {offsets = [0, 128], sizes = [8, 128], strides = [1, 1]} : vector<8x512xf32> to vector<8x128xf32>
    %157 = arith.negf %156 : vector<8x128xf32>
    %158 = math.exp %157 : vector<8x128xf32>
    %cst_52 = arith.constant 1.000000e+00 : f32
    %159 = vector.broadcast %cst_52 : f32 to vector<8x128xf32>
    %160 = arith.addf %159, %158 : vector<8x128xf32>
    %161 = arith.divf %159, %160 : vector<8x128xf32>
    %162 = vector.extract_strided_slice %149 {offsets = [0, 256], sizes = [8, 128], strides = [1, 1]} : vector<8x512xf32> to vector<8x128xf32>
    %163 = math.tanh %162 : vector<8x128xf32>
    %164 = vector.extract_strided_slice %149 {offsets = [0, 384], sizes = [8, 128], strides = [1, 1]} : vector<8x512xf32> to vector<8x128xf32>
    %165 = arith.negf %164 : vector<8x128xf32>
    %166 = math.exp %165 : vector<8x128xf32>
    %cst_53 = arith.constant 1.000000e+00 : f32
    %167 = vector.broadcast %cst_53 : f32 to vector<8x128xf32>
    %168 = arith.addf %167, %166 : vector<8x128xf32>
    %169 = arith.divf %167, %168 : vector<8x128xf32>
    %170 = arith.mulf %161, %109 : vector<8x128xf32>
    %171 = arith.mulf %155, %163 : vector<8x128xf32>
    %172 = arith.addf %170, %171 : vector<8x128xf32>
    %173 = math.tanh %172 : vector<8x128xf32>
    %174 = arith.mulf %169, %173 : vector<8x128xf32>
    %175 = arith.truncf %174 : vector<8x128xf32> to vector<8x128xbf16>
    %176 = tpu.concatenate %175, %142 in 1 : vector<8x128xbf16>, vector<8x128xbf16> -> vector<8x256xbf16>
    %c0_54 = arith.constant 0 : index
    %c0_55 = arith.constant 0 : index
    %177 = vector.load %arg5[%c0_54, %c0_55] : memref<256x512xbf16, #tpu.memory_space<vmem>>, vector<256x512xbf16>
    %cst_56 = arith.constant dense<0.000000e+00> : vector<8x512xf32>
    %178 = tpu.matmul %176, %177, %cst_56 {dimension_numbers = #tpu.dot_dimension_numbers<[1], [0], [0], [1], [0, 0, 1, 1], [], []>} : vector<8x256xbf16>, vector<256x512xbf16>, vector<8x512xf32> -> vector<8x512xf32>
    %179 = arith.addf %178, %12 : vector<8x512xf32>
    %180 = vector.extract_strided_slice %179 {offsets = [0, 0], sizes = [8, 128], strides = [1, 1]} : vector<8x512xf32> to vector<8x128xf32>
    %181 = arith.negf %180 : vector<8x128xf32>
    %182 = math.exp %181 : vector<8x128xf32>
    %cst_57 = arith.constant 1.000000e+00 : f32
    %183 = vector.broadcast %cst_57 : f32 to vector<8x128xf32>
    %184 = arith.addf %183, %182 : vector<8x128xf32>
    %185 = arith.divf %183, %184 : vector<8x128xf32>
    %186 = vector.extract_strided_slice %179 {offsets = [0, 128], sizes = [8, 128], strides = [1, 1]} : vector<8x512xf32> to vector<8x128xf32>
    %187 = arith.negf %186 : vector<8x128xf32>
    %188 = math.exp %187 : vector<8x128xf32>
    %cst_58 = arith.constant 1.000000e+00 : f32
    %189 = vector.broadcast %cst_58 : f32 to vector<8x128xf32>
    %190 = arith.addf %189, %188 : vector<8x128xf32>
    %191 = arith.divf %189, %190 : vector<8x128xf32>
    %192 = vector.extract_strided_slice %179 {offsets = [0, 256], sizes = [8, 128], strides = [1, 1]} : vector<8x512xf32> to vector<8x128xf32>
    %193 = math.tanh %192 : vector<8x128xf32>
    %194 = vector.extract_strided_slice %179 {offsets = [0, 384], sizes = [8, 128], strides = [1, 1]} : vector<8x512xf32> to vector<8x128xf32>
    %195 = arith.negf %194 : vector<8x128xf32>
    %196 = math.exp %195 : vector<8x128xf32>
    %cst_59 = arith.constant 1.000000e+00 : f32
    %197 = vector.broadcast %cst_59 : f32 to vector<8x128xf32>
    %198 = arith.addf %197, %196 : vector<8x128xf32>
    %199 = arith.divf %197, %198 : vector<8x128xf32>
    %200 = arith.mulf %191, %139 : vector<8x128xf32>
    %201 = arith.mulf %185, %193 : vector<8x128xf32>
    %202 = arith.addf %200, %201 : vector<8x128xf32>
    %203 = math.tanh %202 : vector<8x128xf32>
    %204 = arith.mulf %199, %203 : vector<8x128xf32>
    %205 = arith.truncf %204 : vector<8x128xf32> to vector<8x128xbf16>
    %c3_i32 = arith.constant 3 : i32
    %c8_i32_60 = arith.constant 8 : i32
    %206 = arith.muli %c3_i32, %c8_i32_60 : i32
    %207 = tpu.assume_multiple %206, 8 : i32
    %208 = arith.index_cast %207 : i32 to index
    %c0_61 = arith.constant 0 : index
    %209 = vector.load %arg8[%208, %c0_61] : memref<64x512xf32, #tpu.memory_space<vmem>>, vector<8x512xf32>
    %c0_62 = arith.constant 0 : index
    %c0_63 = arith.constant 0 : index
    %210 = vector.load %arg4[%c0_62, %c0_63] : memref<128x512xbf16, #tpu.memory_space<vmem>>, vector<128x512xbf16>
    %cst_64 = arith.constant dense<0.000000e+00> : vector<8x512xf32>
    %211 = tpu.matmul %175, %210, %cst_64 {dimension_numbers = #tpu.dot_dimension_numbers<[1], [0], [0], [1], [0, 0, 1, 1], [], []>} : vector<8x128xbf16>, vector<128x512xbf16>, vector<8x512xf32> -> vector<8x512xf32>
    %212 = arith.addf %209, %211 : vector<8x512xf32>
    %213 = vector.extract_strided_slice %212 {offsets = [0, 0], sizes = [8, 128], strides = [1, 1]} : vector<8x512xf32> to vector<8x128xf32>
    %214 = arith.negf %213 : vector<8x128xf32>
    %215 = math.exp %214 : vector<8x128xf32>
    %cst_65 = arith.constant 1.000000e+00 : f32
    %216 = vector.broadcast %cst_65 : f32 to vector<8x128xf32>
    %217 = arith.addf %216, %215 : vector<8x128xf32>
    %218 = arith.divf %216, %217 : vector<8x128xf32>
    %219 = vector.extract_strided_slice %212 {offsets = [0, 128], sizes = [8, 128], strides = [1, 1]} : vector<8x512xf32> to vector<8x128xf32>
    %220 = arith.negf %219 : vector<8x128xf32>
    %221 = math.exp %220 : vector<8x128xf32>
    %cst_66 = arith.constant 1.000000e+00 : f32
    %222 = vector.broadcast %cst_66 : f32 to vector<8x128xf32>
    %223 = arith.addf %222, %221 : vector<8x128xf32>
    %224 = arith.divf %222, %223 : vector<8x128xf32>
    %225 = vector.extract_strided_slice %212 {offsets = [0, 256], sizes = [8, 128], strides = [1, 1]} : vector<8x512xf32> to vector<8x128xf32>
    %226 = math.tanh %225 : vector<8x128xf32>
    %227 = vector.extract_strided_slice %212 {offsets = [0, 384], sizes = [8, 128], strides = [1, 1]} : vector<8x512xf32> to vector<8x128xf32>
    %228 = arith.negf %227 : vector<8x128xf32>
    %229 = math.exp %228 : vector<8x128xf32>
    %cst_67 = arith.constant 1.000000e+00 : f32
    %230 = vector.broadcast %cst_67 : f32 to vector<8x128xf32>
    %231 = arith.addf %230, %229 : vector<8x128xf32>
    %232 = arith.divf %230, %231 : vector<8x128xf32>
    %233 = arith.mulf %224, %172 : vector<8x128xf32>
    %234 = arith.mulf %218, %226 : vector<8x128xf32>
    %235 = arith.addf %233, %234 : vector<8x128xf32>
    %236 = math.tanh %235 : vector<8x128xf32>
    %237 = arith.mulf %232, %236 : vector<8x128xf32>
    %238 = arith.truncf %237 : vector<8x128xf32> to vector<8x128xbf16>
    %239 = tpu.concatenate %238, %205 in 1 : vector<8x128xbf16>, vector<8x128xbf16> -> vector<8x256xbf16>
    %c0_68 = arith.constant 0 : index
    %c0_69 = arith.constant 0 : index
    %240 = vector.load %arg5[%c0_68, %c0_69] : memref<256x512xbf16, #tpu.memory_space<vmem>>, vector<256x512xbf16>
    %cst_70 = arith.constant dense<0.000000e+00> : vector<8x512xf32>
    %241 = tpu.matmul %239, %240, %cst_70 {dimension_numbers = #tpu.dot_dimension_numbers<[1], [0], [0], [1], [0, 0, 1, 1], [], []>} : vector<8x256xbf16>, vector<256x512xbf16>, vector<8x512xf32> -> vector<8x512xf32>
    %242 = arith.addf %241, %12 : vector<8x512xf32>
    %243 = vector.extract_strided_slice %242 {offsets = [0, 0], sizes = [8, 128], strides = [1, 1]} : vector<8x512xf32> to vector<8x128xf32>
    %244 = arith.negf %243 : vector<8x128xf32>
    %245 = math.exp %244 : vector<8x128xf32>
    %cst_71 = arith.constant 1.000000e+00 : f32
    %246 = vector.broadcast %cst_71 : f32 to vector<8x128xf32>
    %247 = arith.addf %246, %245 : vector<8x128xf32>
    %248 = arith.divf %246, %247 : vector<8x128xf32>
    %249 = vector.extract_strided_slice %242 {offsets = [0, 128], sizes = [8, 128], strides = [1, 1]} : vector<8x512xf32> to vector<8x128xf32>
    %250 = arith.negf %249 : vector<8x128xf32>
    %251 = math.exp %250 : vector<8x128xf32>
    %cst_72 = arith.constant 1.000000e+00 : f32
    %252 = vector.broadcast %cst_72 : f32 to vector<8x128xf32>
    %253 = arith.addf %252, %251 : vector<8x128xf32>
    %254 = arith.divf %252, %253 : vector<8x128xf32>
    %255 = vector.extract_strided_slice %242 {offsets = [0, 256], sizes = [8, 128], strides = [1, 1]} : vector<8x512xf32> to vector<8x128xf32>
    %256 = math.tanh %255 : vector<8x128xf32>
    %257 = vector.extract_strided_slice %242 {offsets = [0, 384], sizes = [8, 128], strides = [1, 1]} : vector<8x512xf32> to vector<8x128xf32>
    %258 = arith.negf %257 : vector<8x128xf32>
    %259 = math.exp %258 : vector<8x128xf32>
    %cst_73 = arith.constant 1.000000e+00 : f32
    %260 = vector.broadcast %cst_73 : f32 to vector<8x128xf32>
    %261 = arith.addf %260, %259 : vector<8x128xf32>
    %262 = arith.divf %260, %261 : vector<8x128xf32>
    %263 = arith.mulf %254, %202 : vector<8x128xf32>
    %264 = arith.mulf %248, %256 : vector<8x128xf32>
    %265 = arith.addf %263, %264 : vector<8x128xf32>
    %266 = math.tanh %265 : vector<8x128xf32>
    %267 = arith.mulf %262, %266 : vector<8x128xf32>
    %268 = arith.truncf %267 : vector<8x128xf32> to vector<8x128xbf16>
    %c4_i32 = arith.constant 4 : i32
    %c8_i32_74 = arith.constant 8 : i32
    %269 = arith.muli %c4_i32, %c8_i32_74 : i32
    %270 = tpu.assume_multiple %269, 8 : i32
    %271 = arith.index_cast %270 : i32 to index
    %c0_75 = arith.constant 0 : index
    %272 = vector.load %arg8[%271, %c0_75] : memref<64x512xf32, #tpu.memory_space<vmem>>, vector<8x512xf32>
    %c0_76 = arith.constant 0 : index
    %c0_77 = arith.constant 0 : index
    %273 = vector.load %arg4[%c0_76, %c0_77] : memref<128x512xbf16, #tpu.memory_space<vmem>>, vector<128x512xbf16>
    %cst_78 = arith.constant dense<0.000000e+00> : vector<8x512xf32>
    %274 = tpu.matmul %238, %273, %cst_78 {dimension_numbers = #tpu.dot_dimension_numbers<[1], [0], [0], [1], [0, 0, 1, 1], [], []>} : vector<8x128xbf16>, vector<128x512xbf16>, vector<8x512xf32> -> vector<8x512xf32>
    %275 = arith.addf %272, %274 : vector<8x512xf32>
    %276 = vector.extract_strided_slice %275 {offsets = [0, 0], sizes = [8, 128], strides = [1, 1]} : vector<8x512xf32> to vector<8x128xf32>
    %277 = arith.negf %276 : vector<8x128xf32>
    %278 = math.exp %277 : vector<8x128xf32>
    %cst_79 = arith.constant 1.000000e+00 : f32
    %279 = vector.broadcast %cst_79 : f32 to vector<8x128xf32>
    %280 = arith.addf %279, %278 : vector<8x128xf32>
    %281 = arith.divf %279, %280 : vector<8x128xf32>
    %282 = vector.extract_strided_slice %275 {offsets = [0, 128], sizes = [8, 128], strides = [1, 1]} : vector<8x512xf32> to vector<8x128xf32>
    %283 = arith.negf %282 : vector<8x128xf32>
    %284 = math.exp %283 : vector<8x128xf32>
    %cst_80 = arith.constant 1.000000e+00 : f32
    %285 = vector.broadcast %cst_80 : f32 to vector<8x128xf32>
    %286 = arith.addf %285, %284 : vector<8x128xf32>
    %287 = arith.divf %285, %286 : vector<8x128xf32>
    %288 = vector.extract_strided_slice %275 {offsets = [0, 256], sizes = [8, 128], strides = [1, 1]} : vector<8x512xf32> to vector<8x128xf32>
    %289 = math.tanh %288 : vector<8x128xf32>
    %290 = vector.extract_strided_slice %275 {offsets = [0, 384], sizes = [8, 128], strides = [1, 1]} : vector<8x512xf32> to vector<8x128xf32>
    %291 = arith.negf %290 : vector<8x128xf32>
    %292 = math.exp %291 : vector<8x128xf32>
    %cst_81 = arith.constant 1.000000e+00 : f32
    %293 = vector.broadcast %cst_81 : f32 to vector<8x128xf32>
    %294 = arith.addf %293, %292 : vector<8x128xf32>
    %295 = arith.divf %293, %294 : vector<8x128xf32>
    %296 = arith.mulf %287, %235 : vector<8x128xf32>
    %297 = arith.mulf %281, %289 : vector<8x128xf32>
    %298 = arith.addf %296, %297 : vector<8x128xf32>
    %299 = math.tanh %298 : vector<8x128xf32>
    %300 = arith.mulf %295, %299 : vector<8x128xf32>
    %301 = arith.truncf %300 : vector<8x128xf32> to vector<8x128xbf16>
    %302 = tpu.concatenate %301, %268 in 1 : vector<8x128xbf16>, vector<8x128xbf16> -> vector<8x256xbf16>
    %c0_82 = arith.constant 0 : index
    %c0_83 = arith.constant 0 : index
    %303 = vector.load %arg5[%c0_82, %c0_83] : memref<256x512xbf16, #tpu.memory_space<vmem>>, vector<256x512xbf16>
    %cst_84 = arith.constant dense<0.000000e+00> : vector<8x512xf32>
    %304 = tpu.matmul %302, %303, %cst_84 {dimension_numbers = #tpu.dot_dimension_numbers<[1], [0], [0], [1], [0, 0, 1, 1], [], []>} : vector<8x256xbf16>, vector<256x512xbf16>, vector<8x512xf32> -> vector<8x512xf32>
    %305 = arith.addf %304, %12 : vector<8x512xf32>
    %306 = vector.extract_strided_slice %305 {offsets = [0, 0], sizes = [8, 128], strides = [1, 1]} : vector<8x512xf32> to vector<8x128xf32>
    %307 = arith.negf %306 : vector<8x128xf32>
    %308 = math.exp %307 : vector<8x128xf32>
    %cst_85 = arith.constant 1.000000e+00 : f32
    %309 = vector.broadcast %cst_85 : f32 to vector<8x128xf32>
    %310 = arith.addf %309, %308 : vector<8x128xf32>
    %311 = arith.divf %309, %310 : vector<8x128xf32>
    %312 = vector.extract_strided_slice %305 {offsets = [0, 128], sizes = [8, 128], strides = [1, 1]} : vector<8x512xf32> to vector<8x128xf32>
    %313 = arith.negf %312 : vector<8x128xf32>
    %314 = math.exp %313 : vector<8x128xf32>
    %cst_86 = arith.constant 1.000000e+00 : f32
    %315 = vector.broadcast %cst_86 : f32 to vector<8x128xf32>
    %316 = arith.addf %315, %314 : vector<8x128xf32>
    %317 = arith.divf %315, %316 : vector<8x128xf32>
    %318 = vector.extract_strided_slice %305 {offsets = [0, 256], sizes = [8, 128], strides = [1, 1]} : vector<8x512xf32> to vector<8x128xf32>
    %319 = math.tanh %318 : vector<8x128xf32>
    %320 = vector.extract_strided_slice %305 {offsets = [0, 384], sizes = [8, 128], strides = [1, 1]} : vector<8x512xf32> to vector<8x128xf32>
    %321 = arith.negf %320 : vector<8x128xf32>
    %322 = math.exp %321 : vector<8x128xf32>
    %cst_87 = arith.constant 1.000000e+00 : f32
    %323 = vector.broadcast %cst_87 : f32 to vector<8x128xf32>
    %324 = arith.addf %323, %322 : vector<8x128xf32>
    %325 = arith.divf %323, %324 : vector<8x128xf32>
    %326 = arith.mulf %317, %265 : vector<8x128xf32>
    %327 = arith.mulf %311, %319 : vector<8x128xf32>
    %328 = arith.addf %326, %327 : vector<8x128xf32>
    %329 = math.tanh %328 : vector<8x128xf32>
    %330 = arith.mulf %325, %329 : vector<8x128xf32>
    %331 = arith.truncf %330 : vector<8x128xf32> to vector<8x128xbf16>
    %c5_i32 = arith.constant 5 : i32
    %c8_i32_88 = arith.constant 8 : i32
    %332 = arith.muli %c5_i32, %c8_i32_88 : i32
    %333 = tpu.assume_multiple %332, 8 : i32
    %334 = arith.index_cast %333 : i32 to index
    %c0_89 = arith.constant 0 : index
    %335 = vector.load %arg8[%334, %c0_89] : memref<64x512xf32, #tpu.memory_space<vmem>>, vector<8x512xf32>
    %c0_90 = arith.constant 0 : index
    %c0_91 = arith.constant 0 : index
    %336 = vector.load %arg4[%c0_90, %c0_91] : memref<128x512xbf16, #tpu.memory_space<vmem>>, vector<128x512xbf16>
    %cst_92 = arith.constant dense<0.000000e+00> : vector<8x512xf32>
    %337 = tpu.matmul %301, %336, %cst_92 {dimension_numbers = #tpu.dot_dimension_numbers<[1], [0], [0], [1], [0, 0, 1, 1], [], []>} : vector<8x128xbf16>, vector<128x512xbf16>, vector<8x512xf32> -> vector<8x512xf32>
    %338 = arith.addf %335, %337 : vector<8x512xf32>
    %339 = vector.extract_strided_slice %338 {offsets = [0, 0], sizes = [8, 128], strides = [1, 1]} : vector<8x512xf32> to vector<8x128xf32>
    %340 = arith.negf %339 : vector<8x128xf32>
    %341 = math.exp %340 : vector<8x128xf32>
    %cst_93 = arith.constant 1.000000e+00 : f32
    %342 = vector.broadcast %cst_93 : f32 to vector<8x128xf32>
    %343 = arith.addf %342, %341 : vector<8x128xf32>
    %344 = arith.divf %342, %343 : vector<8x128xf32>
    %345 = vector.extract_strided_slice %338 {offsets = [0, 128], sizes = [8, 128], strides = [1, 1]} : vector<8x512xf32> to vector<8x128xf32>
    %346 = arith.negf %345 : vector<8x128xf32>
    %347 = math.exp %346 : vector<8x128xf32>
    %cst_94 = arith.constant 1.000000e+00 : f32
    %348 = vector.broadcast %cst_94 : f32 to vector<8x128xf32>
    %349 = arith.addf %348, %347 : vector<8x128xf32>
    %350 = arith.divf %348, %349 : vector<8x128xf32>
    %351 = vector.extract_strided_slice %338 {offsets = [0, 256], sizes = [8, 128], strides = [1, 1]} : vector<8x512xf32> to vector<8x128xf32>
    %352 = math.tanh %351 : vector<8x128xf32>
    %353 = vector.extract_strided_slice %338 {offsets = [0, 384], sizes = [8, 128], strides = [1, 1]} : vector<8x512xf32> to vector<8x128xf32>
    %354 = arith.negf %353 : vector<8x128xf32>
    %355 = math.exp %354 : vector<8x128xf32>
    %cst_95 = arith.constant 1.000000e+00 : f32
    %356 = vector.broadcast %cst_95 : f32 to vector<8x128xf32>
    %357 = arith.addf %356, %355 : vector<8x128xf32>
    %358 = arith.divf %356, %357 : vector<8x128xf32>
    %359 = arith.mulf %350, %298 : vector<8x128xf32>
    %360 = arith.mulf %344, %352 : vector<8x128xf32>
    %361 = arith.addf %359, %360 : vector<8x128xf32>
    %362 = math.tanh %361 : vector<8x128xf32>
    %363 = arith.mulf %358, %362 : vector<8x128xf32>
    %364 = arith.truncf %363 : vector<8x128xf32> to vector<8x128xbf16>
    %365 = tpu.concatenate %364, %331 in 1 : vector<8x128xbf16>, vector<8x128xbf16> -> vector<8x256xbf16>
    %c0_96 = arith.constant 0 : index
    %c0_97 = arith.constant 0 : index
    %366 = vector.load %arg5[%c0_96, %c0_97] : memref<256x512xbf16, #tpu.memory_space<vmem>>, vector<256x512xbf16>
    %cst_98 = arith.constant dense<0.000000e+00> : vector<8x512xf32>
    %367 = tpu.matmul %365, %366, %cst_98 {dimension_numbers = #tpu.dot_dimension_numbers<[1], [0], [0], [1], [0, 0, 1, 1], [], []>} : vector<8x256xbf16>, vector<256x512xbf16>, vector<8x512xf32> -> vector<8x512xf32>
    %368 = arith.addf %367, %12 : vector<8x512xf32>
    %369 = vector.extract_strided_slice %368 {offsets = [0, 0], sizes = [8, 128], strides = [1, 1]} : vector<8x512xf32> to vector<8x128xf32>
    %370 = arith.negf %369 : vector<8x128xf32>
    %371 = math.exp %370 : vector<8x128xf32>
    %cst_99 = arith.constant 1.000000e+00 : f32
    %372 = vector.broadcast %cst_99 : f32 to vector<8x128xf32>
    %373 = arith.addf %372, %371 : vector<8x128xf32>
    %374 = arith.divf %372, %373 : vector<8x128xf32>
    %375 = vector.extract_strided_slice %368 {offsets = [0, 128], sizes = [8, 128], strides = [1, 1]} : vector<8x512xf32> to vector<8x128xf32>
    %376 = arith.negf %375 : vector<8x128xf32>
    %377 = math.exp %376 : vector<8x128xf32>
    %cst_100 = arith.constant 1.000000e+00 : f32
    %378 = vector.broadcast %cst_100 : f32 to vector<8x128xf32>
    %379 = arith.addf %378, %377 : vector<8x128xf32>
    %380 = arith.divf %378, %379 : vector<8x128xf32>
    %381 = vector.extract_strided_slice %368 {offsets = [0, 256], sizes = [8, 128], strides = [1, 1]} : vector<8x512xf32> to vector<8x128xf32>
    %382 = math.tanh %381 : vector<8x128xf32>
    %383 = vector.extract_strided_slice %368 {offsets = [0, 384], sizes = [8, 128], strides = [1, 1]} : vector<8x512xf32> to vector<8x128xf32>
    %384 = arith.negf %383 : vector<8x128xf32>
    %385 = math.exp %384 : vector<8x128xf32>
    %cst_101 = arith.constant 1.000000e+00 : f32
    %386 = vector.broadcast %cst_101 : f32 to vector<8x128xf32>
    %387 = arith.addf %386, %385 : vector<8x128xf32>
    %388 = arith.divf %386, %387 : vector<8x128xf32>
    %389 = arith.mulf %380, %328 : vector<8x128xf32>
    %390 = arith.mulf %374, %382 : vector<8x128xf32>
    %391 = arith.addf %389, %390 : vector<8x128xf32>
    %392 = math.tanh %391 : vector<8x128xf32>
    %393 = arith.mulf %388, %392 : vector<8x128xf32>
    %394 = arith.truncf %393 : vector<8x128xf32> to vector<8x128xbf16>
    %c6_i32 = arith.constant 6 : i32
    %c8_i32_102 = arith.constant 8 : i32
    %395 = arith.muli %c6_i32, %c8_i32_102 : i32
    %396 = tpu.assume_multiple %395, 8 : i32
    %397 = arith.index_cast %396 : i32 to index
    %c0_103 = arith.constant 0 : index
    %398 = vector.load %arg8[%397, %c0_103] : memref<64x512xf32, #tpu.memory_space<vmem>>, vector<8x512xf32>
    %c0_104 = arith.constant 0 : index
    %c0_105 = arith.constant 0 : index
    %399 = vector.load %arg4[%c0_104, %c0_105] : memref<128x512xbf16, #tpu.memory_space<vmem>>, vector<128x512xbf16>
    %cst_106 = arith.constant dense<0.000000e+00> : vector<8x512xf32>
    %400 = tpu.matmul %364, %399, %cst_106 {dimension_numbers = #tpu.dot_dimension_numbers<[1], [0], [0], [1], [0, 0, 1, 1], [], []>} : vector<8x128xbf16>, vector<128x512xbf16>, vector<8x512xf32> -> vector<8x512xf32>
    %401 = arith.addf %398, %400 : vector<8x512xf32>
    %402 = vector.extract_strided_slice %401 {offsets = [0, 0], sizes = [8, 128], strides = [1, 1]} : vector<8x512xf32> to vector<8x128xf32>
    %403 = arith.negf %402 : vector<8x128xf32>
    %404 = math.exp %403 : vector<8x128xf32>
    %cst_107 = arith.constant 1.000000e+00 : f32
    %405 = vector.broadcast %cst_107 : f32 to vector<8x128xf32>
    %406 = arith.addf %405, %404 : vector<8x128xf32>
    %407 = arith.divf %405, %406 : vector<8x128xf32>
    %408 = vector.extract_strided_slice %401 {offsets = [0, 128], sizes = [8, 128], strides = [1, 1]} : vector<8x512xf32> to vector<8x128xf32>
    %409 = arith.negf %408 : vector<8x128xf32>
    %410 = math.exp %409 : vector<8x128xf32>
    %cst_108 = arith.constant 1.000000e+00 : f32
    %411 = vector.broadcast %cst_108 : f32 to vector<8x128xf32>
    %412 = arith.addf %411, %410 : vector<8x128xf32>
    %413 = arith.divf %411, %412 : vector<8x128xf32>
    %414 = vector.extract_strided_slice %401 {offsets = [0, 256], sizes = [8, 128], strides = [1, 1]} : vector<8x512xf32> to vector<8x128xf32>
    %415 = math.tanh %414 : vector<8x128xf32>
    %416 = vector.extract_strided_slice %401 {offsets = [0, 384], sizes = [8, 128], strides = [1, 1]} : vector<8x512xf32> to vector<8x128xf32>
    %417 = arith.negf %416 : vector<8x128xf32>
    %418 = math.exp %417 : vector<8x128xf32>
    %cst_109 = arith.constant 1.000000e+00 : f32
    %419 = vector.broadcast %cst_109 : f32 to vector<8x128xf32>
    %420 = arith.addf %419, %418 : vector<8x128xf32>
    %421 = arith.divf %419, %420 : vector<8x128xf32>
    %422 = arith.mulf %413, %361 : vector<8x128xf32>
    %423 = arith.mulf %407, %415 : vector<8x128xf32>
    %424 = arith.addf %422, %423 : vector<8x128xf32>
    %425 = math.tanh %424 : vector<8x128xf32>
    %426 = arith.mulf %421, %425 : vector<8x128xf32>
    %427 = arith.truncf %426 : vector<8x128xf32> to vector<8x128xbf16>
    %428 = tpu.concatenate %427, %394 in 1 : vector<8x128xbf16>, vector<8x128xbf16> -> vector<8x256xbf16>
    %c0_110 = arith.constant 0 : index
    %c0_111 = arith.constant 0 : index
    %429 = vector.load %arg5[%c0_110, %c0_111] : memref<256x512xbf16, #tpu.memory_space<vmem>>, vector<256x512xbf16>
    %cst_112 = arith.constant dense<0.000000e+00> : vector<8x512xf32>
    %430 = tpu.matmul %428, %429, %cst_112 {dimension_numbers = #tpu.dot_dimension_numbers<[1], [0], [0], [1], [0, 0, 1, 1], [], []>} : vector<8x256xbf16>, vector<256x512xbf16>, vector<8x512xf32> -> vector<8x512xf32>
    %431 = arith.addf %430, %12 : vector<8x512xf32>
    %432 = vector.extract_strided_slice %431 {offsets = [0, 0], sizes = [8, 128], strides = [1, 1]} : vector<8x512xf32> to vector<8x128xf32>
    %433 = arith.negf %432 : vector<8x128xf32>
    %434 = math.exp %433 : vector<8x128xf32>
    %cst_113 = arith.constant 1.000000e+00 : f32
    %435 = vector.broadcast %cst_113 : f32 to vector<8x128xf32>
    %436 = arith.addf %435, %434 : vector<8x128xf32>
    %437 = arith.divf %435, %436 : vector<8x128xf32>
    %438 = vector.extract_strided_slice %431 {offsets = [0, 128], sizes = [8, 128], strides = [1, 1]} : vector<8x512xf32> to vector<8x128xf32>
    %439 = arith.negf %438 : vector<8x128xf32>
    %440 = math.exp %439 : vector<8x128xf32>
    %cst_114 = arith.constant 1.000000e+00 : f32
    %441 = vector.broadcast %cst_114 : f32 to vector<8x128xf32>
    %442 = arith.addf %441, %440 : vector<8x128xf32>
    %443 = arith.divf %441, %442 : vector<8x128xf32>
    %444 = vector.extract_strided_slice %431 {offsets = [0, 256], sizes = [8, 128], strides = [1, 1]} : vector<8x512xf32> to vector<8x128xf32>
    %445 = math.tanh %444 : vector<8x128xf32>
    %446 = vector.extract_strided_slice %431 {offsets = [0, 384], sizes = [8, 128], strides = [1, 1]} : vector<8x512xf32> to vector<8x128xf32>
    %447 = arith.negf %446 : vector<8x128xf32>
    %448 = math.exp %447 : vector<8x128xf32>
    %cst_115 = arith.constant 1.000000e+00 : f32
    %449 = vector.broadcast %cst_115 : f32 to vector<8x128xf32>
    %450 = arith.addf %449, %448 : vector<8x128xf32>
    %451 = arith.divf %449, %450 : vector<8x128xf32>
    %452 = arith.mulf %443, %391 : vector<8x128xf32>
    %453 = arith.mulf %437, %445 : vector<8x128xf32>
    %454 = arith.addf %452, %453 : vector<8x128xf32>
    %455 = math.tanh %454 : vector<8x128xf32>
    %456 = arith.mulf %451, %455 : vector<8x128xf32>
    %457 = arith.truncf %456 : vector<8x128xf32> to vector<8x128xbf16>
    %c7_i32 = arith.constant 7 : i32
    %c8_i32_116 = arith.constant 8 : i32
    %458 = arith.muli %c7_i32, %c8_i32_116 : i32
    %459 = tpu.assume_multiple %458, 8 : i32
    %460 = arith.index_cast %459 : i32 to index
    %c0_117 = arith.constant 0 : index
    %461 = vector.load %arg8[%460, %c0_117] : memref<64x512xf32, #tpu.memory_space<vmem>>, vector<8x512xf32>
    %c0_118 = arith.constant 0 : index
    %c0_119 = arith.constant 0 : index
    %462 = vector.load %arg4[%c0_118, %c0_119] : memref<128x512xbf16, #tpu.memory_space<vmem>>, vector<128x512xbf16>
    %cst_120 = arith.constant dense<0.000000e+00> : vector<8x512xf32>
    %463 = tpu.matmul %427, %462, %cst_120 {dimension_numbers = #tpu.dot_dimension_numbers<[1], [0], [0], [1], [0, 0, 1, 1], [], []>} : vector<8x128xbf16>, vector<128x512xbf16>, vector<8x512xf32> -> vector<8x512xf32>
    %464 = arith.addf %461, %463 : vector<8x512xf32>
    %465 = vector.extract_strided_slice %464 {offsets = [0, 0], sizes = [8, 128], strides = [1, 1]} : vector<8x512xf32> to vector<8x128xf32>
    %466 = arith.negf %465 : vector<8x128xf32>
    %467 = math.exp %466 : vector<8x128xf32>
    %cst_121 = arith.constant 1.000000e+00 : f32
    %468 = vector.broadcast %cst_121 : f32 to vector<8x128xf32>
    %469 = arith.addf %468, %467 : vector<8x128xf32>
    %470 = arith.divf %468, %469 : vector<8x128xf32>
    %471 = vector.extract_strided_slice %464 {offsets = [0, 128], sizes = [8, 128], strides = [1, 1]} : vector<8x512xf32> to vector<8x128xf32>
    %472 = arith.negf %471 : vector<8x128xf32>
    %473 = math.exp %472 : vector<8x128xf32>
    %cst_122 = arith.constant 1.000000e+00 : f32
    %474 = vector.broadcast %cst_122 : f32 to vector<8x128xf32>
    %475 = arith.addf %474, %473 : vector<8x128xf32>
    %476 = arith.divf %474, %475 : vector<8x128xf32>
    %477 = vector.extract_strided_slice %464 {offsets = [0, 256], sizes = [8, 128], strides = [1, 1]} : vector<8x512xf32> to vector<8x128xf32>
    %478 = math.tanh %477 : vector<8x128xf32>
    %479 = vector.extract_strided_slice %464 {offsets = [0, 384], sizes = [8, 128], strides = [1, 1]} : vector<8x512xf32> to vector<8x128xf32>
    %480 = arith.negf %479 : vector<8x128xf32>
    %481 = math.exp %480 : vector<8x128xf32>
    %cst_123 = arith.constant 1.000000e+00 : f32
    %482 = vector.broadcast %cst_123 : f32 to vector<8x128xf32>
    %483 = arith.addf %482, %481 : vector<8x128xf32>
    %484 = arith.divf %482, %483 : vector<8x128xf32>
    %485 = arith.mulf %476, %424 : vector<8x128xf32>
    %486 = arith.mulf %470, %478 : vector<8x128xf32>
    %487 = arith.addf %485, %486 : vector<8x128xf32>
    %488 = math.tanh %487 : vector<8x128xf32>
    %489 = arith.mulf %484, %488 : vector<8x128xf32>
    %490 = arith.truncf %489 : vector<8x128xf32> to vector<8x128xbf16>
    %491 = tpu.concatenate %490, %457 in 1 : vector<8x128xbf16>, vector<8x128xbf16> -> vector<8x256xbf16>
    %c0_124 = arith.constant 0 : index
    %c0_125 = arith.constant 0 : index
    %492 = vector.load %arg5[%c0_124, %c0_125] : memref<256x512xbf16, #tpu.memory_space<vmem>>, vector<256x512xbf16>
    %cst_126 = arith.constant dense<0.000000e+00> : vector<8x512xf32>
    %493 = tpu.matmul %491, %492, %cst_126 {dimension_numbers = #tpu.dot_dimension_numbers<[1], [0], [0], [1], [0, 0, 1, 1], [], []>} : vector<8x256xbf16>, vector<256x512xbf16>, vector<8x512xf32> -> vector<8x512xf32>
    %494 = arith.addf %493, %12 : vector<8x512xf32>
    %495 = vector.extract_strided_slice %494 {offsets = [0, 0], sizes = [8, 128], strides = [1, 1]} : vector<8x512xf32> to vector<8x128xf32>
    %496 = arith.negf %495 : vector<8x128xf32>
    %497 = math.exp %496 : vector<8x128xf32>
    %cst_127 = arith.constant 1.000000e+00 : f32
    %498 = vector.broadcast %cst_127 : f32 to vector<8x128xf32>
    %499 = arith.addf %498, %497 : vector<8x128xf32>
    %500 = arith.divf %498, %499 : vector<8x128xf32>
    %501 = vector.extract_strided_slice %494 {offsets = [0, 128], sizes = [8, 128], strides = [1, 1]} : vector<8x512xf32> to vector<8x128xf32>
    %502 = arith.negf %501 : vector<8x128xf32>
    %503 = math.exp %502 : vector<8x128xf32>
    %cst_128 = arith.constant 1.000000e+00 : f32
    %504 = vector.broadcast %cst_128 : f32 to vector<8x128xf32>
    %505 = arith.addf %504, %503 : vector<8x128xf32>
    %506 = arith.divf %504, %505 : vector<8x128xf32>
    %507 = vector.extract_strided_slice %494 {offsets = [0, 256], sizes = [8, 128], strides = [1, 1]} : vector<8x512xf32> to vector<8x128xf32>
    %508 = math.tanh %507 : vector<8x128xf32>
    %509 = vector.extract_strided_slice %494 {offsets = [0, 384], sizes = [8, 128], strides = [1, 1]} : vector<8x512xf32> to vector<8x128xf32>
    %510 = arith.negf %509 : vector<8x128xf32>
    %511 = math.exp %510 : vector<8x128xf32>
    %cst_129 = arith.constant 1.000000e+00 : f32
    %512 = vector.broadcast %cst_129 : f32 to vector<8x128xf32>
    %513 = arith.addf %512, %511 : vector<8x128xf32>
    %514 = arith.divf %512, %513 : vector<8x128xf32>
    %515 = arith.mulf %506, %454 : vector<8x128xf32>
    %516 = arith.mulf %500, %508 : vector<8x128xf32>
    %517 = arith.addf %515, %516 : vector<8x128xf32>
    %518 = math.tanh %517 : vector<8x128xf32>
    %519 = arith.mulf %514, %518 : vector<8x128xf32>
    %520 = arith.truncf %519 : vector<8x128xf32> to vector<8x128xbf16>
    %c8_i32_130 = arith.constant 8 : i32
    %c0_131 = arith.constant 0 : index
    %c0_132 = arith.constant 0 : index
    %521 = vector.load %arg9[%c0_131, %c0_132] : memref<8x128xbf16, #tpu.memory_space<vmem>>, vector<8x128xbf16>
    tpu.vector_store %arg9[%c0_131, %c0_132], %490 {strides = array<i32>} : memref<8x128xbf16, #tpu.memory_space<vmem>>, vector<8x128xbf16>,
    %c0_133 = arith.constant 0 : index
    %c0_134 = arith.constant 0 : index
    %522 = vector.load %arg10[%c0_133, %c0_134] : memref<8x128xf32, #tpu.memory_space<vmem>>, vector<8x128xf32>
    tpu.vector_store %arg10[%c0_133, %c0_134], %487 {strides = array<i32>} : memref<8x128xf32, #tpu.memory_space<vmem>>, vector<8x128xf32>,
    %c0_135 = arith.constant 0 : index
    %c0_136 = arith.constant 0 : index
    %523 = vector.load %arg11[%c0_135, %c0_136] : memref<8x128xbf16, #tpu.memory_space<vmem>>, vector<8x128xbf16>
    tpu.vector_store %arg11[%c0_135, %c0_136], %520 {strides = array<i32>} : memref<8x128xbf16, #tpu.memory_space<vmem>>, vector<8x128xbf16>,
    %c0_137 = arith.constant 0 : index
    %c0_138 = arith.constant 0 : index
    %524 = vector.load %arg12[%c0_137, %c0_138] : memref<8x128xf32, #tpu.memory_space<vmem>>, vector<8x128xf32>
    tpu.vector_store %arg12[%c0_137, %c0_138], %517 {strides = array<i32>} : memref<8x128xf32, #tpu.memory_space<vmem>>, vector<8x128xf32>,
    %c0_i32_139 = arith.constant 0 : i32
    %525 = arith.cmpi eq, %arg0, %c0_i32_139 : i32
    %526 = arith.extui %525 : i1 to i32
    %c0_i32_140 = arith.constant 0 : i32
    %527 = arith.cmpi ne, %526, %c0_i32_140 : i32
    scf.if %527 {
      %528 = arith.extf %520 : vector<8x128xbf16> to vector<8x128xf32>
      %c0_141 = arith.constant 0 : index
      %c0_142 = arith.constant 0 : index
      %529 = vector.load %arg7[%c0_141, %c0_142] : memref<8x128xf32, #tpu.memory_space<vmem>>, vector<8x128xf32>
      tpu.vector_store %arg7[%c0_141, %c0_142], %528 {strides = array<i32>} : memref<8x128xf32, #tpu.memory_space<vmem>>, vector<8x128xf32>,
    } else {
    }
    return
  }
  func.func @transform_0(%arg0: i32) -> (i32, i32) {
    %c0_i32 = arith.constant 0 : i32
    %c0_i32_0 = arith.constant 0 : i32
    return %arg0, %c0_i32 : i32, i32
  }
  func.func @transform_1(%arg0: i32) -> (i32, i32) {
    %c0_i32 = arith.constant 0 : i32
    %c0_i32_0 = arith.constant 0 : i32
    %c0_i32_1 = arith.constant 0 : i32
    return %c0_i32, %c0_i32_0 : i32, i32
  }
  func.func @transform_2(%arg0: i32) -> (i32, i32) {
    %c0_i32 = arith.constant 0 : i32
    %c0_i32_0 = arith.constant 0 : i32
    %c0_i32_1 = arith.constant 0 : i32
    return %c0_i32, %c0_i32_0 : i32, i32
  }
  func.func @transform_3(%arg0: i32) -> (i32, i32) {
    %c0_i32 = arith.constant 0 : i32
    %c0_i32_0 = arith.constant 0 : i32
    %c0_i32_1 = arith.constant 0 : i32
    return %c0_i32, %c0_i32_0 : i32, i32
  }
  func.func @transform_4(%arg0: i32) -> (i32, i32) {
    %c0_i32 = arith.constant 0 : i32
    %c0_i32_0 = arith.constant 0 : i32
    %c0_i32_1 = arith.constant 0 : i32
    return %c0_i32, %c0_i32_0 : i32, i32
  }
  func.func @transform_5(%arg0: i32) -> (i32, i32) {
    %c0_i32 = arith.constant 0 : i32
    %c0_i32_0 = arith.constant 0 : i32
    %c0_i32_1 = arith.constant 0 : i32
    return %c0_i32, %c0_i32_0 : i32, i32
  }
  func.func @transform_6(%arg0: i32) -> (i32, i32) {
    %c0_i32 = arith.constant 0 : i32
    %c0_i32_0 = arith.constant 0 : i32
    %c0_i32_1 = arith.constant 0 : i32
    return %c0_i32, %c0_i32_0 : i32, i32
  }
}

</mosaic_0001>

<bundles_post_ra>
// kernel: tpu_custom_call.1
= control target key start
LH: loop header
LB: loop body
LE: loop exit
PB: predicated region body
PF: predicated region fallthrough
CT: control target
= control target key end

     0   :  { %11 = vsyncpa [#allocation8], 0  ;;  %s5636_s0 = inlined_call_operand.hbm [shape: bf16[64,128], index: 0, kind: input, shape index: {}]   ;;  %s5637_s1 = inlined_call_operand.hbm [shape: bf16[128,512], index: 1, kind: input, shape index: {}]   ;;  %s5638_s2 = inlined_call_operand.vmem [shape: f32[1,512], index: 2, kind: input, shape index: {}]   ;;  %s5639_s3 = inlined_call_operand.hbm [shape: bf16[128,512], index: 3, kind: input, shape index: {}]   ;;  %s5640_s4 = inlined_call_operand.hbm [shape: bf16[256,512], index: 4, kind: input, shape index: {}]   ;;  %s5641_s5 = inlined_call_operand.vmem [shape: f32[1,512], index: 5, kind: input, shape index: {}]   ;;  %s5642_s6 = inlined_call_operand.hbm [shape: f32[8,128], index: 6, kind: output, shape index: {}]  }
   0x1   :  { %12 = vsyncpa [#allocation11], 0 }
   0x2   :  { %13 = vsyncpa [#allocation14], 0 }
   0x3   :  { %14 = vsyncpa [#allocation9], 0  ;;  %s3899_s21 = smov [#allocation10]   ;;  %s3781_s25 = scalar_lea.hbm %s5637_s1, 4096 }
   0x4   :  { %s32_s22 = sshll.u32 %s3899_s21, 4  ;;  %p3782_p0 = scmp.ne.s32.totalorder %s5637_s1, %s3781_s25  ;;  %s33_s22 = int_to_ptr.vmem [resolvable:$true] %s32_s22 }
   0x5   :  { %p3785_p1 = scmp.lt.u32.totalorder %s3781_s25, %s5637_s1 }
   0x7   :  { %p3787_p2 = pnand %p3785_p1, %p3782_p0 }
   0x9   :  { %3790 = shalt.err (!%p3787_p2)
}
   0xa   :  { %s3791_s30 = scalar_lea.vmem %s33_s22, 4096  ;;  %p3796_p4 = scmp.lt.s32.totalorder %s33_s22, %s33_s22 }
   0xb   :  { %p3792_p3 = scmp.ne.s32.totalorder %s33_s22, %s3791_s30  ;;  %p3797_p5 = scmp.lt.s32.totalorder %s3791_s30, %s3791_s30 }
   0xd   :  { %p3798_p6 = por %p3797_p5, %p3796_p4 }
   0xf   :  { %p3799_p7 = pnand %p3798_p6, %p3792_p3 }
  0x11   :  { %3802 = shalt.err (!%p3799_p7)
}
  0x12   :  { %s3900_s7 = smov 256   ;;  %s3901_s8 = smov 16  }
  0x13   :  { %38 = dma.hbm_to_vmem [thread:$0]  %s5637_s1, 4096, %s33_s22, [#allocation11], %s3900_s7, %s3900_s7, %s3901_s8  }
  0x14   :  { %s3902_s11 = smov [#allocation7]   ;;  %s3803_s15 = scalar_lea.hbm %s5636_s0, 512 }
  0x15   :  { %s20_s12 = sshll.u32 %s3902_s11, 4  ;;  %p3804_p8 = scmp.ne.s32.totalorder %s5636_s0, %s3803_s15  ;;  %s21_s12 = int_to_ptr.vmem [resolvable:$true] %s20_s12 }
  0x16   :  { %p3807_p9 = scmp.lt.u32.totalorder %s3803_s15, %s5636_s0 }
  0x18   :  { %p3809_p10 = pnand %p3807_p9, %p3804_p8 }
  0x1a   :  { %3812 = shalt.err (!%p3809_p10)
}
  0x1b   :  { %s3813_s20 = scalar_lea.vmem %s21_s12, 512  ;;  %p3818_p12 = scmp.lt.s32.totalorder %s21_s12, %s21_s12 }
  0x1c   :  { %p3814_p11 = scmp.ne.s32.totalorder %s21_s12, %s3813_s20  ;;  %p3819_p13 = scmp.lt.s32.totalorder %s3813_s20, %s3813_s20 }
  0x1e   :  { %p3820_p0 = por %p3819_p13, %p3818_p12 }
  0x20   :  { %p3821_p1 = pnand %p3820_p0, %p3814_p11 }
  0x22   :  { %3824 = shalt.err (!%p3821_p1)
}
  0x23   :  { %s3903_s1 = smov 64   ;;  %s3904_s21 = smov 4  }
  0x24   :  { %26 = dma.hbm_to_vmem [thread:$0]  %s5636_s0, 512, %s21_s12, [#allocation8], %s3903_s1, %s3903_s1, %s3904_s21  }
  0x25   :  { %s3905_s24 = smov [#allocation12]   ;;  %s3906_s26 = smov [#allocation13]  }
  0x26   :  { %s46_s25 = sshll.u32 %s3905_s24, 4  ;;  %s58_s27 = sshll.u32 %s3906_s26, 4  ;;  %s47_s25 = int_to_ptr.vmem [resolvable:$true] %s46_s25  ;;  %s3971_s27 = int_to_ptr.vmem [resolvable:$true] %s58_s27 }
  0x27   :  { %s3825_s30 = scalar_lea.hbm %s5639_s3, 4096 }
  0x28   :  { %p3826_p2 = scmp.ne.s32.totalorder %s5639_s3, %s3825_s30  ;;  %p3829_p3 = scmp.lt.u32.totalorder %s3825_s30, %s5639_s3 }
  0x2a   :  { %p3831_p4 = pnand %p3829_p3, %p3826_p2 }
  0x2c   :  { %3834 = shalt.err (!%p3831_p4)
}
  0x2d   :  { %s3835_s0 = scalar_lea.vmem %s47_s25, 4096  ;;  %p3840_p6 = scmp.lt.s32.totalorder %s47_s25, %s47_s25 }
  0x2e   :  { %p3836_p5 = scmp.ne.s32.totalorder %s47_s25, %s3835_s0  ;;  %p3841_p7 = scmp.lt.s32.totalorder %s3835_s0, %s3835_s0 }
  0x30   :  { %p3842_p8 = por %p3841_p7, %p3840_p6 }
  0x32   :  { %p3843_p9 = pnand %p3842_p8, %p3836_p5 }
  0x34   :  { %3846 = shalt.err (!%p3843_p9)
}
  0x35   :  { %52 = dma.hbm_to_vmem [thread:$0]  %s5639_s3, 4096, %s47_s25, [#allocation11], %s3900_s7, %s3900_s7, %s3901_s8  }
  0x36   :  { %s3847_s17 = scalar_lea.hbm %s5640_s4, 8192 }
  0x37   :  { %p3848_p10 = scmp.ne.s32.totalorder %s5640_s4, %s3847_s17  ;;  %p3851_p11 = scmp.lt.u32.totalorder %s3847_s17, %s5640_s4 }
  0x39   :  { %p3853_p12 = pnand %p3851_p11, %p3848_p10 }
  0x3b   :  { %3856 = shalt.err (!%p3853_p12)
}
  0x3c   :  { %s3857_s21 = scalar_lea.vmem %s3971_s27, 8192  ;;  %p3862_p0 = scmp.lt.s32.totalorder %s3971_s27, %s3971_s27 }
  0x3d   :  { %p3858_p13 = scmp.ne.s32.totalorder %s3971_s27, %s3857_s21  ;;  %p3863_p1 = scmp.lt.s32.totalorder %s3857_s21, %s3857_s21 }
  0x3f   :  { %p3864_p2 = por %p3863_p1, %p3862_p0 }
  0x41   :  { %p3865_p3 = pnand %p3864_p2, %p3858_p13 }
  0x43   :  { %3868 = shalt.err (!%p3865_p3)
}
  0x44   :  { %64 = dma.hbm_to_vmem [thread:$0]  %s5640_s4, 8192, %s3971_s27, [#allocation14], %s3900_s7, %s3900_s7, %s3901_s8  }
  0x45   :  { %3891 = dma.done.wait [#allocation8], 512  }
  0x46   :  { %3892 = vsyncadd [#allocation8], 4294966784 }
  0x47   :  { %3893 = dma.done.wait [#allocation11], 8192  }
  0x48   :  { %3894 = vsyncadd [#allocation11], 4294959104 }
  0x49   :  { %3895 = dma.done.wait [#allocation14], 8192  }
  0x4a   :  { %3896 = vsyncadd [#allocation14], 4294959104  ;;  %v5643_v0 = vmov 0   ;;  %v3137_v1 = vld [vmem:[#allocation10 + $0x4] ss:$16 sps:$4 sm:$0xff]   ;;  %v3198_v44 = vld [vmem:[#allocation7 + $0x8] sm:$0xff]  }
  0x4b   :  { %366 = vmatprep.mubr.bf16.mxu0 %v5643_v0  ;;  %84 = vst [vmem:[#allocation3] sm:$0xf] %v5643_v0  ;;  %86 = vst [vmem:[#allocation5] sm:$0xf] %v5643_v0  ;;  %439 = vmatprep.mubr.bf16.mxu1 %v5643_v0  ;;  %v3139_v2 = vld [vmem:[#allocation10 + $0xc] ss:$16 sps:$4 sm:$0xff]  }
  0x4c   :  { %334 = vmatprep.subr.bf16.mxu0 %v3137_v1  ;;  %v3141_v3 = vld [vmem:[#allocation10] ss:$16 sps:$4 sm:$0xff]   ;;  %v3142_v4 = vld [vmem:[#allocation10 + $0x8] ss:$16 sps:$4 sm:$0xff]   ;;  %407 = vmatprep.subr.bf16.mxu1 %v3139_v2  ;;  %v3143_v5 = vld [vmem:[#allocation10 + $0x24] ss:$16 sps:$4 sm:$0xff]  }
  0x4d   :  { %335 = vmatpush1.bf16.msra.mxu0 %v3141_v3  ;;  %408 = vmatpush1.bf16.msra.mxu1 %v3142_v4  ;;  %v3145_v6 = vld [vmem:[#allocation10 + $0x2c] ss:$16 sps:$4 sm:$0xff]   ;;  %v3147_v7 = vld [vmem:[#allocation10 + $0x20] ss:$16 sps:$4 sm:$0xff]   ;;  %v3148_v8 = vld [vmem:[#allocation10 + $0x28] ss:$16 sps:$4 sm:$0xff]  }
  0x4e   :  { %336 = vmatprep.subr.bf16.mxu0 %v3143_v5  ;;  %409 = vmatprep.subr.bf16.mxu1 %v3145_v6  ;;  %v3149_v9 = vld [vmem:[#allocation10 + $0x44] ss:$16 sps:$4 sm:$0xff]   ;;  %v3151_v10 = vld [vmem:[#allocation10 + $0x4c] ss:$16 sps:$4 sm:$0xff]   ;;  %v3153_v11 = vld [vmem:[#allocation10 + $0x40] ss:$16 sps:$4 sm:$0xff]  }
  0x4f   :  { %v3154_v12 = vld [vmem:[#allocation10 + $0x48] ss:$16 sps:$4 sm:$0xff]   ;;  %v3155_v13 = vld [vmem:[#allocation10 + $0x64] ss:$16 sps:$4 sm:$0xff]   ;;  %v3157_v14 = vld [vmem:[#allocation10 + $0x6c] ss:$16 sps:$4 sm:$0xff]  }
  0x50   :  { %v3159_v15 = vld [vmem:[#allocation10 + $0x60] ss:$16 sps:$4 sm:$0xff]   ;;  %v3160_v16 = vld [vmem:[#allocation10 + $0x68] ss:$16 sps:$4 sm:$0xff]   ;;  %v3161_v17 = vld [vmem:[#allocation10 + $0x84] ss:$16 sps:$4 sm:$0xff]  }
  0x51   :  { %337 = vmatpush1.bf16.msra.mxu0 %v3147_v7  ;;  %410 = vmatpush1.bf16.msra.mxu1 %v3148_v8  ;;  %v3163_v18 = vld [vmem:[#allocation10 + $0x8c] ss:$16 sps:$4 sm:$0xff]   ;;  %v3165_v19 = vld [vmem:[#allocation10 + $0x80] ss:$16 sps:$4 sm:$0xff]   ;;  %v3166_v20 = vld [vmem:[#allocation10 + $0x88] ss:$16 sps:$4 sm:$0xff]  }
  0x52   :  { %338 = vmatprep.subr.bf16.mxu0 %v3149_v9  ;;  %411 = vmatprep.subr.bf16.mxu1 %v3151_v10  ;;  %v3167_v21 = vld [vmem:[#allocation10 + $0xa4] ss:$16 sps:$4 sm:$0xff]   ;;  %v3169_v22 = vld [vmem:[#allocation10 + $0xac] ss:$16 sps:$4 sm:$0xff]   ;;  %v3171_v23 = vld [vmem:[#allocation10 + $0xa0] ss:$16 sps:$4 sm:$0xff]  }
  0x53   :  { %v3172_v24 = vld [vmem:[#allocation10 + $0xa8] ss:$16 sps:$4 sm:$0xff]   ;;  %v3173_v25 = vld [vmem:[#allocation10 + $0xc4] ss:$16 sps:$4 sm:$0xff]   ;;  %v3175_v26 = vld [vmem:[#allocation10 + $0xcc] ss:$16 sps:$4 sm:$0xff]  }
  0x54   :  { %v3177_v27 = vld [vmem:[#allocation10 + $0xc0] ss:$16 sps:$4 sm:$0xff]   ;;  %v3178_v28 = vld [vmem:[#allocation10 + $0xc8] ss:$16 sps:$4 sm:$0xff]   ;;  %v3179_v29 = vld [vmem:[#allocation10 + $0xe4] ss:$16 sps:$4 sm:$0xff]  }
  0x55   :  { %339 = vmatpush1.bf16.msra.mxu0 %v3153_v11  ;;  %412 = vmatpush1.bf16.msra.mxu1 %v3154_v12  ;;  %v3181_v30 = vld [vmem:[#allocation10 + $0xec] ss:$16 sps:$4 sm:$0xff]   ;;  %v3183_v31 = vld [vmem:[#allocation10 + $0xe0] ss:$16 sps:$4 sm:$0xff]   ;;  %v3184_v32 = vld [vmem:[#allocation10 + $0xe8] ss:$16 sps:$4 sm:$0xff]  }
  0x56   :  { %340 = vmatprep.subr.bf16.mxu0 %v3155_v13  ;;  %413 = vmatprep.subr.bf16.mxu1 %v3157_v14  ;;  %v4012_v33 = vld [vmem:[#allocation12 + $0x4] ss:$16 sps:$4 sm:$0xff]   ;;  %v4014_v34 = vld [vmem:[#allocation12 + $0xc] ss:$16 sps:$4 sm:$0xff]   ;;  %v4016_v36 = vld [vmem:[#allocation12] ss:$16 sps:$4 sm:$0xff]  }
  0x57   :  { %v3185_v35 = vld [vmem:[#allocation7] sm:$0xff]   ;;  %v4018_v37 = vld [vmem:[#allocation12 + $0x8] ss:$16 sps:$4 sm:$0xff]   ;;  %v4024_v39 = vld [vmem:[#allocation12 + $0x2c] ss:$16 sps:$4 sm:$0xff]  }
  0x58   :  { %v4022_v38 = vld [vmem:[#allocation12 + $0x24] ss:$16 sps:$4 sm:$0xff]   ;;  %v4026_v40 = vld [vmem:[#allocation12 + $0x20] ss:$16 sps:$4 sm:$0xff]   ;;  %v4030_v41 = vld [vmem:[#allocation12 + $0x28] ss:$16 sps:$4 sm:$0xff]  }
  0x59   :  { %341 = vmatpush1.bf16.msra.mxu0 %v3159_v15  ;;  %414 = vmatpush1.bf16.msra.mxu1 %v3160_v16  ;;  %v4034_v42 = vld [vmem:[#allocation12 + $0x44] ss:$16 sps:$4 sm:$0xff]   ;;  %v4036_v43 = vld [vmem:[#allocation12 + $0x4c] ss:$16 sps:$4 sm:$0xff]   ;;  %v4040_v45 = vld [vmem:[#allocation12 + $0x40] ss:$16 sps:$4 sm:$0xff]  }
  0x5a   :  { %342 = vmatprep.subr.bf16.mxu0 %v3161_v17  ;;  %415 = vmatprep.subr.bf16.mxu1 %v3163_v18  ;;  %v4042_v46 = vld [vmem:[#allocation12 + $0x48] ss:$16 sps:$4 sm:$0xff]   ;;  %v4046_v47 = vld [vmem:[#allocation12 + $0x64] ss:$16 sps:$4 sm:$0xff]   ;;  %v4050_v48 = vld [vmem:[#allocation12 + $0x6c] ss:$16 sps:$4 sm:$0xff]  }
  0x5b   :  { %v4052_v49 = vld [vmem:[#allocation12 + $0x60] ss:$16 sps:$4 sm:$0xff]   ;;  %v4054_v50 = vld [vmem:[#allocation12 + $0x68] ss:$16 sps:$4 sm:$0xff]   ;;  %v4058_v51 = vld [vmem:[#allocation12 + $0x84] ss:$16 sps:$4 sm:$0xff]  }
  0x5c   :  { %v4062_v52 = vld [vmem:[#allocation12 + $0x8c] ss:$16 sps:$4 sm:$0xff]   ;;  %v3211_v53 = vld [vmem:[#allocation7 + $0x10] sm:$0xff]   ;;  %v4068_v55 = vld [vmem:[#allocation12 + $0x88] ss:$16 sps:$4 sm:$0xff]  }
  0x5d   :  { %343 = vmatpush1.bf16.msra.mxu0 %v3165_v19  ;;  %416 = vmatpush1.bf16.msra.mxu1 %v3166_v20  ;;  %v4066_v54 = vld [vmem:[#allocation12 + $0x80] ss:$16 sps:$4 sm:$0xff]   ;;  %v4070_v56 = vld [vmem:[#allocation12 + $0xa4] ss:$16 sps:$4 sm:$0xff]   ;;  %v4072_v57 = vld [vmem:[#allocation12 + $0xac] ss:$16 sps:$4 sm:$0xff]  }
  0x5e   :  { %344 = vmatprep.subr.bf16.mxu0 %v3167_v21  ;;  %417 = vmatprep.subr.bf16.mxu1 %v3169_v22  ;;  %v4078_v58 = vld [vmem:[#allocation12 + $0xa0] ss:$16 sps:$4 sm:$0xff]   ;;  %v4080_v59 = vld [vmem:[#allocation12 + $0xa8] ss:$16 sps:$4 sm:$0xff]   ;;  %v4082_v60 = vld [vmem:[#allocation12 + $0xc4] ss:$16 sps:$4 sm:$0xff]  }
  0x5f   :  { %v4084_v61 = vld [vmem:[#allocation12 + $0xcc] ss:$16 sps:$4 sm:$0xff]   ;;  %v4092_v63 = vld [vmem:[#allocation12 + $0xc0] ss:$16 sps:$4 sm:$0xff]   ;;  %v4094_v1 = vld [vmem:[#allocation12 + $0xc8] ss:$16 sps:$4 sm:$0xff]  }
  0x60   :  { %v3224_v62 = vld [vmem:[#allocation7 + $0x18] sm:$0xff]   ;;  %v4096_v2 = vld [vmem:[#allocation12 + $0xe4] ss:$16 sps:$4 sm:$0xff]   ;;  %v4104_v4 = vld [vmem:[#allocation12 + $0xe0] ss:$16 sps:$4 sm:$0xff]  }
  0x61   :  { %345 = vmatpush1.bf16.msra.mxu0 %v3171_v23  ;;  %418 = vmatpush1.bf16.msra.mxu1 %v3172_v24  ;;  %v4098_v3 = vld [vmem:[#allocation12 + $0xec] ss:$16 sps:$4 sm:$0xff]   ;;  %v4106_v5 = vld [vmem:[#allocation12 + $0xe8] ss:$16 sps:$4 sm:$0xff]   ;;  %v4116_v7 = vld [vmem:[#allocation13 + $0x4] ss:$16 sps:$4 sm:$0xff]  }
  0x62   :  { %346 = vmatprep.subr.bf16.mxu0 %v3173_v25  ;;  %419 = vmatprep.subr.bf16.mxu1 %v3175_v26  ;;  %v534_v6 = vld [vmem:[#allocation3] sm:$0xf]  ;;  %v4118_v8 = vld [vmem:[#allocation13 + $0xc] ss:$16 sps:$4 sm:$0xff]   ;;  %v4120_v9 = vld [vmem:[#allocation13] ss:$16 sps:$4 sm:$0xff]  }
  0x63   :  { %v4122_v10 = vld [vmem:[#allocation13 + $0x8] ss:$16 sps:$4 sm:$0xff]   ;;  %v4128_v11 = vld [vmem:[#allocation13 + $0x24] ss:$16 sps:$4 sm:$0xff]   ;;  %v4130_v12 = vld [vmem:[#allocation13 + $0x2c] ss:$16 sps:$4 sm:$0xff]  }
  0x64   :  { %v4132_v13 = vld [vmem:[#allocation13 + $0x20] ss:$16 sps:$4 sm:$0xff]   ;;  %v4134_v14 = vld [vmem:[#allocation13 + $0x28] ss:$16 sps:$4 sm:$0xff]   ;;  %v4140_v15 = vld [vmem:[#allocation13 + $0x44] ss:$16 sps:$4 sm:$0xff]  }
  0x65   :  { %347 = vmatpush1.bf16.msra.mxu0 %v3177_v27  ;;  %420 = vmatpush1.bf16.msra.mxu1 %v3178_v28  ;;  %v4142_v16 = vld [vmem:[#allocation13 + $0x4c] ss:$16 sps:$4 sm:$0xff]   ;;  %v4144_v17 = vld [vmem:[#allocation13 + $0x40] ss:$16 sps:$4 sm:$0xff]   ;;  %v4146_v18 = vld [vmem:[#allocation13 + $0x48] ss:$16 sps:$4 sm:$0xff]  }
  0x66   :  { %348 = vmatprep.subr.bf16.mxu0 %v3179_v29  ;;  %421 = vmatprep.subr.bf16.mxu1 %v3181_v30  ;;  %5986 = vst [vmem:[#allocation20_spill] sm:$0xff] %v4142_v16  ;;  %5987 = vst [vmem:[#allocation21_spill] sm:$0xff] %v4144_v17  ;;  %v4152_v19 = vld [vmem:[#allocation13 + $0x64] ss:$16 sps:$4 sm:$0xff]   ;;  %v4154_v20 = vld [vmem:[#allocation13 + $0x6c] ss:$16 sps:$4 sm:$0xff]  }
  0x67   :  { %5988 = vst [vmem:[#allocation22_spill] sm:$0xff] %v4146_v18  ;;  %5989 = vst [vmem:[#allocation23_spill] sm:$0xff] %v4152_v19  ;;  %v4156_v21 = vld [vmem:[#allocation13 + $0x60] ss:$16 sps:$4 sm:$0xff]   ;;  %v4158_v22 = vld [vmem:[#allocation13 + $0x68] ss:$16 sps:$4 sm:$0xff]  }
  0x68   :  { %5990 = vst [vmem:[#allocation24_spill] sm:$0xff] %v4154_v20  ;;  %5991 = vst [vmem:[#allocation25_spill] sm:$0xff] %v4156_v21  ;;  %v4164_v23 = vld [vmem:[#allocation13 + $0x84] ss:$16 sps:$4 sm:$0xff]   ;;  %v4166_v24 = vld [vmem:[#allocation13 + $0x8c] ss:$16 sps:$4 sm:$0xff]  }
  0x69   :  { %349 = vmatpush1.bf16.msra.mxu0 %v3183_v31  ;;  %422 = vmatpush1.bf16.msra.mxu1 %v3184_v32  ;;  %5992 = vst [vmem:[#allocation26_spill] sm:$0xff] %v4158_v22  ;;  %5993 = vst [vmem:[#allocation27_spill] sm:$0xff] %v4164_v23  ;;  %v4170_v25 = vld [vmem:[#allocation13 + $0x80] ss:$16 sps:$4 sm:$0xff]   ;;  %v4172_v26 = vld [vmem:[#allocation13 + $0x88] ss:$16 sps:$4 sm:$0xff]  }
  0x6a   :  { %737 = vmatprep.subr.bf16.mxu0 %v4012_v33  ;;  %778 = vmatprep.subr.bf16.mxu1 %v4014_v34  ;;  %5994 = vst [vmem:[#allocation28_spill] sm:$0xff] %v4166_v24  ;;  %5995 = vst [vmem:[#allocation29_spill] sm:$0xff] %v4170_v25  ;;  %v4176_v27 = vld [vmem:[#allocation13 + $0xa4] ss:$16 sps:$4 sm:$0xff]   ;;  %v4178_v28 = vld [vmem:[#allocation13 + $0xac] ss:$16 sps:$4 sm:$0xff]  }
  0x6b   :  { %5996 = vst [vmem:[#allocation30_spill] sm:$0xff] %v4172_v26  ;;  %5997 = vst [vmem:[#allocation31_spill] sm:$0xff] %v4176_v27  ;;  %v4180_v29 = vld [vmem:[#allocation13 + $0xa0] ss:$16 sps:$4 sm:$0xff]   ;;  %v4182_v30 = vld [vmem:[#allocation13 + $0xa8] ss:$16 sps:$4 sm:$0xff]  }
  0x6c   :  { %367 = vmatmul.mubr.bf16.vlgmr.msra.gmra.mrb[0].mxu0 %v3185_v35  ;;  %440 = vmatmul.mubr.bf16.vlgmr.msra.gmra.mrb[0].mxu1 %v3185_v35  ;;  %5998 = vst [vmem:[#allocation32_spill] sm:$0xff] %v4178_v28  ;;  %5999 = vst [vmem:[#allocation33_spill] sm:$0xff] %v4180_v29  ;;  %v4188_v31 = vld [vmem:[#allocation13 + $0xc4] ss:$16 sps:$4 sm:$0xff]   ;;  %v4190_v32 = vld [vmem:[#allocation13 + $0xcc] ss:$16 sps:$4 sm:$0xff]  }
  0x6d   :  { %738 = vmatpush1.bf16.msra.mxu0 %v4016_v36  ;;  %779 = vmatpush1.bf16.msra.mxu1 %v4018_v37  ;;  %6000 = vst [vmem:[#allocation34_spill] sm:$0xff] %v4182_v30  ;;  %6001 = vst [vmem:[#allocation35_spill] sm:$0xff] %v4188_v31  ;;  %v4192_v35 = vld [vmem:[#allocation13 + $0xc0] ss:$16 sps:$4 sm:$0xff]  }
  0x6e   :  { %739 = vmatprep.subr.bf16.mxu0 %v4022_v38  ;;  %780 = vmatprep.subr.bf16.mxu1 %v4024_v39  ;;  %6002 = vst [vmem:[#allocation36_spill] sm:$0xff] %v4190_v32  ;;  %6003 = vst [vmem:[#allocation37_spill] sm:$0xff] %v4192_v35 }
  0x6f   :  { %376 = vmatprep.mubr.bf16.mxu0 %v5643_v0  ;;  %449 = vmatprep.mubr.bf16.mxu1 %v5643_v0 }
  0x71   :  { %740 = vmatpush1.bf16.msra.mxu0 %v4026_v40  ;;  %781 = vmatpush1.bf16.msra.mxu1 %v4030_v41 }
  0x72   :  { %741 = vmatprep.subr.bf16.mxu0 %v4034_v42  ;;  %782 = vmatprep.subr.bf16.mxu1 %v4036_v43 }
  0x74   :  { %377 = vmatmul.mubr.bf16.gmra.mrb[4].mxu0 %v3198_v44  ;;  %450 = vmatmul.mubr.bf16.gmra.mrb[4].mxu1 %v3198_v44  ;;  %v4194_v44 = vld [vmem:[#allocation13 + $0xc8] ss:$16 sps:$4 sm:$0xff]  }
  0x75   :  { %742 = vmatpush1.bf16.msra.mxu0 %v4040_v45  ;;  %783 = vmatpush1.bf16.msra.mxu1 %v4042_v46  ;;  %6004 = vst [vmem:[#allocation38_spill] sm:$0xff] %v4194_v44 }
  0x76   :  { %743 = vmatprep.subr.bf16.mxu0 %v4046_v47  ;;  %784 = vmatprep.subr.bf16.mxu1 %v4050_v48 }
  0x77   :  { %386 = vmatprep.mubr.bf16.mxu0 %v5643_v0  ;;  %459 = vmatprep.mubr.bf16.mxu1 %v5643_v0 }
  0x79   :  { %744 = vmatpush1.bf16.msra.mxu0 %v4052_v49  ;;  %785 = vmatpush1.bf16.msra.mxu1 %v4054_v50 }
  0x7a   :  { %745 = vmatprep.subr.bf16.mxu0 %v4058_v51  ;;  %786 = vmatprep.subr.bf16.mxu1 %v4062_v52 }
  0x7c   :  { %387 = vmatmul.mubr.bf16.gmra.mrb[8].mxu0 %v3211_v53  ;;  %460 = vmatmul.mubr.bf16.gmra.mrb[8].mxu1 %v3211_v53  ;;  %v4200_v53 = vld [vmem:[#allocation13 + $0xe4] ss:$16 sps:$4 sm:$0xff]  }
  0x7d   :  { %746 = vmatpush1.bf16.msra.mxu0 %v4066_v54  ;;  %787 = vmatpush1.bf16.msra.mxu1 %v4068_v55  ;;  %6005 = vst [vmem:[#allocation39_spill] sm:$0xff] %v4200_v53 }
  0x7e   :  { %747 = vmatprep.subr.bf16.mxu0 %v4070_v56  ;;  %788 = vmatprep.subr.bf16.mxu1 %v4072_v57 }
  0x7f   :  { %396 = vmatprep.mubr.bf16.mxu0 %v5643_v0  ;;  %469 = vmatprep.mubr.bf16.mxu1 %v5643_v0 }
  0x81   :  { %748 = vmatpush1.bf16.msra.mxu0 %v4078_v58  ;;  %789 = vmatpush1.bf16.msra.mxu1 %v4080_v59 }
  0x82   :  { %749 = vmatprep.subr.bf16.mxu0 %v4082_v60  ;;  %790 = vmatprep.subr.bf16.mxu1 %v4084_v61 }
  0x84   :  { %397 = vmatmul.mubr.bf16.gmra.mrb[12].mxu0 %v3224_v62  ;;  %470 = vmatmul.mubr.bf16.gmra.mrb[12].mxu1 %v3224_v62  ;;  %v4202_v62 = vld [vmem:[#allocation13 + $0xec] ss:$16 sps:$4 sm:$0xff]  }
  0x85   :  { %750 = vmatpush1.bf16.msra.mxu0 %v4092_v63  ;;  %791 = vmatpush1.bf16.msra.mxu1 %v4094_v1  ;;  %6006 = vst [vmem:[#allocation40_spill] sm:$0xff] %v4202_v62 }
  0x86   :  { %751 = vmatprep.subr.bf16.mxu0 %v4096_v2  ;;  %792 = vmatprep.subr.bf16.mxu1 %v4098_v3 }
  0x87   :  { %769 = vmatprep.mubr.bf16.mxu0 %v5643_v0  ;;  %810 = vmatprep.mubr.bf16.mxu1 %v5643_v0  ;;  %v4206_v0 = vld [vmem:[#allocation13 + $0xe8] ss:$16 sps:$4 sm:$0xff]  }
  0x88   :  { %6008 = vst [vmem:[#allocation42_spill] sm:$0xff] %v4206_v0 }
  0x89   :  { %752 = vmatpush1.bf16.msra.mxu0 %v4104_v4  ;;  %793 = vmatpush1.bf16.msra.mxu1 %v4106_v5 }
  0x8a   :  { %1232 = vmatprep.subr.bf16.mxu0 %v4116_v7  ;;  %1273 = vmatprep.subr.bf16.mxu1 %v4118_v8 }
  0x8c   :  { %770 = vmatmul.mubr.bf16.vlgmr.msra.gmra.mrb[16].mxu0 %v534_v6  ;;  %811 = vmatmul.mubr.bf16.vlgmr.msra.gmra.mrb[16].mxu1 %v534_v6  ;;  %v4204_v6 = vld [vmem:[#allocation13 + $0xe0] ss:$16 sps:$4 sm:$0xff]  }
  0x8d   :  { %1233 = vmatpush1.bf16.msra.mxu0 %v4120_v9  ;;  %1274 = vmatpush1.bf16.msra.mxu1 %v4122_v10  ;;  %6007 = vst [vmem:[#allocation41_spill] sm:$0xff] %v4204_v6 }
  0x8e   :  { %1234 = vmatprep.subr.bf16.mxu0 %v4128_v11  ;;  %1275 = vmatprep.subr.bf16.mxu1 %v4130_v12 }
  0x91   :  { %1235 = vmatpush1.bf16.msra.mxu0 %v4132_v13  ;;  %1276 = vmatpush1.bf16.msra.mxu1 %v4134_v14 }
  0x92   :  { %1236 = vmatprep.subr.bf16.mxu0 %v4140_v15  ;;  %1277 = vmatprep.subr.bf16.mxu1 %v4142_v16 }
  0x95   :  { %1237 = vmatpush1.bf16.msra.mxu0 %v4144_v17  ;;  %1278 = vmatpush1.bf16.msra.mxu1 %v4146_v18 }
  0x96   :  { %1238 = vmatprep.subr.bf16.mxu0 %v4152_v19  ;;  %1279 = vmatprep.subr.bf16.mxu1 %v4154_v20 }
  0x99   :  { %1239 = vmatpush1.bf16.msra.mxu0 %v4156_v21  ;;  %1280 = vmatpush1.bf16.msra.mxu1 %v4158_v22 }
  0x9a   :  { %1240 = vmatprep.subr.bf16.mxu0 %v4164_v23  ;;  %1281 = vmatprep.subr.bf16.mxu1 %v4166_v24 }
  0x9d   :  { %1241 = vmatpush1.bf16.msra.mxu0 %v4170_v25  ;;  %1282 = vmatpush1.bf16.msra.mxu1 %v4172_v26 }
  0x9e   :  { %1242 = vmatprep.subr.bf16.mxu0 %v4176_v27  ;;  %1283 = vmatprep.subr.bf16.mxu1 %v4178_v28  ;;  %v4296_v28 = vld [vmem:[#allocation13 + $0x1ec] ss:$16 sps:$4 sm:$0xff]  }
  0x9f   :  { %6038 = vst [vmem:[#allocation72_spill] sm:$0xff] %v4296_v28 }
  0xa1   :  { %1243 = vmatpush1.bf16.msra.mxu0 %v4180_v29  ;;  %1284 = vmatpush1.bf16.msra.mxu1 %v4182_v30  ;;  %v4280_v30 = vld [vmem:[#allocation13 + $0x1c4] ss:$16 sps:$4 sm:$0xff]   ;;  %v4282_v29 = vld [vmem:[#allocation13 + $0x1cc] ss:$16 sps:$4 sm:$0xff]  }
  0xa2   :  { %1244 = vmatprep.subr.bf16.mxu0 %v4188_v31  ;;  %1285 = vmatprep.subr.bf16.mxu1 %v4190_v32  ;;  %v4212_v32 = vld [vmem:[#allocation13 + $0x104] ss:$16 sps:$4 sm:$0xff]   ;;  %v4218_v31 = vld [vmem:[#allocation13 + $0x108] ss:$16 sps:$4 sm:$0xff]   ;;  %6033 = vst [vmem:[#allocation67_spill] sm:$0xff] %v4280_v30  ;;  %6034 = vst [vmem:[#allocation68_spill] sm:$0xff] %v4282_v29 }
  0xa3   :  { %6009 = vst [vmem:[#allocation43_spill] sm:$0xff] %v4212_v32  ;;  %6012 = vst [vmem:[#allocation46_spill] sm:$0xff] %v4218_v31 }
  0xa5   :  { %1245 = vmatpush1.bf16.msra.mxu0 %v4192_v35  ;;  %1286 = vmatpush1.bf16.msra.mxu1 %v4194_v44  ;;  %v4214_v35 = vld [vmem:[#allocation13 + $0x10c] ss:$16 sps:$4 sm:$0xff]   ;;  %v4216_v44 = vld [vmem:[#allocation13 + $0x100] ss:$16 sps:$4 sm:$0xff]  }
  0xa6   :  { %1246 = vmatprep.subr.bf16.mxu0 %v4200_v53  ;;  %1287 = vmatprep.subr.bf16.mxu1 %v4202_v62  ;;  %6010 = vst [vmem:[#allocation44_spill] sm:$0xff] %v4214_v35  ;;  %6011 = vst [vmem:[#allocation45_spill] sm:$0xff] %v4216_v44  ;;  %v4224_v62 = vld [vmem:[#allocation13 + $0x124] ss:$16 sps:$4 sm:$0xff]   ;;  %v4230_v53 = vld [vmem:[#allocation13 + $0x128] ss:$16 sps:$4 sm:$0xff]  }
  0xa7   :  { %6013 = vst [vmem:[#allocation47_spill] sm:$0xff] %v4224_v62  ;;  %6016 = vst [vmem:[#allocation50_spill] sm:$0xff] %v4230_v53 }
  0xa9   :  { %1247 = vmatpush1.bf16.msra.mxu0 %v4204_v6  ;;  %1288 = vmatpush1.bf16.msra.mxu1 %v4206_v0  ;;  %v4226_v6 = vld [vmem:[#allocation13 + $0x12c] ss:$16 sps:$4 sm:$0xff]   ;;  %v4228_v0 = vld [vmem:[#allocation13 + $0x120] ss:$16 sps:$4 sm:$0xff]  }
  0xaa   :  { %1248 = vmatprep.subr.bf16.mxu0 %v4212_v32  ;;  %1289 = vmatprep.subr.bf16.mxu1 %v4214_v35  ;;  %6014 = vst [vmem:[#allocation48_spill] sm:$0xff] %v4226_v6  ;;  %6015 = vst [vmem:[#allocation49_spill] sm:$0xff] %v4228_v0  ;;  %v4236_v35 = vld [vmem:[#allocation13 + $0x144] ss:$16 sps:$4 sm:$0xff]   ;;  %v4242_v32 = vld [vmem:[#allocation13 + $0x148] ss:$16 sps:$4 sm:$0xff]  }
  0xab   :  { %6017 = vst [vmem:[#allocation51_spill] sm:$0xff] %v4236_v35  ;;  %6020 = vst [vmem:[#allocation54_spill] sm:$0xff] %v4242_v32 }
  0xad   :  { %1249 = vmatpush1.bf16.msra.mxu0 %v4216_v44  ;;  %1290 = vmatpush1.bf16.msra.mxu1 %v4218_v31  ;;  %v4238_v44 = vld [vmem:[#allocation13 + $0x14c] ss:$16 sps:$4 sm:$0xff]   ;;  %v4240_v31 = vld [vmem:[#allocation13 + $0x140] ss:$16 sps:$4 sm:$0xff]  }
  0xae   :  { %1250 = vmatprep.subr.bf16.mxu0 %v4224_v62  ;;  %1291 = vmatprep.subr.bf16.mxu1 %v4226_v6  ;;  %6018 = vst [vmem:[#allocation52_spill] sm:$0xff] %v4238_v44  ;;  %6019 = vst [vmem:[#allocation53_spill] sm:$0xff] %v4240_v31  ;;  %v4248_v6 = vld [vmem:[#allocation13 + $0x164] ss:$16 sps:$4 sm:$0xff]   ;;  %v4254_v62 = vld [vmem:[#allocation13 + $0x168] ss:$16 sps:$4 sm:$0xff]  }
  0xaf   :  { %6021 = vst [vmem:[#allocation55_spill] sm:$0xff] %v4248_v6  ;;  %6024 = vst [vmem:[#allocation58_spill] sm:$0xff] %v4254_v62 }
  0xb1   :  { %1251 = vmatpush1.bf16.msra.mxu0 %v4228_v0  ;;  %1292 = vmatpush1.bf16.msra.mxu1 %v4230_v53  ;;  %v4250_v0 = vld [vmem:[#allocation13 + $0x16c] ss:$16 sps:$4 sm:$0xff]   ;;  %v4252_v53 = vld [vmem:[#allocation13 + $0x160] ss:$16 sps:$4 sm:$0xff]  }
  0xb2   :  { %1252 = vmatprep.subr.bf16.mxu0 %v4236_v35  ;;  %1293 = vmatprep.subr.bf16.mxu1 %v4238_v44  ;;  %6022 = vst [vmem:[#allocation56_spill] sm:$0xff] %v4250_v0  ;;  %6023 = vst [vmem:[#allocation57_spill] sm:$0xff] %v4252_v53  ;;  %v4260_v44 = vld [vmem:[#allocation13 + $0x184] ss:$16 sps:$4 sm:$0xff]   ;;  %v4266_v35 = vld [vmem:[#allocation13 + $0x188] ss:$16 sps:$4 sm:$0xff]  }
  0xb3   :  { %6025 = vst [vmem:[#allocation59_spill] sm:$0xff] %v4260_v44  ;;  %6028 = vst [vmem:[#allocation62_spill] sm:$0xff] %v4266_v35 }
  0xb5   :  { %1253 = vmatpush1.bf16.msra.mxu0 %v4240_v31  ;;  %1294 = vmatpush1.bf16.msra.mxu1 %v4242_v32  ;;  %v4262_v31 = vld [vmem:[#allocation13 + $0x18c] ss:$16 sps:$4 sm:$0xff]   ;;  %v4264_v32 = vld [vmem:[#allocation13 + $0x180] ss:$16 sps:$4 sm:$0xff]  }
  0xb6   :  { %1254 = vmatprep.subr.bf16.mxu0 %v4248_v6  ;;  %1295 = vmatprep.subr.bf16.mxu1 %v4250_v0  ;;  %6026 = vst [vmem:[#allocation60_spill] sm:$0xff] %v4262_v31  ;;  %6027 = vst [vmem:[#allocation61_spill] sm:$0xff] %v4264_v32  ;;  %v4272_v0 = vld [vmem:[#allocation13 + $0x1a4] ss:$16 sps:$4 sm:$0xff]   ;;  %v4278_v6 = vld [vmem:[#allocation13 + $0x1a8] ss:$16 sps:$4 sm:$0xff]  }
  0xb7   :  { %6029 = vst [vmem:[#allocation63_spill] sm:$0xff] %v4272_v0  ;;  %6032 = vst [vmem:[#allocation66_spill] sm:$0xff] %v4278_v6 }
  0xb9   :  { %1255 = vmatpush1.bf16.msra.mxu0 %v4252_v53  ;;  %1296 = vmatpush1.bf16.msra.mxu1 %v4254_v62  ;;  %v4274_v53 = vld [vmem:[#allocation13 + $0x1ac] ss:$16 sps:$4 sm:$0xff]   ;;  %v4276_v62 = vld [vmem:[#allocation13 + $0x1a0] ss:$16 sps:$4 sm:$0xff]  }
  0xba   :  { %1256 = vmatprep.subr.bf16.mxu0 %v4260_v44  ;;  %1297 = vmatprep.subr.bf16.mxu1 %v4262_v31  ;;  %6030 = vst [vmem:[#allocation64_spill] sm:$0xff] %v4274_v53  ;;  %6031 = vst [vmem:[#allocation65_spill] sm:$0xff] %v4276_v62  ;;  %v536_v31 = vld [vmem:[#allocation5] sm:$0xf]  ;;  %v4294_v44 = vld [vmem:[#allocation13 + $0x1e4] ss:$16 sps:$4 sm:$0xff]  }
  0xbb   :  { %6037 = vst [vmem:[#allocation71_spill] sm:$0xff] %v4294_v44  ;;  %1264 = vmatprep.mubr.bf16.mxu0 %v536_v31  ;;  %1305 = vmatprep.mubr.bf16.mxu1 %v536_v31  ;;  %v130_v31 = vlaneseq }
  0xbd   :  { %1257 = vmatpush1.bf16.msra.mxu0 %v4264_v32  ;;  %1298 = vmatpush1.bf16.msra.mxu1 %v4266_v35  ;;  %v4288_v35 = vld [vmem:[#allocation13 + $0x1c0] ss:$16 sps:$4 sm:$0xff]   ;;  %v4290_v32 = vld [vmem:[#allocation13 + $0x1c8] ss:$16 sps:$4 sm:$0xff]  }
  0xbe   :  { %1258 = vmatprep.subr.bf16.mxu0 %v4272_v0  ;;  %1299 = vmatprep.subr.bf16.mxu1 %v4274_v53  ;;  %6035 = vst [vmem:[#allocation69_spill] sm:$0xff] %v4288_v35  ;;  %6036 = vst [vmem:[#allocation70_spill] sm:$0xff] %v4290_v32 }
  0xc1   :  { %1259 = vmatpush1.bf16.msra.mxu0 %v4276_v62  ;;  %1300 = vmatpush1.bf16.msra.mxu1 %v4278_v6  ;;  %v4300_v6 = vld [vmem:[#allocation13 + $0x1e0] ss:$16 sps:$4 sm:$0xff]   ;;  %v4302_v62 = vld [vmem:[#allocation13 + $0x1e8] ss:$16 sps:$4 sm:$0xff]  }
  0xc2   :  { %1260 = vmatprep.subr.bf16.mxu0 %v4280_v30  ;;  %1301 = vmatprep.subr.bf16.mxu1 %v4282_v29  ;;  %6039 = vst [vmem:[#allocation73_spill] sm:$0xff] %v4300_v6  ;;  %6040 = vst [vmem:[#allocation74_spill] sm:$0xff] %v4302_v62 }
  0xc5   :  { %1261 = vmatpush1.bf16.msra.mxu0 %v4288_v35  ;;  %1302 = vmatpush1.bf16.msra.mxu1 %v4290_v32  ;;  %v4310_v35 = vshrl.u32 %v130_v31, 7 }
  0xc6   :  { %1262 = vmatprep.subr.bf16.mxu0 %v4294_v44  ;;  %1303 = vmatprep.subr.bf16.mxu1 %v4296_v28  ;;  %v128_v28 = vld [vmem:[%s5638_s2] sm:$0xf] }
  0xc7   :  { %6041 = vst [vmem:[#allocation75_spill] sm:$0xff] %v4310_v35  ;;  %v5737_v32 = vsub.s32 2, %v4310_v35  ;;  %v5746_v29 = vsub.s32 3, %v4310_v35  ;;  %v5747_v30 = vsub.s32 0, %v4310_v35 }
  0xc9   :  { %1263 = vmatpush1.bf16.msra.mxu0 %v4300_v6  ;;  %1304 = vmatpush1.bf16.msra.mxu1 %v4302_v62  ;;  %v5754_v6 = vsub.s32 1, %v4310_v35  ;;  %v4329_v62 = vrot.slane %v128_v28, %v5746_v29  ;;  %v133_v44 = vrot.slane %v128_v28, %v5747_v30 }
  0xca   :  { %1346 = vmatprep.subr.bf16.mxu0 %v4012_v33  ;;  %1387 = vmatprep.subr.bf16.mxu1 %v4014_v34  ;;  %v4321_v33 = vrot.slane %v128_v28, %v5737_v32 }
  0xcb   :  { %v137_v27 = vrot.slane %v128_v28, %v5754_v6 }
 0x13f   :  { %v4323_v34 = vpop.f32.mrb[0].mxu0  ;;  %v4325_v31 = vpop.f32.mrb[0].mxu1 }
 0x140   :  { %v370_v53 = vpop.f32.mrb[1].mxu0  ;;  %v443_v0 = vpop.f32.mrb[1].mxu1 }
 0x141   :  { %v372_v26 = vpop.f32.mrb[2].mxu0  ;;  %v445_v25 = vpop.f32.mrb[2].mxu1 }
 0x142   :  { %v4335_v32 = vadd.f32 %v372_v26, %v133_v44  ;;  %v374_v24 = vpop.f32.mrb[3].mxu0  ;;  %v4338_v23 = vadd.f32 %v445_v25, %v4321_v33  ;;  %v447_v22 = vpop.f32.mrb[3].mxu1 }
 0x143   :  { %v4340_v21 = vadd.f32 %v374_v24, %v137_v27  ;;  %v4343_v29 = vadd.f32 %v447_v22, %v4329_v62 }
 0x144   :  { %6042 = vst [vmem:[#allocation76_spill] sm:$0xff] %v4335_v32  ;;  %6043 = vst [vmem:[#allocation77_spill] sm:$0xff] %v4338_v23 }
 0x145   :  { %6044 = vst [vmem:[#allocation78_spill] sm:$0xff] %v4340_v21  ;;  %6045 = vst [vmem:[#allocation79_spill] sm:$0xff] %v4343_v29 }
 0x147   :  { %v378_v30 = vpop.f32.mrb[4].mxu0  ;;  %v451_v20 = vpop.f32.mrb[4].mxu1 }
 0x148   :  { %v4345_v19 = vadd.f32 %v378_v30, %v133_v44  ;;  %v380_v35 = vpop.f32.mrb[5].mxu0  ;;  %v4348_v28 = vadd.f32 %v451_v20, %v4321_v33  ;;  %v453_v26 = vpop.f32.mrb[5].mxu1 }
 0x149   :  { %v4350_v6 = vadd.f32 %v380_v35, %v137_v27  ;;  %v382_v32 = vpop.f32.mrb[6].mxu0  ;;  %v4353_v25 = vadd.f32 %v453_v26, %v4329_v62  ;;  %v455_v24 = vpop.f32.mrb[6].mxu1 }
 0x14a   :  { %6046 = vst [vmem:[#allocation80_spill] sm:$0xff] %v4345_v19  ;;  %6047 = vst [vmem:[#allocation81_spill] sm:$0xff] %v4348_v28  ;;  %v4355_v21 = vadd.f32 %v382_v32, %v133_v44  ;;  %v384_v22 = vpop.f32.mrb[7].mxu0  ;;  %v4358_v29 = vadd.f32 %v455_v24, %v4321_v33  ;;  %v457_v30 = vpop.f32.mrb[7].mxu1 }
 0x14b   :  { %6048 = vst [vmem:[#allocation82_spill] sm:$0xff] %v4350_v6  ;;  %6049 = vst [vmem:[#allocation83_spill] sm:$0xff] %v4353_v25  ;;  %v4360_v19 = vadd.f32 %v384_v22, %v137_v27  ;;  %v4363_v20 = vadd.f32 %v457_v30, %v4329_v62 }
 0x14c   :  { %6050 = vst [vmem:[#allocation84_spill] sm:$0xff] %v4355_v21  ;;  %6051 = vst [vmem:[#allocation85_spill] sm:$0xff] %v4358_v29 }
 0x14d   :  { %6052 = vst [vmem:[#allocation86_spill] sm:$0xff] %v4360_v19  ;;  %6053 = vst [vmem:[#allocation87_spill] sm:$0xff] %v4363_v20 }
 0x14f   :  { %v388_v28 = vpop.f32.mrb[8].mxu0  ;;  %v461_v35 = vpop.f32.mrb[8].mxu1 }
 0x150   :  { %v4365_v6 = vadd.f32 %v388_v28, %v133_v44  ;;  %v390_v23 = vpop.f32.mrb[9].mxu0  ;;  %v4368_v26 = vadd.f32 %v461_v35, %v4321_v33  ;;  %v463_v32 = vpop.f32.mrb[9].mxu1 }
 0x151   :  { %v4370_v21 = vadd.f32 %v390_v23, %v137_v27  ;;  %v392_v25 = vpop.f32.mrb[10].mxu0  ;;  %v4373_v24 = vadd.f32 %v463_v32, %v4329_v62  ;;  %v465_v22 = vpop.f32.mrb[10].mxu1 }
 0x152   :  { %6054 = vst [vmem:[#allocation88_spill] sm:$0xff] %v4365_v6  ;;  %6055 = vst [vmem:[#allocation89_spill] sm:$0xff] %v4368_v26  ;;  %v4375_v19 = vadd.f32 %v392_v25, %v133_v44  ;;  %v394_v30 = vpop.f32.mrb[11].mxu0  ;;  %v4378_v20 = vadd.f32 %v465_v22, %v4321_v33  ;;  %v467_v28 = vpop.f32.mrb[11].mxu1 }
 0x153   :  { %6056 = vst [vmem:[#allocation90_spill] sm:$0xff] %v4370_v21  ;;  %6057 = vst [vmem:[#allocation91_spill] sm:$0xff] %v4373_v24  ;;  %v4380_v6 = vadd.f32 %v394_v30, %v137_v27  ;;  %v4383_v35 = vadd.f32 %v467_v28, %v4329_v62 }
 0x154   :  { %6058 = vst [vmem:[#allocation92_spill] sm:$0xff] %v4375_v19  ;;  %6059 = vst [vmem:[#allocation93_spill] sm:$0xff] %v4378_v20 }
 0x155   :  { %6060 = vst [vmem:[#allocation94_spill] sm:$0xff] %v4380_v6  ;;  %6061 = vst [vmem:[#allocation95_spill] sm:$0xff] %v4383_v35 }
 0x157   :  { %v398_v26 = vpop.f32.mrb[12].mxu0  ;;  %v471_v23 = vpop.f32.mrb[12].mxu1 }
 0x158   :  { %v4385_v21 = vadd.f32 %v398_v26, %v133_v44  ;;  %v400_v29 = vpop.f32.mrb[13].mxu0  ;;  %v4388_v32 = vadd.f32 %v471_v23, %v4321_v33  ;;  %v473_v25 = vpop.f32.mrb[13].mxu1 }
 0x159   :  { %v4390_v19 = vadd.f32 %v400_v29, %v137_v27  ;;  %v402_v24 = vpop.f32.mrb[14].mxu0  ;;  %v4393_v22 = vadd.f32 %v473_v25, %v4329_v62  ;;  %v475_v30 = vpop.f32.mrb[14].mxu1  ;;  %v369_v29 = vadd.f32 %v4323_v34, %v133_v44  ;;  %v371_v25 = vadd.f32 %v370_v53, %v137_v27 }
 0x15a   :  { %6062 = vst [vmem:[#allocation96_spill] sm:$0xff] %v4385_v21  ;;  %6063 = vst [vmem:[#allocation97_spill] sm:$0xff] %v4388_v32  ;;  %v4395_v6 = vadd.f32 %v402_v24, %v133_v44  ;;  %v404_v28 = vpop.f32.mrb[15].mxu0  ;;  %v4398_v35 = vadd.f32 %v475_v30, %v4321_v33  ;;  %v477_v26 = vpop.f32.mrb[15].mxu1 }
 0x15b   :  { %6064 = vst [vmem:[#allocation98_spill] sm:$0xff] %v4390_v19  ;;  %6065 = vst [vmem:[#allocation99_spill] sm:$0xff] %v4393_v22  ;;  %v4400_v21 = vadd.f32 %v404_v28, %v137_v27  ;;  %v4403_v23 = vadd.f32 %v477_v26, %v4329_v62  ;;  %v442_v19 = vadd.f32 %v4325_v31, %v4321_v33 }
 0x15c   :  { %6066 = vst [vmem:[#allocation100_spill] sm:$0xff] %v4395_v6  ;;  %6067 = vst [vmem:[#allocation101_spill] sm:$0xff] %v4398_v35  ;;  %v444_v22 = vadd.f32 %v443_v0, %v4329_v62 }
 0x15d   :  { %6068 = vst [vmem:[#allocation102_spill] sm:$0xff] %v4400_v21  ;;  %6069 = vst [vmem:[#allocation103_spill] sm:$0xff] %v4403_v23 }
 0x15f   :  { %v771_v24 = vpop.f32.mrb[16].mxu0  ;;  %v812_v6 = vpop.f32.mrb[16].mxu1 }
 0x160   :  { %v819_v32 = vadd.f32 %v771_v24, %v369_v29  ;;  %v821_v20 = vadd.f32 %v812_v6, %v442_v19  ;;  %v773_v30 = vpop.f32.mrb[17].mxu0  ;;  %v814_v35 = vpop.f32.mrb[17].mxu1  ;;  %v6101_v29 = vld [vmem:[#allocation50_spill] sm:$0xff]  ;;  %v6103_v24 = vld [vmem:[#allocation52_spill] sm:$0xff] }
 0x161   :  { %v820_v18 = vadd.f32 %v773_v30, %v371_v25  ;;  %v822_v28 = vadd.f32 %v814_v35, %v444_v22  ;;  %v775_v21 = vpop.f32.mrb[18].mxu0  ;;  %v816_v17 = vpop.f32.mrb[18].mxu1  ;;  %v6102_v25 = vld [vmem:[#allocation51_spill] sm:$0xff]  ;;  %v6104_v30 = vld [vmem:[#allocation53_spill] sm:$0xff] }
 0x162   :  { %v3015_v26 = vmul.f32 -1.442695, %v819_v32  ;;  %v776_v23 = vpop.f32.mrb[19].mxu0  ;;  %v817_v16 = vpop.f32.mrb[19].mxu1 }
 0x163   :  { %v3016_v44 = vmul.f32 -1.442695, %v820_v18  ;;  %v3017_v33 = vmul.f32 -1.442695, %v822_v28  ;;  %v6105_v28 = vld [vmem:[#allocation54_spill] sm:$0xff] }
 0x164   :  { %3333 = vpow2.f32 %v3015_v26  ;;  %v6106_v26 = vld [vmem:[#allocation55_spill] sm:$0xff] }
 0x165   :  { %3335 = vpow2.f32 %v3016_v44  ;;  %v6107_v44 = vld [vmem:[#allocation56_spill] sm:$0xff] }
 0x166   :  { %3337 = vpow2.f32 %v3017_v33  ;;  %v6108_v33 = vld [vmem:[#allocation57_spill] sm:$0xff] }
 0x167   :  { %3339 = vtanh.f32 %v821_v20  ;;  %v6070_v20 = vmov 0  }
 0x16e   :  { %v3334_v27 = vpop.eup %3333 }
 0x16f   :  { %v3336_v53 = vpop.eup %3335  ;;  %v826_v0 = vadd.f32 1.0, %v3334_v27  ;;  %v6109_v27 = vld [vmem:[#allocation58_spill] sm:$0xff] }
 0x170   :  { %v832_v62 = vadd.f32 1.0, %v3336_v53  ;;  %v3338_v19 = vpop.eup %3337  ;;  %v6110_v53 = vld [vmem:[#allocation59_spill] sm:$0xff] }
 0x171   :  { %3341 = vrcp.f32 %v826_v0  ;;  %v3340_v6 = vpop.eup %3339  ;;  %v839_v31 = vadd.f32 1.0, %v3338_v19  ;;  %v6111_v0 = vld [vmem:[#allocation60_spill] sm:$0xff]  ;;  %v6113_v19 = vld [vmem:[#allocation62_spill] sm:$0xff] }
 0x172   :  { %3343 = vrcp.f32 %v832_v62  ;;  %v6112_v62 = vld [vmem:[#allocation61_spill] sm:$0xff] }
 0x173   :  { %3345 = vrcp.f32 %v839_v31  ;;  %v6118_v31 = vld [vmem:[#allocation67_spill] sm:$0xff] }
 0x17b   :  { %v3342_v34 = vpop.eup %3341 }
 0x17c   :  { %v3344_v21 = vpop.eup %3343  ;;  %v843_v17 = vmul.f32 %v3342_v34, %v3340_v6  ;;  %v6114_v6 = vld [vmem:[#allocation63_spill] sm:$0xff]  ;;  %v6115_v34 = vld [vmem:[#allocation64_spill] sm:$0xff] }
 0x17d   :  { %v842_v35 = vmul.f32 0.0, %v3344_v21  ;;  %v3346_v18 = vpop.eup %3345  ;;  %v6116_v21 = vld [vmem:[#allocation65_spill] sm:$0xff] }
 0x17f   :  { %v4409_v16 = vadd.f32 %v843_v17, %v842_v35  ;;  %v6117_v17 = vld [vmem:[#allocation66_spill] sm:$0xff]  ;;  %v6119_v35 = vld [vmem:[#allocation68_spill] sm:$0xff] }
 0x181   :  { %3347 = vtanh.f32 %v4409_v16 }
 0x18b   :  { %v3348_v32 = vpop.eup %3347 }
 0x18c   :  { %v846_v22 = vmul.f32 %v3348_v32, %v3346_v18  ;;  %v6120_v18 = vld [vmem:[#allocation69_spill] sm:$0xff]  ;;  %v6121_v32 = vld [vmem:[#allocation70_spill] sm:$0xff] }
 0x18e   :  { %v847_v23 = vpack.c.bf16 %v846_v22, %v846_v22  ;;  %v6122_v22 = vld [vmem:[#allocation71_spill] sm:$0xff] }
 0x190   :  { %1265 = vmatmul.mubr.bf16.vlgmr.msra.gmra.mrb[20].mxu0 %v847_v23  ;;  %1306 = vmatmul.mubr.bf16.vlgmr.msra.gmra.mrb[20].mxu1 %v847_v23 }
 0x191   :  { %1347 = vmatpush1.bf16.msra.mxu0 %v4016_v36  ;;  %1388 = vmatpush1.bf16.msra.mxu1 %v4018_v37  ;;  %v6071_v36 = vld [vmem:[#allocation20_spill] sm:$0xff]  ;;  %v6072_v37 = vld [vmem:[#allocation21_spill] sm:$0xff] }
 0x192   :  { %1348 = vmatprep.subr.bf16.mxu0 %v4022_v38  ;;  %1389 = vmatprep.subr.bf16.mxu1 %v4024_v39  ;;  %v6073_v38 = vld [vmem:[#allocation22_spill] sm:$0xff]  ;;  %v6074_v39 = vld [vmem:[#allocation23_spill] sm:$0xff] }
 0x193   :  { %1378 = vmatprep.mubr.bf16.mxu0 %v6070_v20  ;;  %1419 = vmatprep.mubr.bf16.mxu1 %v6070_v20 }
 0x195   :  { %1349 = vmatpush1.bf16.msra.mxu0 %v4026_v40  ;;  %1390 = vmatpush1.bf16.msra.mxu1 %v4030_v41  ;;  %v6075_v40 = vld [vmem:[#allocation24_spill] sm:$0xff]  ;;  %v6076_v41 = vld [vmem:[#allocation25_spill] sm:$0xff] }
 0x196   :  { %1350 = vmatprep.subr.bf16.mxu0 %v4034_v42  ;;  %1391 = vmatprep.subr.bf16.mxu1 %v4036_v43  ;;  %v6077_v42 = vld [vmem:[#allocation26_spill] sm:$0xff]  ;;  %v6078_v43 = vld [vmem:[#allocation27_spill] sm:$0xff] }
 0x199   :  { %1351 = vmatpush1.bf16.msra.mxu0 %v4040_v45  ;;  %1392 = vmatpush1.bf16.msra.mxu1 %v4042_v46  ;;  %v6079_v45 = vld [vmem:[#allocation28_spill] sm:$0xff]  ;;  %v6080_v46 = vld [vmem:[#allocation29_spill] sm:$0xff] }
 0x19a   :  { %1352 = vmatprep.subr.bf16.mxu0 %v4046_v47  ;;  %1393 = vmatprep.subr.bf16.mxu1 %v4050_v48  ;;  %v6081_v47 = vld [vmem:[#allocation30_spill] sm:$0xff]  ;;  %v6082_v48 = vld [vmem:[#allocation31_spill] sm:$0xff] }
 0x19d   :  { %1353 = vmatpush1.bf16.msra.mxu0 %v4052_v49  ;;  %1394 = vmatpush1.bf16.msra.mxu1 %v4054_v50  ;;  %v6083_v49 = vld [vmem:[#allocation32_spill] sm:$0xff]  ;;  %v6084_v50 = vld [vmem:[#allocation33_spill] sm:$0xff] }
 0x19e   :  { %1354 = vmatprep.subr.bf16.mxu0 %v4058_v51  ;;  %1395 = vmatprep.subr.bf16.mxu1 %v4062_v52  ;;  %v6085_v51 = vld [vmem:[#allocation34_spill] sm:$0xff]  ;;  %v6086_v52 = vld [vmem:[#allocation35_spill] sm:$0xff] }
 0x1a1   :  { %1355 = vmatpush1.bf16.msra.mxu0 %v4066_v54  ;;  %1396 = vmatpush1.bf16.msra.mxu1 %v4068_v55  ;;  %v6087_v54 = vld [vmem:[#allocation36_spill] sm:$0xff]  ;;  %v6088_v55 = vld [vmem:[#allocation37_spill] sm:$0xff] }
 0x1a2   :  { %1356 = vmatprep.subr.bf16.mxu0 %v4070_v56  ;;  %1397 = vmatprep.subr.bf16.mxu1 %v4072_v57  ;;  %v6089_v56 = vld [vmem:[#allocation38_spill] sm:$0xff]  ;;  %v6090_v57 = vld [vmem:[#allocation39_spill] sm:$0xff] }
 0x1a5   :  { %1357 = vmatpush1.bf16.msra.mxu0 %v4078_v58  ;;  %1398 = vmatpush1.bf16.msra.mxu1 %v4080_v59  ;;  %v6091_v58 = vld [vmem:[#allocation40_spill] sm:$0xff]  ;;  %v6092_v59 = vld [vmem:[#allocation41_spill] sm:$0xff] }
 0x1a6   :  { %1358 = vmatprep.subr.bf16.mxu0 %v4082_v60  ;;  %1399 = vmatprep.subr.bf16.mxu1 %v4084_v61  ;;  %v6093_v60 = vld [vmem:[#allocation42_spill] sm:$0xff]  ;;  %v6094_v61 = vld [vmem:[#allocation43_spill] sm:$0xff] }
 0x1a9   :  { %1359 = vmatpush1.bf16.msra.mxu0 %v4092_v63  ;;  %1400 = vmatpush1.bf16.msra.mxu1 %v4094_v1  ;;  %v6095_v63 = vld [vmem:[#allocation44_spill] sm:$0xff]  ;;  %v6096_v1 = vld [vmem:[#allocation45_spill] sm:$0xff] }
 0x1aa   :  { %1360 = vmatprep.subr.bf16.mxu0 %v4096_v2  ;;  %1401 = vmatprep.subr.bf16.mxu1 %v4098_v3  ;;  %v6097_v2 = vld [vmem:[#allocation46_spill] sm:$0xff]  ;;  %v6098_v3 = vld [vmem:[#allocation47_spill] sm:$0xff] }
 0x1ad   :  { %1361 = vmatpush1.bf16.msra.mxu0 %v4104_v4  ;;  %1402 = vmatpush1.bf16.msra.mxu1 %v4106_v5  ;;  %v6099_v4 = vld [vmem:[#allocation48_spill] sm:$0xff]  ;;  %v6100_v5 = vld [vmem:[#allocation49_spill] sm:$0xff] }
 0x1ae   :  { %1457 = vmatprep.subr.bf16.mxu0 %v4116_v7  ;;  %1498 = vmatprep.subr.bf16.mxu1 %v4118_v8 }
 0x1b0   :  { %1379 = vmatmul.mubr.bf16.vlgmr.msra.gmra.mrb[24].mxu0 %v847_v23  ;;  %1420 = vmatmul.mubr.bf16.vlgmr.msra.gmra.mrb[24].mxu1 %v847_v23  ;;  %v6123_v23 = vld [vmem:[#allocation72_spill] sm:$0xff] }
 0x1b1   :  { %1458 = vmatpush1.bf16.msra.mxu0 %v4120_v9  ;;  %1499 = vmatpush1.bf16.msra.mxu1 %v4122_v10 }
 0x1b2   :  { %1459 = vmatprep.subr.bf16.mxu0 %v4128_v11  ;;  %1500 = vmatprep.subr.bf16.mxu1 %v4130_v12 }
 0x1b5   :  { %1460 = vmatpush1.bf16.msra.mxu0 %v4132_v13  ;;  %1501 = vmatpush1.bf16.msra.mxu1 %v4134_v14 }
 0x1b6   :  { %1461 = vmatprep.subr.bf16.mxu0 %v4140_v15  ;;  %1502 = vmatprep.subr.bf16.mxu1 %v6071_v36 }
 0x1b9   :  { %1462 = vmatpush1.bf16.msra.mxu0 %v6072_v37  ;;  %1503 = vmatpush1.bf16.msra.mxu1 %v6073_v38 }
 0x1ba   :  { %1463 = vmatprep.subr.bf16.mxu0 %v6074_v39  ;;  %1504 = vmatprep.subr.bf16.mxu1 %v6075_v40 }
 0x1bd   :  { %1464 = vmatpush1.bf16.msra.mxu0 %v6076_v41  ;;  %1505 = vmatpush1.bf16.msra.mxu1 %v6077_v42 }
 0x1be   :  { %1465 = vmatprep.subr.bf16.mxu0 %v6078_v43  ;;  %1506 = vmatprep.subr.bf16.mxu1 %v6079_v45 }
 0x1c1   :  { %1466 = vmatpush1.bf16.msra.mxu0 %v6080_v46  ;;  %1507 = vmatpush1.bf16.msra.mxu1 %v6081_v47 }
 0x1c2   :  { %1467 = vmatprep.subr.bf16.mxu0 %v6082_v48  ;;  %1508 = vmatprep.subr.bf16.mxu1 %v6083_v49 }
 0x1c5   :  { %1468 = vmatpush1.bf16.msra.mxu0 %v6084_v50  ;;  %1509 = vmatpush1.bf16.msra.mxu1 %v6085_v51 }
 0x1c6   :  { %1469 = vmatprep.subr.bf16.mxu0 %v6086_v52  ;;  %1510 = vmatprep.subr.bf16.mxu1 %v6087_v54 }
 0x1c9   :  { %1470 = vmatpush1.bf16.msra.mxu0 %v6088_v55  ;;  %1511 = vmatpush1.bf16.msra.mxu1 %v6089_v56 }
 0x1ca   :  { %1471 = vmatprep.subr.bf16.mxu0 %v6090_v57  ;;  %1512 = vmatprep.subr.bf16.mxu1 %v6091_v58 }
 0x1cd   :  { %1472 = vmatpush1.bf16.msra.mxu0 %v6092_v59  ;;  %1513 = vmatpush1.bf16.msra.mxu1 %v6093_v60 }
 0x1ce   :  { %1473 = vmatprep.subr.bf16.mxu0 %v6094_v61  ;;  %1514 = vmatprep.subr.bf16.mxu1 %v6095_v63 }
 0x1d1   :  { %1474 = vmatpush1.bf16.msra.mxu0 %v6096_v1  ;;  %1515 = vmatpush1.bf16.msra.mxu1 %v6097_v2 }
 0x1d2   :  { %1475 = vmatprep.subr.bf16.mxu0 %v6098_v3  ;;  %1516 = vmatprep.subr.bf16.mxu1 %v6099_v4 }
 0x1d5   :  { %1476 = vmatpush1.bf16.msra.mxu0 %v6100_v5  ;;  %1517 = vmatpush1.bf16.msra.mxu1 %v6101_v29 }
 0x1d6   :  { %1477 = vmatprep.subr.bf16.mxu0 %v6102_v25  ;;  %1518 = vmatprep.subr.bf16.mxu1 %v6103_v24 }
 0x1d9   :  { %1478 = vmatpush1.bf16.msra.mxu0 %v6104_v30  ;;  %1519 = vmatpush1.bf16.msra.mxu1 %v6105_v28 }
 0x1da   :  { %1479 = vmatprep.subr.bf16.mxu0 %v6106_v26  ;;  %1520 = vmatprep.subr.bf16.mxu1 %v6107_v44 }
 0x1dd   :  { %1480 = vmatpush1.bf16.msra.mxu0 %v6108_v33  ;;  %1521 = vmatpush1.bf16.msra.mxu1 %v6109_v27 }
 0x1de   :  { %1481 = vmatprep.subr.bf16.mxu0 %v6110_v53  ;;  %1522 = vmatprep.subr.bf16.mxu1 %v6111_v0 }
 0x1e1   :  { %1482 = vmatpush1.bf16.msra.mxu0 %v6112_v62  ;;  %1523 = vmatpush1.bf16.msra.mxu1 %v6113_v19  ;;  %v6124_v19 = vld [vmem:[#allocation73_spill] sm:$0xff] }
 0x1e2   :  { %1483 = vmatprep.subr.bf16.mxu0 %v6114_v6  ;;  %1524 = vmatprep.subr.bf16.mxu1 %v6115_v34  ;;  %v6125_v6 = vld [vmem:[#allocation74_spill] sm:$0xff]  ;;  %v4508_v34 = vld [vmem:[#allocation12 + $0x4] ss:$16 sps:$4 sm:$0xff]  }
 0x1e3   :  { %6126 = vst [vmem:[#allocation20_spill] sm:$0xff] %v4508_v34 }
 0x1e5   :  { %1484 = vmatpush1.bf16.msra.mxu0 %v6116_v21  ;;  %1525 = vmatpush1.bf16.msra.mxu1 %v6117_v17  ;;  %v4511_v17 = vld [vmem:[#allocation12 + $0xc] ss:$16 sps:$4 sm:$0xff]  }
 0x1e6   :  { %1485 = vmatprep.subr.bf16.mxu0 %v6118_v31  ;;  %1526 = vmatprep.subr.bf16.mxu1 %v6119_v35  ;;  %6127 = vst [vmem:[#allocation21_spill] sm:$0xff] %v4511_v17 }
 0x1e9   :  { %1486 = vmatpush1.bf16.msra.mxu0 %v6120_v18  ;;  %1527 = vmatpush1.bf16.msra.mxu1 %v6121_v32  ;;  %v512_v32 = vld [vmem:[%s5641_s5] sm:$0xf]  ;;  %v6128_v18 = vld [vmem:[#allocation75_spill] sm:$0xff]  ;;  %s3908_s5 = smov [#allocation15]  }
 0x1ea   :  { %1487 = vmatprep.subr.bf16.mxu0 %v6122_v22  ;;  %1528 = vmatprep.subr.bf16.mxu1 %v6123_v23  ;;  %v6129_v22 = vsub.s32 0, %v6128_v18  ;;  %s2929_s23 = sshll.u32 %s3908_s5, 4  ;;  %s2930_s23 = int_to_ptr.vmem [resolvable:$true] %s2929_s23 }
 0x1eb   :  { %s3869_s24 = scalar_lea.vmem %s2930_s23, 128  ;;  %p3874_p5 = scmp.lt.s32.totalorder %s2930_s23, %s2930_s23 }
 0x1ec   :  { %v4519_v35 = vrot.slane %v512_v32, %v6129_v22  ;;  %v6133_v22 = vsub.s32 3, %v6128_v18  ;;  %p3870_p4 = scmp.ne.s32.totalorder %s2930_s23, %s3869_s24  ;;  %p3875_p6 = scmp.lt.s32.totalorder %s3869_s24, %s3869_s24 }
 0x1ed   :  { %1488 = vmatpush1.bf16.msra.mxu0 %v6124_v19  ;;  %1529 = vmatpush1.bf16.msra.mxu1 %v6125_v6  ;;  %v6131_v19 = vsub.s32 1, %v6128_v18 }
 0x1ee   :  { %1571 = vmatprep.subr.bf16.mxu0 %v4508_v34  ;;  %1612 = vmatprep.subr.bf16.mxu1 %v4511_v17  ;;  %6130 = vst [vmem:[#allocation22_spill] sm:$0xff] %v4519_v35  ;;  %v4529_v28 = vrot.slane %v512_v32, %v6133_v22  ;;  %p3876_p7 = por %p3875_p6, %p3874_p5 }
 0x1ef   :  { %v4523_v23 = vrot.slane %v512_v32, %v6131_v19 }
 0x1f0   :  { %6134 = vst [vmem:[#allocation24_spill] sm:$0xff] %v4529_v28  ;;  %p3877_p8 = pnand %p3876_p7, %p3870_p4 }
 0x1f1   :  { %6132 = vst [vmem:[#allocation23_spill] sm:$0xff] %v4523_v23 }
 0x263   :  { %v1266_v6 = vpop.f32.mrb[20].mxu0  ;;  %v1307_v31 = vpop.f32.mrb[20].mxu1 }
 0x264   :  { %v1267_v34 = vadd.f32 %v1266_v6, %v4519_v35  ;;  %v1268_v21 = vpop.f32.mrb[21].mxu0  ;;  %v1309_v62 = vpop.f32.mrb[21].mxu1  ;;  %v6135_v6 = vsub.s32 2, %v6128_v18 }
 0x265   :  { %v1269_v17 = vadd.f32 %v1268_v21, %v4523_v23  ;;  %v1270_v0 = vpop.f32.mrb[22].mxu0  ;;  %v1311_v53 = vpop.f32.mrb[22].mxu1  ;;  %v1310_v19 = vadd.f32 %v1309_v62, %v4529_v28  ;;  %v6141_v28 = vld [vmem:[#allocation79_spill] sm:$0xff] }
 0x266   :  { %v3082_v27 = vmul.f32 -1.442695, %v1267_v34  ;;  %v1271_v33 = vpop.f32.mrb[23].mxu0  ;;  %v1312_v44 = vpop.f32.mrb[23].mxu1  ;;  %v4534_v35 = vrot.slane %v512_v32, %v6135_v6 }
 0x267   :  { %v3083_v26 = vmul.f32 -1.442695, %v1269_v17  ;;  %v3084_v30 = vmul.f32 -1.442695, %v1310_v19 }
 0x268   :  { %3349 = vpow2.f32 %v3082_v27  ;;  %6136 = vst [vmem:[#allocation25_spill] sm:$0xff] %v4534_v35  ;;  %v1308_v0 = vadd.f32 %v1307_v31, %v4534_v35  ;;  %v6138_v31 = vld [vmem:[#allocation76_spill] sm:$0xff] }
 0x269   :  { %3351 = vpow2.f32 %v3083_v26 }
 0x26a   :  { %3353 = vpow2.f32 %v3084_v30 }
 0x26b   :  { %3355 = vtanh.f32 %v1308_v0 }
 0x272   :  { %v3350_v53 = vpop.eup %3349 }
 0x273   :  { %v3352_v34 = vpop.eup %3351  ;;  %v1317_v33 = vadd.f32 1.0, %v3350_v53  ;;  %v6139_v53 = vld [vmem:[#allocation77_spill] sm:$0xff] }
 0x274   :  { %v1323_v44 = vadd.f32 1.0, %v3352_v34  ;;  %v3354_v21 = vpop.eup %3353 }
 0x275   :  { %3357 = vrcp.f32 %v1317_v33  ;;  %v3356_v27 = vpop.eup %3355  ;;  %v1330_v22 = vadd.f32 1.0, %v3354_v21  ;;  %v6140_v33 = vld [vmem:[#allocation78_spill] sm:$0xff] }
 0x276   :  { %3359 = vrcp.f32 %v1323_v44 }
 0x277   :  { %3361 = vrcp.f32 %v1330_v22 }
 0x27f   :  { %v3358_v26 = vpop.eup %3357 }
 0x280   :  { %v3360_v17 = vpop.eup %3359  ;;  %v1334_v62 = vmul.f32 %v3358_v26, %v3356_v27 }
 0x281   :  { %v1333_v18 = vmul.f32 0.0, %v3360_v17  ;;  %v3362_v22 = vpop.eup %3361 }
 0x283   :  { %v4537_v32 = vadd.f32 %v1334_v62, %v1333_v18  ;;  %v1380_v19 = vpop.f32.mrb[24].mxu0  ;;  %v1421_v6 = vpop.f32.mrb[24].mxu1 }
 0x284   :  { %v1428_v35 = vadd.f32 %v1380_v19, %v6138_v31  ;;  %v1430_v30 = vadd.f32 %v1421_v6, %v6139_v53  ;;  %v1382_v0 = vpop.f32.mrb[25].mxu0  ;;  %v1423_v34 = vpop.f32.mrb[25].mxu1 }
 0x285   :  { %6137 = vst [vmem:[#allocation26_spill] sm:$0xff] %v4537_v32  ;;  %3363 = vtanh.f32 %v4537_v32  ;;  %v1429_v44 = vadd.f32 %v1382_v0, %v6140_v33  ;;  %v1431_v23 = vadd.f32 %v1423_v34, %v6141_v28  ;;  %v1384_v27 = vpop.f32.mrb[26].mxu0  ;;  %v1425_v21 = vpop.f32.mrb[26].mxu1 }
 0x286   :  { %v3085_v26 = vmul.f32 -1.442695, %v1428_v35  ;;  %v1385_v17 = vpop.f32.mrb[27].mxu0  ;;  %v1426_v62 = vpop.f32.mrb[27].mxu1 }
 0x287   :  { %v3086_v18 = vmul.f32 -1.442695, %v1429_v44  ;;  %v3087_v31 = vmul.f32 -1.442695, %v1431_v23  ;;  %v4561_v62 = vld [vmem:[#allocation12 + $0x2c] ss:$16 sps:$4 sm:$0xff]  }
 0x288   :  { %3365 = vpow2.f32 %v3085_v26 }
 0x289   :  { %3367 = vpow2.f32 %v3086_v18  ;;  %v4566_v18 = vld [vmem:[#allocation12 + $0x20] ss:$16 sps:$4 sm:$0xff]  }
 0x28a   :  { %3369 = vpow2.f32 %v3087_v31  ;;  %v4575_v31 = vld [vmem:[#allocation12 + $0x4c] ss:$16 sps:$4 sm:$0xff]  }
 0x28b   :  { %3371 = vtanh.f32 %v1430_v30 }
 0x28f   :  { %v3364_v19 = vpop.eup %3363 }
 0x290   :  { %v1337_v6 = vmul.f32 %v3364_v19, %v3362_v22  ;;  %v4569_v22 = vld [vmem:[#allocation12 + $0x28] ss:$16 sps:$4 sm:$0xff]   ;;  %v4572_v19 = vld [vmem:[#allocation12 + $0x44] ss:$16 sps:$4 sm:$0xff]  }
 0x292   :  { %v3366_v53 = vpop.eup %3365  ;;  %v1338_v24 = vpack.c.bf16 %v1337_v6, %v1337_v6  ;;  %v4578_v6 = vld [vmem:[#allocation12 + $0x40] ss:$16 sps:$4 sm:$0xff]  }
 0x293   :  { %v3368_v25 = vpop.eup %3367  ;;  %v1435_v32 = vadd.f32 1.0, %v3366_v53  ;;  %v4581_v53 = vld [vmem:[#allocation12 + $0x48] ss:$16 sps:$4 sm:$0xff]  }
 0x294   :  { %v1441_v0 = vadd.f32 1.0, %v3368_v25  ;;  %1489 = vmatprep.mubr.bf16.mxu0 %v1338_v24  ;;  %1530 = vmatprep.mubr.bf16.mxu1 %v1338_v24  ;;  %v3370_v28 = vpop.eup %3369  ;;  %v4552_v24 = vld [vmem:[#allocation12] ss:$16 sps:$4 sm:$0xff]  }
 0x295   :  { %3373 = vrcp.f32 %v1435_v32  ;;  %v3372_v35 = vpop.eup %3371  ;;  %v1448_v27 = vadd.f32 1.0, %v3370_v28  ;;  %v4555_v32 = vld [vmem:[#allocation12 + $0x8] ss:$16 sps:$4 sm:$0xff]   ;;  %v4587_v28 = vld [vmem:[#allocation12 + $0x6c] ss:$16 sps:$4 sm:$0xff]  }
 0x296   :  { %3375 = vrcp.f32 %v1441_v0  ;;  %v4584_v0 = vld [vmem:[#allocation12 + $0x64] ss:$16 sps:$4 sm:$0xff]  }
 0x297   :  { %3377 = vrcp.f32 %v1448_v27  ;;  %v4602_v27 = vld [vmem:[#allocation12 + $0x80] ss:$16 sps:$4 sm:$0xff]  }
 0x298   :  { %6143 = vst [vmem:[#allocation28_spill] sm:$0xff] %v4602_v27 }
 0x29f   :  { %v3374_v34 = vpop.eup %3373 }
 0x2a0   :  { %v3376_v33 = vpop.eup %3375  ;;  %v1452_v44 = vmul.f32 %v3374_v34, %v3372_v35  ;;  %v4590_v35 = vld [vmem:[#allocation12 + $0x60] ss:$16 sps:$4 sm:$0xff]   ;;  %v4593_v34 = vld [vmem:[#allocation12 + $0x68] ss:$16 sps:$4 sm:$0xff]  }
 0x2a1   :  { %v1451_v23 = vmul.f32 %v3376_v33, %v4409_v16  ;;  %v3378_v26 = vpop.eup %3377  ;;  %v4558_v16 = vld [vmem:[#allocation12 + $0x24] ss:$16 sps:$4 sm:$0xff]  }
 0x2a2   :  { %v4596_v33 = vld [vmem:[#allocation12 + $0x84] ss:$16 sps:$4 sm:$0xff]  }
 0x2a3   :  { %v4545_v21 = vadd.f32 %v1452_v44, %v1451_v23  ;;  %v4599_v44 = vld [vmem:[#allocation12 + $0x8c] ss:$16 sps:$4 sm:$0xff]   ;;  %v4605_v23 = vld [vmem:[#allocation12 + $0x88] ss:$16 sps:$4 sm:$0xff]  }
 0x2a4   :  { %6142 = vst [vmem:[#allocation27_spill] sm:$0xff] %v4599_v44  ;;  %6144 = vst [vmem:[#allocation29_spill] sm:$0xff] %v4605_v23 }
 0x2a5   :  { %3379 = vtanh.f32 %v4545_v21 }
 0x2af   :  { %v3380_v30 = vpop.eup %3379 }
 0x2b0   :  { %v1455_v25 = vmul.f32 %v3380_v30, %v3378_v26  ;;  %v4608_v26 = vld [vmem:[#allocation12 + $0xa4] ss:$16 sps:$4 sm:$0xff]   ;;  %v4611_v30 = vld [vmem:[#allocation12 + $0xac] ss:$16 sps:$4 sm:$0xff]  }
 0x2b1   :  { %6145 = vst [vmem:[#allocation30_spill] sm:$0xff] %v4608_v26  ;;  %6146 = vst [vmem:[#allocation31_spill] sm:$0xff] %v4611_v30 }
 0x2b2   :  { %v4548_v17 = vpack.c.bf16 %v1455_v25, %v1455_v25  ;;  %v4614_v25 = vld [vmem:[#allocation12 + $0xa0] ss:$16 sps:$4 sm:$0xff]  }
 0x2b3   :  { %6147 = vst [vmem:[#allocation32_spill] sm:$0xff] %v4614_v25 }
 0x2b4   :  { %1490 = vmatmul.mubr.bf16.vlgmr.msra.gmra.mrb[28].mxu0 %v4548_v17  ;;  %1531 = vmatmul.mubr.bf16.vlgmr.msra.gmra.mrb[28].mxu1 %v4548_v17 }
 0x2b5   :  { %1572 = vmatpush1.bf16.msra.mxu0 %v4552_v24  ;;  %1613 = vmatpush1.bf16.msra.mxu1 %v4555_v32 }
 0x2b6   :  { %1573 = vmatprep.subr.bf16.mxu0 %v4558_v16  ;;  %1614 = vmatprep.subr.bf16.mxu1 %v4561_v62 }
 0x2b7   :  { %1603 = vmatprep.mubr.bf16.mxu0 %v6070_v20  ;;  %1644 = vmatprep.mubr.bf16.mxu1 %v6070_v20 }
 0x2b9   :  { %1574 = vmatpush1.bf16.msra.mxu0 %v4566_v18  ;;  %1615 = vmatpush1.bf16.msra.mxu1 %v4569_v22 }
 0x2ba   :  { %1575 = vmatprep.subr.bf16.mxu0 %v4572_v19  ;;  %1616 = vmatprep.subr.bf16.mxu1 %v4575_v31 }
 0x2bd   :  { %1576 = vmatpush1.bf16.msra.mxu0 %v4578_v6  ;;  %1617 = vmatpush1.bf16.msra.mxu1 %v4581_v53 }
 0x2be   :  { %1577 = vmatprep.subr.bf16.mxu0 %v4584_v0  ;;  %1618 = vmatprep.subr.bf16.mxu1 %v4587_v28 }
 0x2c1   :  { %1578 = vmatpush1.bf16.msra.mxu0 %v4590_v35  ;;  %1619 = vmatpush1.bf16.msra.mxu1 %v4593_v34 }
 0x2c2   :  { %1579 = vmatprep.subr.bf16.mxu0 %v4596_v33  ;;  %1620 = vmatprep.subr.bf16.mxu1 %v4599_v44  ;;  %v4617_v44 = vld [vmem:[#allocation12 + $0xa8] ss:$16 sps:$4 sm:$0xff]  }
 0x2c3   :  { %6148 = vst [vmem:[#allocation33_spill] sm:$0xff] %v4617_v44 }
 0x2c5   :  { %1580 = vmatpush1.bf16.msra.mxu0 %v4602_v27  ;;  %1621 = vmatpush1.bf16.msra.mxu1 %v4605_v23  ;;  %v4620_v27 = vld [vmem:[#allocation12 + $0xc4] ss:$16 sps:$4 sm:$0xff]   ;;  %v4623_v23 = vld [vmem:[#allocation12 + $0xcc] ss:$16 sps:$4 sm:$0xff]  }
 0x2c6   :  { %1581 = vmatprep.subr.bf16.mxu0 %v4608_v26  ;;  %1622 = vmatprep.subr.bf16.mxu1 %v4611_v30  ;;  %6149 = vst [vmem:[#allocation34_spill] sm:$0xff] %v4620_v27  ;;  %6150 = vst [vmem:[#allocation35_spill] sm:$0xff] %v4623_v23  ;;  %v4626_v26 = vld [vmem:[#allocation12 + $0xc0] ss:$16 sps:$4 sm:$0xff]   ;;  %v4629_v30 = vld [vmem:[#allocation12 + $0xc8] ss:$16 sps:$4 sm:$0xff]  }
 0x2c9   :  { %1582 = vmatpush1.bf16.msra.mxu0 %v4614_v25  ;;  %1623 = vmatpush1.bf16.msra.mxu1 %v4617_v44  ;;  %v4632_v25 = vld [vmem:[#allocation12 + $0xe4] ss:$16 sps:$4 sm:$0xff]   ;;  %v4635_v44 = vld [vmem:[#allocation12 + $0xec] ss:$16 sps:$4 sm:$0xff]  }
 0x2ca   :  { %1583 = vmatprep.subr.bf16.mxu0 %v4620_v27  ;;  %1624 = vmatprep.subr.bf16.mxu1 %v4623_v23  ;;  %v4638_v27 = vld [vmem:[#allocation12 + $0xe0] ss:$16 sps:$4 sm:$0xff]   ;;  %v4641_v23 = vld [vmem:[#allocation12 + $0xe8] ss:$16 sps:$4 sm:$0xff]  }
 0x2cd   :  { %1584 = vmatpush1.bf16.msra.mxu0 %v4626_v26  ;;  %1625 = vmatpush1.bf16.msra.mxu1 %v4629_v30 }
 0x2ce   :  { %1585 = vmatprep.subr.bf16.mxu0 %v4632_v25  ;;  %1626 = vmatprep.subr.bf16.mxu1 %v4635_v44 }
 0x2d1   :  { %1586 = vmatpush1.bf16.msra.mxu0 %v4638_v27  ;;  %1627 = vmatpush1.bf16.msra.mxu1 %v4641_v23 }
 0x2d2   :  { %1682 = vmatprep.subr.bf16.mxu0 %v4116_v7  ;;  %1723 = vmatprep.subr.bf16.mxu1 %v4118_v8  ;;  %v6151_v7 = vld [vmem:[#allocation51_spill] sm:$0xff]  ;;  %v6152_v8 = vld [vmem:[#allocation52_spill] sm:$0xff] }
 0x2d4   :  { %1604 = vmatmul.mubr.bf16.vlgmr.msra.gmra.mrb[32].mxu0 %v4548_v17  ;;  %1645 = vmatmul.mubr.bf16.vlgmr.msra.gmra.mrb[32].mxu1 %v4548_v17  ;;  %v6179_v17 = vld [vmem:[#allocation24_spill] sm:$0xff] }
 0x2d5   :  { %1683 = vmatpush1.bf16.msra.mxu0 %v4120_v9  ;;  %1724 = vmatpush1.bf16.msra.mxu1 %v4122_v10  ;;  %v6153_v9 = vld [vmem:[#allocation53_spill] sm:$0xff]  ;;  %v6154_v10 = vld [vmem:[#allocation54_spill] sm:$0xff] }
 0x2d6   :  { %1684 = vmatprep.subr.bf16.mxu0 %v4128_v11  ;;  %1725 = vmatprep.subr.bf16.mxu1 %v4130_v12  ;;  %v6155_v11 = vld [vmem:[#allocation55_spill] sm:$0xff]  ;;  %v6156_v12 = vld [vmem:[#allocation56_spill] sm:$0xff] }
 0x2d9   :  { %1685 = vmatpush1.bf16.msra.mxu0 %v4132_v13  ;;  %1726 = vmatpush1.bf16.msra.mxu1 %v4134_v14  ;;  %v6157_v13 = vld [vmem:[#allocation57_spill] sm:$0xff]  ;;  %v6158_v14 = vld [vmem:[#allocation58_spill] sm:$0xff] }
 0x2da   :  { %1686 = vmatprep.subr.bf16.mxu0 %v4140_v15  ;;  %1727 = vmatprep.subr.bf16.mxu1 %v6071_v36  ;;  %v6159_v15 = vld [vmem:[#allocation59_spill] sm:$0xff]  ;;  %v6160_v36 = vld [vmem:[#allocation60_spill] sm:$0xff] }
 0x2dd   :  { %1687 = vmatpush1.bf16.msra.mxu0 %v6072_v37  ;;  %1728 = vmatpush1.bf16.msra.mxu1 %v6073_v38  ;;  %v6161_v37 = vld [vmem:[#allocation61_spill] sm:$0xff]  ;;  %v6162_v38 = vld [vmem:[#allocation62_spill] sm:$0xff] }
 0x2de   :  { %1688 = vmatprep.subr.bf16.mxu0 %v6074_v39  ;;  %1729 = vmatprep.subr.bf16.mxu1 %v6075_v40  ;;  %v6163_v39 = vld [vmem:[#allocation63_spill] sm:$0xff]  ;;  %v6164_v40 = vld [vmem:[#allocation64_spill] sm:$0xff] }
 0x2e1   :  { %1689 = vmatpush1.bf16.msra.mxu0 %v6076_v41  ;;  %1730 = vmatpush1.bf16.msra.mxu1 %v6077_v42  ;;  %v6165_v41 = vld [vmem:[#allocation65_spill] sm:$0xff]  ;;  %v6166_v42 = vld [vmem:[#allocation66_spill] sm:$0xff] }
 0x2e2   :  { %1690 = vmatprep.subr.bf16.mxu0 %v6078_v43  ;;  %1731 = vmatprep.subr.bf16.mxu1 %v6079_v45  ;;  %v6167_v43 = vld [vmem:[#allocation67_spill] sm:$0xff]  ;;  %v6168_v45 = vld [vmem:[#allocation68_spill] sm:$0xff] }
 0x2e5   :  { %1691 = vmatpush1.bf16.msra.mxu0 %v6080_v46  ;;  %1732 = vmatpush1.bf16.msra.mxu1 %v6081_v47  ;;  %v6169_v46 = vld [vmem:[#allocation69_spill] sm:$0xff]  ;;  %v6170_v47 = vld [vmem:[#allocation70_spill] sm:$0xff] }
 0x2e6   :  { %1692 = vmatprep.subr.bf16.mxu0 %v6082_v48  ;;  %1733 = vmatprep.subr.bf16.mxu1 %v6083_v49  ;;  %v6171_v48 = vld [vmem:[#allocation71_spill] sm:$0xff]  ;;  %v6172_v49 = vld [vmem:[#allocation72_spill] sm:$0xff] }
 0x2e9   :  { %1693 = vmatpush1.bf16.msra.mxu0 %v6084_v50  ;;  %1734 = vmatpush1.bf16.msra.mxu1 %v6085_v51  ;;  %v6173_v50 = vld [vmem:[#allocation73_spill] sm:$0xff]  ;;  %v6174_v51 = vld [vmem:[#allocation74_spill] sm:$0xff] }
 0x2ea   :  { %1694 = vmatprep.subr.bf16.mxu0 %v6086_v52  ;;  %1735 = vmatprep.subr.bf16.mxu1 %v6087_v54  ;;  %v6175_v52 = vld [vmem:[#allocation20_spill] sm:$0xff]  ;;  %v6176_v54 = vld [vmem:[#allocation21_spill] sm:$0xff] }
 0x2ed   :  { %1695 = vmatpush1.bf16.msra.mxu0 %v6088_v55  ;;  %1736 = vmatpush1.bf16.msra.mxu1 %v6089_v56 }
 0x2ee   :  { %1696 = vmatprep.subr.bf16.mxu0 %v6090_v57  ;;  %1737 = vmatprep.subr.bf16.mxu1 %v6091_v58  ;;  %v6177_v57 = vld [vmem:[#allocation22_spill] sm:$0xff] }
 0x2f1   :  { %1697 = vmatpush1.bf16.msra.mxu0 %v6092_v59  ;;  %1738 = vmatpush1.bf16.msra.mxu1 %v6093_v60 }
 0x2f2   :  { %1698 = vmatprep.subr.bf16.mxu0 %v6094_v61  ;;  %1739 = vmatprep.subr.bf16.mxu1 %v6095_v63  ;;  %v6178_v61 = vld [vmem:[#allocation23_spill] sm:$0xff] }
 0x2f5   :  { %1699 = vmatpush1.bf16.msra.mxu0 %v6096_v1  ;;  %1740 = vmatpush1.bf16.msra.mxu1 %v6097_v2 }
 0x2f6   :  { %1700 = vmatprep.subr.bf16.mxu0 %v6098_v3  ;;  %1741 = vmatprep.subr.bf16.mxu1 %v6099_v4 }
 0x2f9   :  { %1701 = vmatpush1.bf16.msra.mxu0 %v6100_v5  ;;  %1742 = vmatpush1.bf16.msra.mxu1 %v6101_v29 }
 0x2fa   :  { %1702 = vmatprep.subr.bf16.mxu0 %v6151_v7  ;;  %1743 = vmatprep.subr.bf16.mxu1 %v6152_v8 }
 0x2fd   :  { %1703 = vmatpush1.bf16.msra.mxu0 %v6153_v9  ;;  %1744 = vmatpush1.bf16.msra.mxu1 %v6154_v10  ;;  %v6180_v9 = vld [vmem:[#allocation25_spill] sm:$0xff] }
 0x2fe   :  { %1704 = vmatprep.subr.bf16.mxu0 %v6155_v11  ;;  %1745 = vmatprep.subr.bf16.mxu1 %v6156_v12 }
 0x301   :  { %1705 = vmatpush1.bf16.msra.mxu0 %v6157_v13  ;;  %1746 = vmatpush1.bf16.msra.mxu1 %v6158_v14 }
 0x302   :  { %1706 = vmatprep.subr.bf16.mxu0 %v6159_v15  ;;  %1747 = vmatprep.subr.bf16.mxu1 %v6160_v36 }
 0x305   :  { %1707 = vmatpush1.bf16.msra.mxu0 %v6161_v37  ;;  %1748 = vmatpush1.bf16.msra.mxu1 %v6162_v38 }
 0x306   :  { %1708 = vmatprep.subr.bf16.mxu0 %v6163_v39  ;;  %1749 = vmatprep.subr.bf16.mxu1 %v6164_v40 }
 0x309   :  { %1709 = vmatpush1.bf16.msra.mxu0 %v6165_v41  ;;  %1750 = vmatpush1.bf16.msra.mxu1 %v6166_v42  ;;  %v6181_v41 = vld [vmem:[#allocation26_spill] sm:$0xff] }
 0x30a   :  { %1710 = vmatprep.subr.bf16.mxu0 %v6167_v43  ;;  %1751 = vmatprep.subr.bf16.mxu1 %v6168_v45 }
 0x30d   :  { %1711 = vmatpush1.bf16.msra.mxu0 %v6169_v46  ;;  %1752 = vmatpush1.bf16.msra.mxu1 %v6170_v47  ;;  %v6182_v47 = vld [vmem:[#allocation80_spill] sm:$0xff] }
 0x30e   :  { %1712 = vmatprep.subr.bf16.mxu0 %v6171_v48  ;;  %1753 = vmatprep.subr.bf16.mxu1 %v6172_v49  ;;  %v6183_v49 = vld [vmem:[#allocation81_spill] sm:$0xff] }
 0x311   :  { %1713 = vmatpush1.bf16.msra.mxu0 %v6173_v50  ;;  %1754 = vmatpush1.bf16.msra.mxu1 %v6174_v51 }
 0x312   :  { %1796 = vmatprep.subr.bf16.mxu0 %v6175_v52  ;;  %1837 = vmatprep.subr.bf16.mxu1 %v6176_v54 }
 0x387   :  { %v1491_v55 = vpop.f32.mrb[28].mxu0  ;;  %v1532_v56 = vpop.f32.mrb[28].mxu1 }
 0x388   :  { %v1492_v58 = vadd.f32 %v1491_v55, %v6177_v57  ;;  %v1493_v59 = vpop.f32.mrb[29].mxu0  ;;  %v1534_v60 = vpop.f32.mrb[29].mxu1  ;;  %v1533_v10 = vadd.f32 %v1532_v56, %v6180_v9  ;;  %v6184_v56 = vld [vmem:[#allocation82_spill] sm:$0xff] }
 0x389   :  { %v1494_v63 = vadd.f32 %v1493_v59, %v6178_v61  ;;  %v1495_v1 = vpop.f32.mrb[30].mxu0  ;;  %v1536_v2 = vpop.f32.mrb[30].mxu1  ;;  %v1535_v7 = vadd.f32 %v1534_v60, %v6179_v17  ;;  %v6185_v59 = vld [vmem:[#allocation83_spill] sm:$0xff] }
 0x38a   :  { %v3088_v3 = vmul.f32 -1.442695, %v1492_v58  ;;  %v1496_v4 = vpop.f32.mrb[31].mxu0  ;;  %v1537_v5 = vpop.f32.mrb[31].mxu1 }
 0x38b   :  { %v3089_v29 = vmul.f32 -1.442695, %v1494_v63  ;;  %v3090_v8 = vmul.f32 -1.442695, %v1535_v7 }
 0x38c   :  { %3381 = vpow2.f32 %v3088_v3 }
 0x38d   :  { %3383 = vpow2.f32 %v3089_v29 }
 0x38e   :  { %3385 = vpow2.f32 %v3090_v8 }
 0x38f   :  { %3387 = vtanh.f32 %v1533_v10 }
 0x396   :  { %v3382_v11 = vpop.eup %3381 }
 0x397   :  { %v3384_v12 = vpop.eup %3383  ;;  %v1542_v13 = vadd.f32 1.0, %v3382_v11 }
 0x398   :  { %v1548_v14 = vadd.f32 1.0, %v3384_v12  ;;  %v3386_v15 = vpop.eup %3385 }
 0x399   :  { %3389 = vrcp.f32 %v1542_v13  ;;  %v3388_v36 = vpop.eup %3387  ;;  %v1555_v40 = vadd.f32 1.0, %v3386_v15 }
 0x39a   :  { %3391 = vrcp.f32 %v1548_v14 }
 0x39b   :  { %3393 = vrcp.f32 %v1555_v40 }
 0x3a3   :  { %v3390_v37 = vpop.eup %3389 }
 0x3a4   :  { %v3392_v38 = vpop.eup %3391  ;;  %v1559_v39 = vmul.f32 %v3390_v37, %v3388_v36 }
 0x3a5   :  { %v1558_v42 = vmul.f32 %v3392_v38, %v6181_v41  ;;  %v3394_v29 = vpop.eup %3393 }
 0x3a7   :  { %v1605_v43 = vpop.f32.mrb[32].mxu0  ;;  %v1646_v45 = vpop.f32.mrb[32].mxu1  ;;  %v4717_v46 = vadd.f32 %v1559_v39, %v1558_v42 }
 0x3a8   :  { %v1653_v48 = vadd.f32 %v1605_v43, %v6182_v47  ;;  %v1655_v50 = vadd.f32 %v1646_v45, %v6183_v49  ;;  %v1607_v51 = vpop.f32.mrb[33].mxu0  ;;  %v1648_v55 = vpop.f32.mrb[33].mxu1 }
 0x3a9   :  { %v1654_v58 = vadd.f32 %v1607_v51, %v6184_v56  ;;  %v1656_v60 = vadd.f32 %v1648_v55, %v6185_v59  ;;  %v1609_v63 = vpop.f32.mrb[34].mxu0  ;;  %v1650_v1 = vpop.f32.mrb[34].mxu1  ;;  %3395 = vtanh.f32 %v4717_v46  ;;  %v6188_v51 = vld [vmem:[#allocation29_spill] sm:$0xff]  ;;  %v6189_v55 = vld [vmem:[#allocation30_spill] sm:$0xff]  ;;  %v6190_v56 = vld [vmem:[#allocation31_spill] sm:$0xff] }
 0x3aa   :  { %v3091_v2 = vmul.f32 -1.442695, %v1653_v48  ;;  %v1610_v3 = vpop.f32.mrb[35].mxu0  ;;  %v1651_v4 = vpop.f32.mrb[35].mxu1  ;;  %v6192_v59 = vld [vmem:[#allocation33_spill] sm:$0xff]  ;;  %v6194_v63 = vld [vmem:[#allocation35_spill] sm:$0xff] }
 0x3ab   :  { %v3092_v5 = vmul.f32 -1.442695, %v1654_v58  ;;  %v3093_v8 = vmul.f32 -1.442695, %v1656_v60  ;;  %v6191_v58 = vld [vmem:[#allocation32_spill] sm:$0xff]  ;;  %v6193_v60 = vld [vmem:[#allocation34_spill] sm:$0xff] }
 0x3ac   :  { %3397 = vpow2.f32 %v3091_v2  ;;  %v4760_v1 = vld [vmem:[#allocation13 + $0x4] ss:$16 sps:$4 sm:$0xff]   ;;  %v4763_v2 = vld [vmem:[#allocation13 + $0xc] ss:$16 sps:$4 sm:$0xff]   ;;  %v4766_v3 = vld [vmem:[#allocation13] ss:$16 sps:$4 sm:$0xff]  }
 0x3ad   :  { %3399 = vpow2.f32 %v3092_v5  ;;  %v4769_v4 = vld [vmem:[#allocation13 + $0x8] ss:$16 sps:$4 sm:$0xff]   ;;  %v4772_v5 = vld [vmem:[#allocation13 + $0x24] ss:$16 sps:$4 sm:$0xff]  }
 0x3ae   :  { %3401 = vpow2.f32 %v3093_v8  ;;  %v4781_v8 = vld [vmem:[#allocation13 + $0x28] ss:$16 sps:$4 sm:$0xff]  }
 0x3af   :  { %3403 = vtanh.f32 %v1655_v50  ;;  %v6187_v50 = vld [vmem:[#allocation28_spill] sm:$0xff] }
 0x3b3   :  { %v3396_v7 = vpop.eup %3395 }
 0x3b4   :  { %v1562_v10 = vmul.f32 %v3396_v7, %v3394_v29  ;;  %v4775_v29 = vld [vmem:[#allocation13 + $0x2c] ss:$16 sps:$4 sm:$0xff]   ;;  %v4778_v7 = vld [vmem:[#allocation13 + $0x20] ss:$16 sps:$4 sm:$0xff]  }
 0x3b6   :  { %v3398_v11 = vpop.eup %3397  ;;  %v1563_v12 = vpack.c.bf16 %v1562_v10, %v1562_v10  ;;  %v4784_v10 = vld [vmem:[#allocation13 + $0x44] ss:$16 sps:$4 sm:$0xff]  }
 0x3b7   :  { %v3400_v13 = vpop.eup %3399  ;;  %v1660_v14 = vadd.f32 1.0, %v3398_v11  ;;  %v4787_v11 = vld [vmem:[#allocation13 + $0x4c] ss:$16 sps:$4 sm:$0xff]  }
 0x3b8   :  { %v1666_v15 = vadd.f32 1.0, %v3400_v13  ;;  %1714 = vmatprep.mubr.bf16.mxu0 %v1563_v12  ;;  %1755 = vmatprep.mubr.bf16.mxu1 %v1563_v12  ;;  %v3402_v36 = vpop.eup %3401  ;;  %v4790_v12 = vld [vmem:[#allocation13 + $0x40] ss:$16 sps:$4 sm:$0xff]   ;;  %v4793_v13 = vld [vmem:[#allocation13 + $0x48] ss:$16 sps:$4 sm:$0xff]  }
 0x3b9   :  { %3405 = vrcp.f32 %v1660_v14  ;;  %v3404_v37 = vpop.eup %3403  ;;  %v1673_v41 = vadd.f32 1.0, %v3402_v36  ;;  %6195 = vst [vmem:[#allocation36_spill] sm:$0xff] %v4790_v12  ;;  %6196 = vst [vmem:[#allocation37_spill] sm:$0xff] %v4793_v13  ;;  %v4796_v14 = vld [vmem:[#allocation13 + $0x64] ss:$16 sps:$4 sm:$0xff]  }
 0x3ba   :  { %3407 = vrcp.f32 %v1666_v15  ;;  %6197 = vst [vmem:[#allocation38_spill] sm:$0xff] %v4796_v14  ;;  %v4799_v15 = vld [vmem:[#allocation13 + $0x6c] ss:$16 sps:$4 sm:$0xff]   ;;  %v4802_v36 = vld [vmem:[#allocation13 + $0x60] ss:$16 sps:$4 sm:$0xff]  }
 0x3bb   :  { %3409 = vrcp.f32 %v1673_v41  ;;  %6198 = vst [vmem:[#allocation39_spill] sm:$0xff] %v4799_v15  ;;  %6199 = vst [vmem:[#allocation40_spill] sm:$0xff] %v4802_v36  ;;  %v4817_v41 = vld [vmem:[#allocation13 + $0x88] ss:$16 sps:$4 sm:$0xff]  }
 0x3bc   :  { %6204 = vst [vmem:[#allocation45_spill] sm:$0xff] %v4817_v41 }
 0x3c3   :  { %v3406_v38 = vpop.eup %3405 }
 0x3c4   :  { %v3408_v39 = vpop.eup %3407  ;;  %v1677_v40 = vmul.f32 %v3406_v38, %v3404_v37  ;;  %v4805_v37 = vld [vmem:[#allocation13 + $0x68] ss:$16 sps:$4 sm:$0xff]   ;;  %v4808_v38 = vld [vmem:[#allocation13 + $0x84] ss:$16 sps:$4 sm:$0xff]  }
 0x3c5   :  { %v1676_v42 = vmul.f32 %v3408_v39, %v4545_v21  ;;  %v3410_v45 = vpop.eup %3409  ;;  %v6186_v21 = vld [vmem:[#allocation27_spill] sm:$0xff]  ;;  %6200 = vst [vmem:[#allocation41_spill] sm:$0xff] %v4805_v37  ;;  %6201 = vst [vmem:[#allocation42_spill] sm:$0xff] %v4808_v38  ;;  %v4811_v39 = vld [vmem:[#allocation13 + $0x8c] ss:$16 sps:$4 sm:$0xff]  }
 0x3c6   :  { %6202 = vst [vmem:[#allocation43_spill] sm:$0xff] %v4811_v39 }
 0x3c7   :  { %v4725_v43 = vadd.f32 %v1677_v40, %v1676_v42  ;;  %v4814_v40 = vld [vmem:[#allocation13 + $0x80] ss:$16 sps:$4 sm:$0xff]   ;;  %v4820_v42 = vld [vmem:[#allocation13 + $0xa4] ss:$16 sps:$4 sm:$0xff]  }
 0x3c8   :  { %6203 = vst [vmem:[#allocation44_spill] sm:$0xff] %v4814_v40  ;;  %6205 = vst [vmem:[#allocation46_spill] sm:$0xff] %v4820_v42 }
 0x3c9   :  { %3411 = vtanh.f32 %v4725_v43 }
 0x3d3   :  { %v3412_v47 = vpop.eup %3411 }
 0x3d4   :  { %v1680_v48 = vmul.f32 %v3412_v47, %v3410_v45  ;;  %v4823_v45 = vld [vmem:[#allocation13 + $0xac] ss:$16 sps:$4 sm:$0xff]   ;;  %v4826_v47 = vld [vmem:[#allocation13 + $0xa0] ss:$16 sps:$4 sm:$0xff]  }
 0x3d5   :  { %6206 = vst [vmem:[#allocation47_spill] sm:$0xff] %v4823_v45  ;;  %6207 = vst [vmem:[#allocation48_spill] sm:$0xff] %v4826_v47 }
 0x3d6   :  { %v1681_v49 = vpack.c.bf16 %v1680_v48, %v1680_v48  ;;  %v4829_v48 = vld [vmem:[#allocation13 + $0xa8] ss:$16 sps:$4 sm:$0xff]  }
 0x3d7   :  { %6208 = vst [vmem:[#allocation49_spill] sm:$0xff] %v4829_v48 }
 0x3d8   :  { %1715 = vmatmul.mubr.bf16.vlgmr.msra.gmra.mrb[36].mxu0 %v1681_v49  ;;  %1756 = vmatmul.mubr.bf16.vlgmr.msra.gmra.mrb[36].mxu1 %v1681_v49 }
 0x3d9   :  { %1797 = vmatpush1.bf16.msra.mxu0 %v4552_v24  ;;  %1838 = vmatpush1.bf16.msra.mxu1 %v4555_v32 }
 0x3da   :  { %1798 = vmatprep.subr.bf16.mxu0 %v4558_v16  ;;  %1839 = vmatprep.subr.bf16.mxu1 %v4561_v62 }
 0x3db   :  { %1828 = vmatprep.mubr.bf16.mxu0 %v6070_v20  ;;  %1869 = vmatprep.mubr.bf16.mxu1 %v6070_v20 }
 0x3dd   :  { %1799 = vmatpush1.bf16.msra.mxu0 %v4566_v18  ;;  %1840 = vmatpush1.bf16.msra.mxu1 %v4569_v22 }
 0x3de   :  { %1800 = vmatprep.subr.bf16.mxu0 %v4572_v19  ;;  %1841 = vmatprep.subr.bf16.mxu1 %v4575_v31 }
 0x3e1   :  { %1801 = vmatpush1.bf16.msra.mxu0 %v4578_v6  ;;  %1842 = vmatpush1.bf16.msra.mxu1 %v4581_v53 }
 0x3e2   :  { %1802 = vmatprep.subr.bf16.mxu0 %v4584_v0  ;;  %1843 = vmatprep.subr.bf16.mxu1 %v4587_v28 }
 0x3e5   :  { %1803 = vmatpush1.bf16.msra.mxu0 %v4590_v35  ;;  %1844 = vmatpush1.bf16.msra.mxu1 %v4593_v34 }
 0x3e6   :  { %1804 = vmatprep.subr.bf16.mxu0 %v4596_v33  ;;  %1845 = vmatprep.subr.bf16.mxu1 %v6186_v21 }
 0x3e9   :  { %1805 = vmatpush1.bf16.msra.mxu0 %v6187_v50  ;;  %1846 = vmatpush1.bf16.msra.mxu1 %v6188_v51 }
 0x3ea   :  { %1806 = vmatprep.subr.bf16.mxu0 %v6189_v55  ;;  %1847 = vmatprep.subr.bf16.mxu1 %v6190_v56 }
 0x3ed   :  { %1807 = vmatpush1.bf16.msra.mxu0 %v6191_v58  ;;  %1848 = vmatpush1.bf16.msra.mxu1 %v6192_v59 }
 0x3ee   :  { %1808 = vmatprep.subr.bf16.mxu0 %v6193_v60  ;;  %1849 = vmatprep.subr.bf16.mxu1 %v6194_v63 }
 0x3f1   :  { %1809 = vmatpush1.bf16.msra.mxu0 %v4626_v26  ;;  %1850 = vmatpush1.bf16.msra.mxu1 %v4629_v30 }
 0x3f2   :  { %1810 = vmatprep.subr.bf16.mxu0 %v4632_v25  ;;  %1851 = vmatprep.subr.bf16.mxu1 %v4635_v44 }
 0x3f5   :  { %1811 = vmatpush1.bf16.msra.mxu0 %v4638_v27  ;;  %1852 = vmatpush1.bf16.msra.mxu1 %v4641_v23 }
 0x3f6   :  { %1907 = vmatprep.subr.bf16.mxu0 %v4760_v1  ;;  %1948 = vmatprep.subr.bf16.mxu1 %v4763_v2 }
 0x3f8   :  { %1829 = vmatmul.mubr.bf16.vlgmr.msra.gmra.mrb[40].mxu0 %v1681_v49  ;;  %1870 = vmatmul.mubr.bf16.vlgmr.msra.gmra.mrb[40].mxu1 %v1681_v49  ;;  %v4832_v49 = vld [vmem:[#allocation13 + $0xc4] ss:$16 sps:$4 sm:$0xff]  }
 0x3f9   :  { %1908 = vmatpush1.bf16.msra.mxu0 %v4766_v3  ;;  %1949 = vmatpush1.bf16.msra.mxu1 %v4769_v4  ;;  %6209 = vst [vmem:[#allocation50_spill] sm:$0xff] %v4832_v49 }
 0x3fa   :  { %1909 = vmatprep.subr.bf16.mxu0 %v4772_v5  ;;  %1950 = vmatprep.subr.bf16.mxu1 %v4775_v29 }
 0x3fd   :  { %1910 = vmatpush1.bf16.msra.mxu0 %v4778_v7  ;;  %1951 = vmatpush1.bf16.msra.mxu1 %v4781_v8 }
 0x3fe   :  { %1911 = vmatprep.subr.bf16.mxu0 %v4784_v10  ;;  %1952 = vmatprep.subr.bf16.mxu1 %v4787_v11 }
 0x401   :  { %1912 = vmatpush1.bf16.msra.mxu0 %v4790_v12  ;;  %1953 = vmatpush1.bf16.msra.mxu1 %v4793_v13 }
 0x402   :  { %1913 = vmatprep.subr.bf16.mxu0 %v4796_v14  ;;  %1954 = vmatprep.subr.bf16.mxu1 %v4799_v15 }
 0x405   :  { %1914 = vmatpush1.bf16.msra.mxu0 %v4802_v36  ;;  %1955 = vmatpush1.bf16.msra.mxu1 %v4805_v37 }
 0x406   :  { %1915 = vmatprep.subr.bf16.mxu0 %v4808_v38  ;;  %1956 = vmatprep.subr.bf16.mxu1 %v4811_v39 }
 0x409   :  { %1916 = vmatpush1.bf16.msra.mxu0 %v4814_v40  ;;  %1957 = vmatpush1.bf16.msra.mxu1 %v4817_v41  ;;  %v4835_v41 = vld [vmem:[#allocation13 + $0xcc] ss:$16 sps:$4 sm:$0xff]  }
 0x40a   :  { %1917 = vmatprep.subr.bf16.mxu0 %v4820_v42  ;;  %1958 = vmatprep.subr.bf16.mxu1 %v4823_v45  ;;  %6210 = vst [vmem:[#allocation75_spill] sm:$0xff] %v4835_v41  ;;  %v4838_v42 = vld [vmem:[#allocation13 + $0xc0] ss:$16 sps:$4 sm:$0xff]   ;;  %v4841_v45 = vld [vmem:[#allocation13 + $0xc8] ss:$16 sps:$4 sm:$0xff]  }
 0x40b   :  { %6211 = vst [vmem:[#allocation76_spill] sm:$0xff] %v4838_v42  ;;  %6212 = vst [vmem:[#allocation77_spill] sm:$0xff] %v4841_v45 }
 0x40d   :  { %1918 = vmatpush1.bf16.msra.mxu0 %v4826_v47  ;;  %1959 = vmatpush1.bf16.msra.mxu1 %v4829_v48  ;;  %v4844_v47 = vld [vmem:[#allocation13 + $0xe4] ss:$16 sps:$4 sm:$0xff]   ;;  %v4847_v48 = vld [vmem:[#allocation13 + $0xec] ss:$16 sps:$4 sm:$0xff]  }
 0x40e   :  { %1919 = vmatprep.subr.bf16.mxu0 %v4832_v49  ;;  %1960 = vmatprep.subr.bf16.mxu1 %v4835_v41  ;;  %6213 = vst [vmem:[#allocation78_spill] sm:$0xff] %v4844_v47  ;;  %6214 = vst [vmem:[#allocation79_spill] sm:$0xff] %v4847_v48  ;;  %v4850_v49 = vld [vmem:[#allocation13 + $0xe0] ss:$16 sps:$4 sm:$0xff]   ;;  %v4853_v41 = vld [vmem:[#allocation13 + $0xe8] ss:$16 sps:$4 sm:$0xff]  }
 0x40f   :  { %6215 = vst [vmem:[#allocation51_spill] sm:$0xff] %v4850_v49  ;;  %6216 = vst [vmem:[#allocation52_spill] sm:$0xff] %v4853_v41 }
 0x411   :  { %1920 = vmatpush1.bf16.msra.mxu0 %v4838_v42  ;;  %1961 = vmatpush1.bf16.msra.mxu1 %v4841_v45  ;;  %v4856_v42 = vld [vmem:[#allocation13 + $0x104] ss:$16 sps:$4 sm:$0xff]   ;;  %v4859_v45 = vld [vmem:[#allocation13 + $0x10c] ss:$16 sps:$4 sm:$0xff]  }
 0x412   :  { %1921 = vmatprep.subr.bf16.mxu0 %v4844_v47  ;;  %1962 = vmatprep.subr.bf16.mxu1 %v4847_v48  ;;  %6217 = vst [vmem:[#allocation53_spill] sm:$0xff] %v4856_v42  ;;  %6218 = vst [vmem:[#allocation54_spill] sm:$0xff] %v4859_v45  ;;  %v4862_v47 = vld [vmem:[#allocation13 + $0x100] ss:$16 sps:$4 sm:$0xff]   ;;  %v4865_v48 = vld [vmem:[#allocation13 + $0x108] ss:$16 sps:$4 sm:$0xff]  }
 0x413   :  { %6219 = vst [vmem:[#allocation55_spill] sm:$0xff] %v4862_v47  ;;  %6220 = vst [vmem:[#allocation56_spill] sm:$0xff] %v4865_v48 }
 0x415   :  { %1922 = vmatpush1.bf16.msra.mxu0 %v4850_v49  ;;  %1963 = vmatpush1.bf16.msra.mxu1 %v4853_v41  ;;  %v4868_v49 = vld [vmem:[#allocation13 + $0x124] ss:$16 sps:$4 sm:$0xff]   ;;  %v4871_v41 = vld [vmem:[#allocation13 + $0x12c] ss:$16 sps:$4 sm:$0xff]  }
 0x416   :  { %1923 = vmatprep.subr.bf16.mxu0 %v4856_v42  ;;  %1964 = vmatprep.subr.bf16.mxu1 %v4859_v45  ;;  %6221 = vst [vmem:[#allocation57_spill] sm:$0xff] %v4868_v49  ;;  %6222 = vst [vmem:[#allocation58_spill] sm:$0xff] %v4871_v41  ;;  %v4874_v42 = vld [vmem:[#allocation13 + $0x120] ss:$16 sps:$4 sm:$0xff]   ;;  %v4877_v45 = vld [vmem:[#allocation13 + $0x128] ss:$16 sps:$4 sm:$0xff]  }
 0x417   :  { %6223 = vst [vmem:[#allocation59_spill] sm:$0xff] %v4874_v42  ;;  %6224 = vst [vmem:[#allocation60_spill] sm:$0xff] %v4877_v45 }
 0x419   :  { %1924 = vmatpush1.bf16.msra.mxu0 %v4862_v47  ;;  %1965 = vmatpush1.bf16.msra.mxu1 %v4865_v48  ;;  %v4880_v47 = vld [vmem:[#allocation13 + $0x144] ss:$16 sps:$4 sm:$0xff]   ;;  %v4883_v48 = vld [vmem:[#allocation13 + $0x14c] ss:$16 sps:$4 sm:$0xff]  }
 0x41a   :  { %1925 = vmatprep.subr.bf16.mxu0 %v4868_v49  ;;  %1966 = vmatprep.subr.bf16.mxu1 %v4871_v41  ;;  %6225 = vst [vmem:[#allocation61_spill] sm:$0xff] %v4880_v47  ;;  %6226 = vst [vmem:[#allocation62_spill] sm:$0xff] %v4883_v48  ;;  %v4886_v49 = vld [vmem:[#allocation13 + $0x140] ss:$16 sps:$4 sm:$0xff]   ;;  %v4889_v41 = vld [vmem:[#allocation13 + $0x148] ss:$16 sps:$4 sm:$0xff]  }
 0x41b   :  { %6227 = vst [vmem:[#allocation63_spill] sm:$0xff] %v4886_v49  ;;  %6228 = vst [vmem:[#allocation64_spill] sm:$0xff] %v4889_v41 }
 0x41d   :  { %1926 = vmatpush1.bf16.msra.mxu0 %v4874_v42  ;;  %1967 = vmatpush1.bf16.msra.mxu1 %v4877_v45  ;;  %v4892_v42 = vld [vmem:[#allocation13 + $0x164] ss:$16 sps:$4 sm:$0xff]   ;;  %v4895_v45 = vld [vmem:[#allocation13 + $0x16c] ss:$16 sps:$4 sm:$0xff]  }
 0x41e   :  { %1927 = vmatprep.subr.bf16.mxu0 %v4880_v47  ;;  %1968 = vmatprep.subr.bf16.mxu1 %v4883_v48  ;;  %6229 = vst [vmem:[#allocation65_spill] sm:$0xff] %v4892_v42  ;;  %6230 = vst [vmem:[#allocation66_spill] sm:$0xff] %v4895_v45  ;;  %v4898_v47 = vld [vmem:[#allocation13 + $0x160] ss:$16 sps:$4 sm:$0xff]   ;;  %v4901_v48 = vld [vmem:[#allocation13 + $0x168] ss:$16 sps:$4 sm:$0xff]  }
 0x41f   :  { %6231 = vst [vmem:[#allocation67_spill] sm:$0xff] %v4898_v47  ;;  %6232 = vst [vmem:[#allocation68_spill] sm:$0xff] %v4901_v48 }
 0x421   :  { %1928 = vmatpush1.bf16.msra.mxu0 %v4886_v49  ;;  %1969 = vmatpush1.bf16.msra.mxu1 %v4889_v41  ;;  %v4904_v49 = vld [vmem:[#allocation13 + $0x184] ss:$16 sps:$4 sm:$0xff]   ;;  %v4907_v41 = vld [vmem:[#allocation13 + $0x18c] ss:$16 sps:$4 sm:$0xff]  }
 0x422   :  { %1929 = vmatprep.subr.bf16.mxu0 %v4892_v42  ;;  %1970 = vmatprep.subr.bf16.mxu1 %v4895_v45  ;;  %6233 = vst [vmem:[#allocation69_spill] sm:$0xff] %v4904_v49  ;;  %6234 = vst [vmem:[#allocation70_spill] sm:$0xff] %v4907_v41  ;;  %v4910_v42 = vld [vmem:[#allocation13 + $0x180] ss:$16 sps:$4 sm:$0xff]   ;;  %v4913_v45 = vld [vmem:[#allocation13 + $0x188] ss:$16 sps:$4 sm:$0xff]  }
 0x423   :  { %6235 = vst [vmem:[#allocation71_spill] sm:$0xff] %v4910_v42  ;;  %6236 = vst [vmem:[#allocation72_spill] sm:$0xff] %v4913_v45 }
 0x425   :  { %1930 = vmatpush1.bf16.msra.mxu0 %v4898_v47  ;;  %1971 = vmatpush1.bf16.msra.mxu1 %v4901_v48  ;;  %v4916_v47 = vld [vmem:[#allocation13 + $0x1a4] ss:$16 sps:$4 sm:$0xff]   ;;  %v4919_v48 = vld [vmem:[#allocation13 + $0x1ac] ss:$16 sps:$4 sm:$0xff]  }
 0x426   :  { %1931 = vmatprep.subr.bf16.mxu0 %v4904_v49  ;;  %1972 = vmatprep.subr.bf16.mxu1 %v4907_v41  ;;  %6237 = vst [vmem:[#allocation73_spill] sm:$0xff] %v4916_v47  ;;  %6238 = vst [vmem:[#allocation74_spill] sm:$0xff] %v4919_v48  ;;  %v4922_v49 = vld [vmem:[#allocation13 + $0x1a0] ss:$16 sps:$4 sm:$0xff]   ;;  %v4925_v41 = vld [vmem:[#allocation13 + $0x1a8] ss:$16 sps:$4 sm:$0xff]  }
 0x427   :  { %6239 = vst [vmem:[#allocation20_spill] sm:$0xff] %v4922_v49  ;;  %6240 = vst [vmem:[#allocation21_spill] sm:$0xff] %v4925_v41 }
 0x429   :  { %1932 = vmatpush1.bf16.msra.mxu0 %v4910_v42  ;;  %1973 = vmatpush1.bf16.msra.mxu1 %v4913_v45  ;;  %v4928_v42 = vld [vmem:[#allocation13 + $0x1c4] ss:$16 sps:$4 sm:$0xff]   ;;  %v4931_v45 = vld [vmem:[#allocation13 + $0x1cc] ss:$16 sps:$4 sm:$0xff]  }
 0x42a   :  { %1933 = vmatprep.subr.bf16.mxu0 %v4916_v47  ;;  %1974 = vmatprep.subr.bf16.mxu1 %v4919_v48  ;;  %6241 = vst [vmem:[#allocation26_spill] sm:$0xff] %v4928_v42  ;;  %6242 = vst [vmem:[#allocation80_spill] sm:$0xff] %v4931_v45  ;;  %v4934_v47 = vld [vmem:[#allocation13 + $0x1c0] ss:$16 sps:$4 sm:$0xff]   ;;  %v4937_v48 = vld [vmem:[#allocation13 + $0x1c8] ss:$16 sps:$4 sm:$0xff]  }
 0x42b   :  { %6243 = vst [vmem:[#allocation81_spill] sm:$0xff] %v4934_v47  ;;  %6244 = vst [vmem:[#allocation82_spill] sm:$0xff] %v4937_v48 }
 0x42d   :  { %1934 = vmatpush1.bf16.msra.mxu0 %v4922_v49  ;;  %1975 = vmatpush1.bf16.msra.mxu1 %v4925_v41  ;;  %v4940_v49 = vld [vmem:[#allocation13 + $0x1e4] ss:$16 sps:$4 sm:$0xff]   ;;  %v4943_v41 = vld [vmem:[#allocation13 + $0x1ec] ss:$16 sps:$4 sm:$0xff]  }
 0x42e   :  { %1935 = vmatprep.subr.bf16.mxu0 %v4928_v42  ;;  %1976 = vmatprep.subr.bf16.mxu1 %v4931_v45  ;;  %6245 = vst [vmem:[#allocation83_spill] sm:$0xff] %v4940_v49  ;;  %6246 = vst [vmem:[#allocation27_spill] sm:$0xff] %v4943_v41  ;;  %v4946_v42 = vld [vmem:[#allocation13 + $0x1e0] ss:$16 sps:$4 sm:$0xff]   ;;  %v4949_v45 = vld [vmem:[#allocation13 + $0x1e8] ss:$16 sps:$4 sm:$0xff]  }
 0x42f   :  { %6247 = vst [vmem:[#allocation28_spill] sm:$0xff] %v4946_v42  ;;  %6248 = vst [vmem:[#allocation29_spill] sm:$0xff] %v4949_v45 }
 0x431   :  { %1936 = vmatpush1.bf16.msra.mxu0 %v4934_v47  ;;  %1977 = vmatpush1.bf16.msra.mxu1 %v4937_v48 }
 0x432   :  { %1937 = vmatprep.subr.bf16.mxu0 %v4940_v49  ;;  %1978 = vmatprep.subr.bf16.mxu1 %v4943_v41 }
 0x435   :  { %1938 = vmatpush1.bf16.msra.mxu0 %v4946_v42  ;;  %1979 = vmatpush1.bf16.msra.mxu1 %v4949_v45 }
 0x436   :  { %2021 = vmatprep.subr.bf16.mxu0 %v6175_v52  ;;  %2062 = vmatprep.subr.bf16.mxu1 %v6176_v54 }
 0x4ab   :  { %v1716_v48 = vpop.f32.mrb[36].mxu0  ;;  %v1757_v47 = vpop.f32.mrb[36].mxu1 }
 0x4ac   :  { %v1717_v49 = vadd.f32 %v1716_v48, %v6177_v57  ;;  %v1718_v40 = vpop.f32.mrb[37].mxu0  ;;  %v1759_v39 = vpop.f32.mrb[37].mxu1  ;;  %v1758_v54 = vadd.f32 %v1757_v47, %v6180_v9  ;;  %v6249_v47 = vld [vmem:[#allocation84_spill] sm:$0xff]  ;;  %v6252_v9 = vld [vmem:[#allocation87_spill] sm:$0xff] }
 0x4ad   :  { %v1719_v41 = vadd.f32 %v1718_v40, %v6178_v61  ;;  %v1720_v38 = vpop.f32.mrb[38].mxu0  ;;  %v1761_v37 = vpop.f32.mrb[38].mxu1  ;;  %v1760_v52 = vadd.f32 %v1759_v39, %v6179_v17 }
 0x4ae   :  { %v3094_v36 = vmul.f32 -1.442695, %v1717_v49  ;;  %v1721_v42 = vpop.f32.mrb[39].mxu0  ;;  %v1762_v15 = vpop.f32.mrb[39].mxu1 }
 0x4af   :  { %v3095_v14 = vmul.f32 -1.442695, %v1719_v41  ;;  %v3096_v45 = vmul.f32 -1.442695, %v1760_v52 }
 0x4b0   :  { %3413 = vpow2.f32 %v3094_v36 }
 0x4b1   :  { %3415 = vpow2.f32 %v3095_v14 }
 0x4b2   :  { %3417 = vpow2.f32 %v3096_v45  ;;  %v6250_v45 = vld [vmem:[#allocation85_spill] sm:$0xff] }
 0x4b3   :  { %3419 = vtanh.f32 %v1758_v54 }
 0x4ba   :  { %v3414_v13 = vpop.eup %3413 }
 0x4bb   :  { %v3416_v12 = vpop.eup %3415  ;;  %v1767_v48 = vadd.f32 1.0, %v3414_v13 }
 0x4bc   :  { %v1773_v57 = vadd.f32 1.0, %v3416_v12  ;;  %v3418_v37 = vpop.eup %3417 }
 0x4bd   :  { %3421 = vrcp.f32 %v1767_v48  ;;  %v3420_v38 = vpop.eup %3419  ;;  %v1780_v36 = vadd.f32 1.0, %v3418_v37 }
 0x4be   :  { %3423 = vrcp.f32 %v1773_v57  ;;  %v6251_v57 = vld [vmem:[#allocation86_spill] sm:$0xff] }
 0x4bf   :  { %3425 = vrcp.f32 %v1780_v36 }
 0x4c7   :  { %v3422_v40 = vpop.eup %3421 }
 0x4c8   :  { %v3424_v15 = vpop.eup %3423  ;;  %v1784_v41 = vmul.f32 %v3422_v40, %v3420_v38 }
 0x4c9   :  { %v1783_v14 = vmul.f32 %v3424_v15, %v4717_v46 }
 0x4cb   :  { %v1830_v39 = vpop.f32.mrb[40].mxu0  ;;  %v1871_v42 = vpop.f32.mrb[40].mxu1  ;;  %v4959_v49 = vadd.f32 %v1784_v41, %v1783_v14 }
 0x4cc   :  { %v1878_v13 = vadd.f32 %v1830_v39, %v6249_v47  ;;  %v1880_v52 = vadd.f32 %v1871_v42, %v6250_v45  ;;  %v1832_v12 = vpop.f32.mrb[41].mxu0  ;;  %v1873_v54 = vpop.f32.mrb[41].mxu1 }
 0x4cd   :  { %v1879_v48 = vadd.f32 %v1832_v12, %v6251_v57  ;;  %v1881_v17 = vadd.f32 %v1873_v54, %v6252_v9  ;;  %v1834_v61 = vpop.f32.mrb[42].mxu0  ;;  %v1875_v38 = vpop.f32.mrb[42].mxu1  ;;  %3427 = vtanh.f32 %v4959_v49 }
 0x4ce   :  { %v3097_v46 = vmul.f32 -1.442695, %v1878_v13  ;;  %v1835_v37 = vpop.f32.mrb[43].mxu0  ;;  %v1876_v40 = vpop.f32.mrb[43].mxu1 }
 0x4cf   :  { %v3098_v15 = vmul.f32 -1.442695, %v1879_v48  ;;  %v3426_v41 = vpop.eup %3425  ;;  %v3099_v14 = vmul.f32 -1.442695, %v1881_v17 }
 0x4d0   :  { %3429 = vpow2.f32 %v3097_v46 }
 0x4d1   :  { %3431 = vpow2.f32 %v3098_v15 }
 0x4d2   :  { %3433 = vpow2.f32 %v3099_v14  ;;  %v6286_v14 = vld [vmem:[#allocation64_spill] sm:$0xff] }
 0x4d3   :  { %3435 = vtanh.f32 %v1880_v52 }
 0x4d7   :  { %v3428_v36 = vpop.eup %3427 }
 0x4d8   :  { %v1787_v39 = vmul.f32 %v3428_v36, %v3426_v41  ;;  %v6284_v41 = vld [vmem:[#allocation62_spill] sm:$0xff]  ;;  %v6285_v36 = vld [vmem:[#allocation63_spill] sm:$0xff] }
 0x4da   :  { %v3430_v42 = vpop.eup %3429  ;;  %v1788_v47 = vpack.c.bf16 %v1787_v39, %v1787_v39  ;;  %v6287_v39 = vld [vmem:[#allocation65_spill] sm:$0xff] }
 0x4db   :  { %v3432_v45 = vpop.eup %3431  ;;  %v1885_v12 = vadd.f32 1.0, %v3430_v42  ;;  %v6288_v42 = vld [vmem:[#allocation66_spill] sm:$0xff] }
 0x4dc   :  { %v1891_v61 = vadd.f32 1.0, %v3432_v45  ;;  %1939 = vmatprep.mubr.bf16.mxu0 %v1788_v47  ;;  %1980 = vmatprep.mubr.bf16.mxu1 %v1788_v47  ;;  %v3434_v9 = vpop.eup %3433  ;;  %v6289_v47 = vld [vmem:[#allocation67_spill] sm:$0xff]  ;;  %v6290_v45 = vld [vmem:[#allocation68_spill] sm:$0xff] }
 0x4dd   :  { %3437 = vrcp.f32 %v1885_v12  ;;  %v3436_v13 = vpop.eup %3435  ;;  %v1898_v38 = vadd.f32 1.0, %v3434_v9  ;;  %v6291_v12 = vld [vmem:[#allocation69_spill] sm:$0xff]  ;;  %v6293_v9 = vld [vmem:[#allocation71_spill] sm:$0xff] }
 0x4de   :  { %3439 = vrcp.f32 %v1891_v61  ;;  %v6292_v61 = vld [vmem:[#allocation70_spill] sm:$0xff] }
 0x4df   :  { %3441 = vrcp.f32 %v1898_v38  ;;  %v6298_v38 = vld [vmem:[#allocation21_spill] sm:$0xff] }
 0x4e7   :  { %v3438_v54 = vpop.eup %3437 }
 0x4e8   :  { %v3440_v57 = vpop.eup %3439  ;;  %v1902_v48 = vmul.f32 %v3438_v54, %v3436_v13  ;;  %v6294_v13 = vld [vmem:[#allocation72_spill] sm:$0xff]  ;;  %v6295_v54 = vld [vmem:[#allocation73_spill] sm:$0xff] }
 0x4e9   :  { %v1901_v17 = vmul.f32 %v3440_v57, %v4725_v43  ;;  %v3442_v37 = vpop.eup %3441  ;;  %v6274_v43 = vld [vmem:[#allocation52_spill] sm:$0xff]  ;;  %v6296_v57 = vld [vmem:[#allocation74_spill] sm:$0xff] }
 0x4eb   :  { %v4967_v46 = vadd.f32 %v1902_v48, %v1901_v17  ;;  %v6297_v48 = vld [vmem:[#allocation20_spill] sm:$0xff]  ;;  %v6299_v17 = vld [vmem:[#allocation26_spill] sm:$0xff] }
 0x4ed   :  { %3443 = vtanh.f32 %v4967_v46 }
 0x4f7   :  { %v3444_v52 = vpop.eup %3443 }
 0x4f8   :  { %v1905_v40 = vmul.f32 %v3444_v52, %v3442_v37  ;;  %v6300_v37 = vld [vmem:[#allocation80_spill] sm:$0xff]  ;;  %v6301_v52 = vld [vmem:[#allocation81_spill] sm:$0xff] }
 0x4fa   :  { %v1906_v15 = vpack.c.bf16 %v1905_v40, %v1905_v40  ;;  %v6302_v40 = vld [vmem:[#allocation82_spill] sm:$0xff] }
 0x4fc   :  { %1940 = vmatmul.mubr.bf16.vlgmr.msra.gmra.mrb[44].mxu0 %v1906_v15  ;;  %1981 = vmatmul.mubr.bf16.vlgmr.msra.gmra.mrb[44].mxu1 %v1906_v15 }
 0x4fd   :  { %2022 = vmatpush1.bf16.msra.mxu0 %v4552_v24  ;;  %2063 = vmatpush1.bf16.msra.mxu1 %v4555_v32  ;;  %v6253_v24 = vld [vmem:[#allocation36_spill] sm:$0xff]  ;;  %v6254_v32 = vld [vmem:[#allocation37_spill] sm:$0xff] }
 0x4fe   :  { %2023 = vmatprep.subr.bf16.mxu0 %v4558_v16  ;;  %2064 = vmatprep.subr.bf16.mxu1 %v4561_v62  ;;  %v6255_v16 = vld [vmem:[#allocation38_spill] sm:$0xff]  ;;  %v6256_v62 = vld [vmem:[#allocation39_spill] sm:$0xff] }
 0x4ff   :  { %2053 = vmatprep.mubr.bf16.mxu0 %v6070_v20  ;;  %2094 = vmatprep.mubr.bf16.mxu1 %v6070_v20 }
 0x501   :  { %2024 = vmatpush1.bf16.msra.mxu0 %v4566_v18  ;;  %2065 = vmatpush1.bf16.msra.mxu1 %v4569_v22  ;;  %v6257_v18 = vld [vmem:[#allocation40_spill] sm:$0xff]  ;;  %v6258_v22 = vld [vmem:[#allocation41_spill] sm:$0xff] }
 0x502   :  { %2025 = vmatprep.subr.bf16.mxu0 %v4572_v19  ;;  %2066 = vmatprep.subr.bf16.mxu1 %v4575_v31  ;;  %v6259_v19 = vld [vmem:[#allocation42_spill] sm:$0xff]  ;;  %v6260_v31 = vld [vmem:[#allocation43_spill] sm:$0xff] }
 0x505   :  { %2026 = vmatpush1.bf16.msra.mxu0 %v4578_v6  ;;  %2067 = vmatpush1.bf16.msra.mxu1 %v4581_v53  ;;  %v6261_v6 = vld [vmem:[#allocation44_spill] sm:$0xff]  ;;  %v6262_v53 = vld [vmem:[#allocation45_spill] sm:$0xff] }
 0x506   :  { %2027 = vmatprep.subr.bf16.mxu0 %v4584_v0  ;;  %2068 = vmatprep.subr.bf16.mxu1 %v4587_v28  ;;  %v6263_v0 = vld [vmem:[#allocation46_spill] sm:$0xff]  ;;  %v6264_v28 = vld [vmem:[#allocation47_spill] sm:$0xff] }
 0x509   :  { %2028 = vmatpush1.bf16.msra.mxu0 %v4590_v35  ;;  %2069 = vmatpush1.bf16.msra.mxu1 %v4593_v34  ;;  %v6265_v35 = vld [vmem:[#allocation48_spill] sm:$0xff]  ;;  %v6266_v34 = vld [vmem:[#allocation49_spill] sm:$0xff] }
 0x50a   :  { %2029 = vmatprep.subr.bf16.mxu0 %v4596_v33  ;;  %2070 = vmatprep.subr.bf16.mxu1 %v6186_v21  ;;  %v6267_v33 = vld [vmem:[#allocation50_spill] sm:$0xff]  ;;  %v6275_v21 = vld [vmem:[#allocation53_spill] sm:$0xff] }
 0x50d   :  { %2030 = vmatpush1.bf16.msra.mxu0 %v6187_v50  ;;  %2071 = vmatpush1.bf16.msra.mxu1 %v6188_v51  ;;  %v6276_v50 = vld [vmem:[#allocation54_spill] sm:$0xff]  ;;  %v6277_v51 = vld [vmem:[#allocation55_spill] sm:$0xff] }
 0x50e   :  { %2031 = vmatprep.subr.bf16.mxu0 %v6189_v55  ;;  %2072 = vmatprep.subr.bf16.mxu1 %v6190_v56  ;;  %v6278_v55 = vld [vmem:[#allocation56_spill] sm:$0xff]  ;;  %v6279_v56 = vld [vmem:[#allocation57_spill] sm:$0xff] }
 0x511   :  { %2032 = vmatpush1.bf16.msra.mxu0 %v6191_v58  ;;  %2073 = vmatpush1.bf16.msra.mxu1 %v6192_v59  ;;  %v6280_v58 = vld [vmem:[#allocation58_spill] sm:$0xff]  ;;  %v6281_v59 = vld [vmem:[#allocation59_spill] sm:$0xff] }
 0x512   :  { %2033 = vmatprep.subr.bf16.mxu0 %v6193_v60  ;;  %2074 = vmatprep.subr.bf16.mxu1 %v6194_v63  ;;  %v6282_v60 = vld [vmem:[#allocation60_spill] sm:$0xff]  ;;  %v6283_v63 = vld [vmem:[#allocation61_spill] sm:$0xff] }
 0x515   :  { %2034 = vmatpush1.bf16.msra.mxu0 %v4626_v26  ;;  %2075 = vmatpush1.bf16.msra.mxu1 %v4629_v30  ;;  %v6271_v26 = vld [vmem:[#allocation78_spill] sm:$0xff]  ;;  %v6272_v30 = vld [vmem:[#allocation79_spill] sm:$0xff] }
 0x516   :  { %2035 = vmatprep.subr.bf16.mxu0 %v4632_v25  ;;  %2076 = vmatprep.subr.bf16.mxu1 %v4635_v44  ;;  %v6268_v44 = vld [vmem:[#allocation75_spill] sm:$0xff] }
 0x517   :  { %v6273_v25 = vld [vmem:[#allocation51_spill] sm:$0xff] }
 0x519   :  { %2036 = vmatpush1.bf16.msra.mxu0 %v4638_v27  ;;  %2077 = vmatpush1.bf16.msra.mxu1 %v4641_v23  ;;  %v6269_v27 = vld [vmem:[#allocation76_spill] sm:$0xff]  ;;  %v6270_v23 = vld [vmem:[#allocation77_spill] sm:$0xff] }
 0x51a   :  { %2132 = vmatprep.subr.bf16.mxu0 %v4760_v1  ;;  %2173 = vmatprep.subr.bf16.mxu1 %v4763_v2 }
 0x51c   :  { %2054 = vmatmul.mubr.bf16.vlgmr.msra.gmra.mrb[48].mxu0 %v1906_v15  ;;  %2095 = vmatmul.mubr.bf16.vlgmr.msra.gmra.mrb[48].mxu1 %v1906_v15  ;;  %v6303_v15 = vld [vmem:[#allocation83_spill] sm:$0xff] }
 0x51d   :  { %2133 = vmatpush1.bf16.msra.mxu0 %v4766_v3  ;;  %2174 = vmatpush1.bf16.msra.mxu1 %v4769_v4 }
 0x51e   :  { %2134 = vmatprep.subr.bf16.mxu0 %v4772_v5  ;;  %2175 = vmatprep.subr.bf16.mxu1 %v4775_v29 }
 0x521   :  { %2135 = vmatpush1.bf16.msra.mxu0 %v4778_v7  ;;  %2176 = vmatpush1.bf16.msra.mxu1 %v4781_v8 }
 0x522   :  { %2136 = vmatprep.subr.bf16.mxu0 %v4784_v10  ;;  %2177 = vmatprep.subr.bf16.mxu1 %v4787_v11 }
 0x525   :  { %2137 = vmatpush1.bf16.msra.mxu0 %v6253_v24  ;;  %2178 = vmatpush1.bf16.msra.mxu1 %v6254_v32 }
 0x526   :  { %2138 = vmatprep.subr.bf16.mxu0 %v6255_v16  ;;  %2179 = vmatprep.subr.bf16.mxu1 %v6256_v62 }
 0x529   :  { %2139 = vmatpush1.bf16.msra.mxu0 %v6257_v18  ;;  %2180 = vmatpush1.bf16.msra.mxu1 %v6258_v22 }
 0x52a   :  { %2140 = vmatprep.subr.bf16.mxu0 %v6259_v19  ;;  %2181 = vmatprep.subr.bf16.mxu1 %v6260_v31 }
 0x52d   :  { %2141 = vmatpush1.bf16.msra.mxu0 %v6261_v6  ;;  %2182 = vmatpush1.bf16.msra.mxu1 %v6262_v53 }
 0x52e   :  { %2142 = vmatprep.subr.bf16.mxu0 %v6263_v0  ;;  %2183 = vmatprep.subr.bf16.mxu1 %v6264_v28 }
 0x531   :  { %2143 = vmatpush1.bf16.msra.mxu0 %v6265_v35  ;;  %2184 = vmatpush1.bf16.msra.mxu1 %v6266_v34 }
 0x532   :  { %2144 = vmatprep.subr.bf16.mxu0 %v6267_v33  ;;  %2185 = vmatprep.subr.bf16.mxu1 %v6268_v44 }
 0x535   :  { %2145 = vmatpush1.bf16.msra.mxu0 %v6269_v27  ;;  %2186 = vmatpush1.bf16.msra.mxu1 %v6270_v23 }
 0x536   :  { %2146 = vmatprep.subr.bf16.mxu0 %v6271_v26  ;;  %2187 = vmatprep.subr.bf16.mxu1 %v6272_v30 }
 0x539   :  { %2147 = vmatpush1.bf16.msra.mxu0 %v6273_v25  ;;  %2188 = vmatpush1.bf16.msra.mxu1 %v6274_v43 }
 0x53a   :  { %2148 = vmatprep.subr.bf16.mxu0 %v6275_v21  ;;  %2189 = vmatprep.subr.bf16.mxu1 %v6276_v50 }
 0x53d   :  { %2149 = vmatpush1.bf16.msra.mxu0 %v6277_v51  ;;  %2190 = vmatpush1.bf16.msra.mxu1 %v6278_v55 }
 0x53e   :  { %2150 = vmatprep.subr.bf16.mxu0 %v6279_v56  ;;  %2191 = vmatprep.subr.bf16.mxu1 %v6280_v58 }
 0x541   :  { %2151 = vmatpush1.bf16.msra.mxu0 %v6281_v59  ;;  %2192 = vmatpush1.bf16.msra.mxu1 %v6282_v60 }
 0x542   :  { %2152 = vmatprep.subr.bf16.mxu0 %v6283_v63  ;;  %2193 = vmatprep.subr.bf16.mxu1 %v6284_v41 }
 0x545   :  { %2153 = vmatpush1.bf16.msra.mxu0 %v6285_v36  ;;  %2194 = vmatpush1.bf16.msra.mxu1 %v6286_v14 }
 0x546   :  { %2154 = vmatprep.subr.bf16.mxu0 %v6287_v39  ;;  %2195 = vmatprep.subr.bf16.mxu1 %v6288_v42 }
 0x549   :  { %2155 = vmatpush1.bf16.msra.mxu0 %v6289_v47  ;;  %2196 = vmatpush1.bf16.msra.mxu1 %v6290_v45 }
 0x54a   :  { %2156 = vmatprep.subr.bf16.mxu0 %v6291_v12  ;;  %2197 = vmatprep.subr.bf16.mxu1 %v6292_v61  ;;  %v6310_v61 = vld [vmem:[#allocation23_spill] sm:$0xff] }
 0x54d   :  { %2157 = vmatpush1.bf16.msra.mxu0 %v6293_v9  ;;  %2198 = vmatpush1.bf16.msra.mxu1 %v6294_v13  ;;  %v6304_v9 = vld [vmem:[#allocation27_spill] sm:$0xff]  ;;  %v6305_v13 = vld [vmem:[#allocation28_spill] sm:$0xff] }
 0x54e   :  { %2158 = vmatprep.subr.bf16.mxu0 %v6295_v54  ;;  %2199 = vmatprep.subr.bf16.mxu1 %v6296_v57  ;;  %v6306_v54 = vld [vmem:[#allocation29_spill] sm:$0xff] }
 0x54f   :  { %v5066_v57 = vld [vmem:[#allocation12 + $0x4] ss:$16 sps:$4 sm:$0xff]  }
 0x550   :  { %6307 = vst [vmem:[#allocation30_spill] sm:$0xff] %v5066_v57 }
 0x551   :  { %2159 = vmatpush1.bf16.msra.mxu0 %v6297_v48  ;;  %2200 = vmatpush1.bf16.msra.mxu1 %v6298_v38  ;;  %v5069_v38 = vld [vmem:[#allocation12 + $0xc] ss:$16 sps:$4 sm:$0xff]  }
 0x552   :  { %2160 = vmatprep.subr.bf16.mxu0 %v6299_v17  ;;  %2201 = vmatprep.subr.bf16.mxu1 %v6300_v37  ;;  %6308 = vst [vmem:[#allocation31_spill] sm:$0xff] %v5069_v38  ;;  %v6309_v17 = vld [vmem:[#allocation22_spill] sm:$0xff] }
 0x555   :  { %2161 = vmatpush1.bf16.msra.mxu0 %v6301_v52  ;;  %2202 = vmatpush1.bf16.msra.mxu1 %v6302_v40 }
 0x556   :  { %2162 = vmatprep.subr.bf16.mxu0 %v6303_v15  ;;  %2203 = vmatprep.subr.bf16.mxu1 %v6304_v9 }
 0x559   :  { %2163 = vmatpush1.bf16.msra.mxu0 %v6305_v13  ;;  %2204 = vmatpush1.bf16.msra.mxu1 %v6306_v54 }
 0x55a   :  { %2246 = vmatprep.subr.bf16.mxu0 %v5066_v57  ;;  %2287 = vmatprep.subr.bf16.mxu1 %v5069_v38  ;;  %v6311_v57 = vld [vmem:[#allocation24_spill] sm:$0xff]  ;;  %v6312_v38 = vld [vmem:[#allocation25_spill] sm:$0xff] }
 0x5cf   :  { %v1941_v37 = vpop.f32.mrb[44].mxu0  ;;  %v1982_v52 = vpop.f32.mrb[44].mxu1 }
 0x5d0   :  { %v1942_v40 = vadd.f32 %v1941_v37, %v6309_v17  ;;  %v1943_v48 = vpop.f32.mrb[45].mxu0  ;;  %v1984_v15 = vpop.f32.mrb[45].mxu1  ;;  %v1983_v36 = vadd.f32 %v1982_v52, %v6312_v38  ;;  %v6313_v52 = vld [vmem:[#allocation88_spill] sm:$0xff]  ;;  %v6316_v38 = vld [vmem:[#allocation91_spill] sm:$0xff] }
 0x5d1   :  { %v1944_v9 = vadd.f32 %v1943_v48, %v6310_v61  ;;  %v1945_v12 = vpop.f32.mrb[46].mxu0  ;;  %v1986_v13 = vpop.f32.mrb[46].mxu1  ;;  %v1985_v39 = vadd.f32 %v1984_v15, %v6311_v57 }
 0x5d2   :  { %v3100_v45 = vmul.f32 -1.442695, %v1942_v40  ;;  %v1946_v54 = vpop.f32.mrb[47].mxu0  ;;  %v1987_v47 = vpop.f32.mrb[47].mxu1 }
 0x5d3   :  { %v3101_v42 = vmul.f32 -1.442695, %v1944_v9  ;;  %v3102_v14 = vmul.f32 -1.442695, %v1985_v39 }
 0x5d4   :  { %3445 = vpow2.f32 %v3100_v45 }
 0x5d5   :  { %3447 = vpow2.f32 %v3101_v42 }
 0x5d6   :  { %3449 = vpow2.f32 %v3102_v14  ;;  %v6314_v14 = vld [vmem:[#allocation89_spill] sm:$0xff] }
 0x5d7   :  { %3451 = vtanh.f32 %v1983_v36 }
 0x5de   :  { %v3446_v41 = vpop.eup %3445 }
 0x5df   :  { %v3448_v63 = vpop.eup %3447  ;;  %v1992_v37 = vadd.f32 1.0, %v3446_v41 }
 0x5e0   :  { %v1998_v17 = vadd.f32 1.0, %v3448_v63  ;;  %v3450_v12 = vpop.eup %3449 }
 0x5e1   :  { %3453 = vrcp.f32 %v1992_v37  ;;  %v3452_v13 = vpop.eup %3451  ;;  %v2005_v45 = vadd.f32 1.0, %v3450_v12 }
 0x5e2   :  { %3455 = vrcp.f32 %v1998_v17  ;;  %v6315_v17 = vld [vmem:[#allocation90_spill] sm:$0xff] }
 0x5e3   :  { %3457 = vrcp.f32 %v2005_v45 }
 0x5eb   :  { %v3454_v54 = vpop.eup %3453 }
 0x5ec   :  { %v3456_v47 = vpop.eup %3455  ;;  %v2009_v9 = vmul.f32 %v3454_v54, %v3452_v13 }
 0x5ed   :  { %v2008_v42 = vmul.f32 %v3456_v47, %v4959_v49 }
 0x5ef   :  { %v2055_v48 = vpop.f32.mrb[48].mxu0  ;;  %v2096_v39 = vpop.f32.mrb[48].mxu1  ;;  %v5077_v40 = vadd.f32 %v2009_v9, %v2008_v42 }
 0x5f0   :  { %v2103_v41 = vadd.f32 %v2055_v48, %v6313_v52  ;;  %v2105_v36 = vadd.f32 %v2096_v39, %v6314_v14  ;;  %v2057_v63 = vpop.f32.mrb[49].mxu0  ;;  %v2098_v15 = vpop.f32.mrb[49].mxu1 }
 0x5f1   :  { %v2104_v37 = vadd.f32 %v2057_v63, %v6315_v17  ;;  %v2106_v57 = vadd.f32 %v2098_v15, %v6316_v38  ;;  %v2059_v61 = vpop.f32.mrb[50].mxu0  ;;  %v2100_v13 = vpop.f32.mrb[50].mxu1  ;;  %3459 = vtanh.f32 %v5077_v40 }
 0x5f2   :  { %v3103_v49 = vmul.f32 -1.442695, %v2103_v41  ;;  %v2060_v12 = vpop.f32.mrb[51].mxu0  ;;  %v2101_v54 = vpop.f32.mrb[51].mxu1 }
 0x5f3   :  { %v3104_v47 = vmul.f32 -1.442695, %v2104_v37  ;;  %v3458_v9 = vpop.eup %3457  ;;  %v3105_v42 = vmul.f32 -1.442695, %v2106_v57 }
 0x5f4   :  { %3461 = vpow2.f32 %v3103_v49 }
 0x5f5   :  { %3463 = vpow2.f32 %v3104_v47 }
 0x5f6   :  { %3465 = vpow2.f32 %v3105_v42  ;;  %v5101_v42 = vld [vmem:[#allocation12 + $0x2c] ss:$16 sps:$4 sm:$0xff]  }
 0x5f7   :  { %3467 = vtanh.f32 %v2105_v36 }
 0x5fb   :  { %v3460_v45 = vpop.eup %3459 }
 0x5fc   :  { %v2012_v48 = vmul.f32 %v3460_v45, %v3458_v9  ;;  %v5092_v9 = vld [vmem:[#allocation12] ss:$16 sps:$4 sm:$0xff]   ;;  %v5095_v45 = vld [vmem:[#allocation12 + $0x8] ss:$16 sps:$4 sm:$0xff]  }
 0x5fe   :  { %v3462_v39 = vpop.eup %3461  ;;  %v2013_v52 = vpack.c.bf16 %v2012_v48, %v2012_v48  ;;  %v5106_v48 = vld [vmem:[#allocation12 + $0x20] ss:$16 sps:$4 sm:$0xff]  }
 0x5ff   :  { %v3464_v14 = vpop.eup %3463  ;;  %v2110_v63 = vadd.f32 1.0, %v3462_v39  ;;  %v5109_v39 = vld [vmem:[#allocation12 + $0x28] ss:$16 sps:$4 sm:$0xff]  }
 0x600   :  { %v2116_v61 = vadd.f32 1.0, %v3464_v14  ;;  %2164 = vmatprep.mubr.bf16.mxu0 %v2013_v52  ;;  %2205 = vmatprep.mubr.bf16.mxu1 %v2013_v52  ;;  %v3466_v38 = vpop.eup %3465  ;;  %v5112_v52 = vld [vmem:[#allocation12 + $0x44] ss:$16 sps:$4 sm:$0xff]   ;;  %v5115_v14 = vld [vmem:[#allocation12 + $0x4c] ss:$16 sps:$4 sm:$0xff]  }
 0x601   :  { %3469 = vrcp.f32 %v2110_v63  ;;  %v3468_v41 = vpop.eup %3467  ;;  %v2123_v13 = vadd.f32 1.0, %v3466_v38  ;;  %v5118_v63 = vld [vmem:[#allocation12 + $0x40] ss:$16 sps:$4 sm:$0xff]   ;;  %v5124_v38 = vld [vmem:[#allocation12 + $0x64] ss:$16 sps:$4 sm:$0xff]  }
 0x602   :  { %3471 = vrcp.f32 %v2116_v61  ;;  %v5121_v61 = vld [vmem:[#allocation12 + $0x48] ss:$16 sps:$4 sm:$0xff]  }
 0x603   :  { %3473 = vrcp.f32 %v2123_v13  ;;  %v5139_v13 = vld [vmem:[#allocation12 + $0x8c] ss:$16 sps:$4 sm:$0xff]  }
 0x604   :  { %6318 = vst [vmem:[#allocation33_spill] sm:$0xff] %v5139_v13 }
 0x60b   :  { %v3470_v15 = vpop.eup %3469 }
 0x60c   :  { %v3472_v17 = vpop.eup %3471  ;;  %v2127_v37 = vmul.f32 %v3470_v15, %v3468_v41  ;;  %v5127_v41 = vld [vmem:[#allocation12 + $0x6c] ss:$16 sps:$4 sm:$0xff]   ;;  %v5130_v15 = vld [vmem:[#allocation12 + $0x60] ss:$16 sps:$4 sm:$0xff]  }
 0x60d   :  { %v2126_v57 = vmul.f32 %v3472_v17, %v4967_v46  ;;  %v3474_v12 = vpop.eup %3473  ;;  %v5098_v46 = vld [vmem:[#allocation12 + $0x24] ss:$16 sps:$4 sm:$0xff]   ;;  %v5133_v17 = vld [vmem:[#allocation12 + $0x68] ss:$16 sps:$4 sm:$0xff]  }
 0x60f   :  { %v5085_v49 = vadd.f32 %v2127_v37, %v2126_v57  ;;  %v5136_v37 = vld [vmem:[#allocation12 + $0x84] ss:$16 sps:$4 sm:$0xff]   ;;  %v5142_v57 = vld [vmem:[#allocation12 + $0x80] ss:$16 sps:$4 sm:$0xff]  }
 0x610   :  { %6317 = vst [vmem:[#allocation32_spill] sm:$0xff] %v5136_v37  ;;  %6319 = vst [vmem:[#allocation34_spill] sm:$0xff] %v5142_v57 }
 0x611   :  { %3475 = vtanh.f32 %v5085_v49 }
 0x61b   :  { %v3476_v36 = vpop.eup %3475 }
 0x61c   :  { %v2130_v54 = vmul.f32 %v3476_v36, %v3474_v12  ;;  %v5145_v12 = vld [vmem:[#allocation12 + $0x88] ss:$16 sps:$4 sm:$0xff]   ;;  %v5148_v36 = vld [vmem:[#allocation12 + $0xa4] ss:$16 sps:$4 sm:$0xff]  }
 0x61d   :  { %6320 = vst [vmem:[#allocation35_spill] sm:$0xff] %v5145_v12  ;;  %6321 = vst [vmem:[#allocation84_spill] sm:$0xff] %v5148_v36 }
 0x61e   :  { %v5088_v47 = vpack.c.bf16 %v2130_v54, %v2130_v54  ;;  %v5151_v54 = vld [vmem:[#allocation12 + $0xac] ss:$16 sps:$4 sm:$0xff]  }
 0x61f   :  { %6322 = vst [vmem:[#allocation85_spill] sm:$0xff] %v5151_v54 }
 0x620   :  { %2165 = vmatmul.mubr.bf16.vlgmr.msra.gmra.mrb[52].mxu0 %v5088_v47  ;;  %2206 = vmatmul.mubr.bf16.vlgmr.msra.gmra.mrb[52].mxu1 %v5088_v47 }
 0x621   :  { %2247 = vmatpush1.bf16.msra.mxu0 %v5092_v9  ;;  %2288 = vmatpush1.bf16.msra.mxu1 %v5095_v45 }
 0x622   :  { %2248 = vmatprep.subr.bf16.mxu0 %v5098_v46  ;;  %2289 = vmatprep.subr.bf16.mxu1 %v5101_v42 }
 0x623   :  { %2278 = vmatprep.mubr.bf16.mxu0 %v6070_v20  ;;  %2319 = vmatprep.mubr.bf16.mxu1 %v6070_v20 }
 0x625   :  { %2249 = vmatpush1.bf16.msra.mxu0 %v5106_v48  ;;  %2290 = vmatpush1.bf16.msra.mxu1 %v5109_v39 }
 0x626   :  { %2250 = vmatprep.subr.bf16.mxu0 %v5112_v52  ;;  %2291 = vmatprep.subr.bf16.mxu1 %v5115_v14 }
 0x629   :  { %2251 = vmatpush1.bf16.msra.mxu0 %v5118_v63  ;;  %2292 = vmatpush1.bf16.msra.mxu1 %v5121_v61 }
 0x62a   :  { %2252 = vmatprep.subr.bf16.mxu0 %v5124_v38  ;;  %2293 = vmatprep.subr.bf16.mxu1 %v5127_v41 }
 0x62d   :  { %2253 = vmatpush1.bf16.msra.mxu0 %v5130_v15  ;;  %2294 = vmatpush1.bf16.msra.mxu1 %v5133_v17 }
 0x62e   :  { %2254 = vmatprep.subr.bf16.mxu0 %v5136_v37  ;;  %2295 = vmatprep.subr.bf16.mxu1 %v5139_v13  ;;  %v5154_v37 = vld [vmem:[#allocation12 + $0xa0] ss:$16 sps:$4 sm:$0xff]   ;;  %v5157_v13 = vld [vmem:[#allocation12 + $0xa8] ss:$16 sps:$4 sm:$0xff]  }
 0x62f   :  { %6323 = vst [vmem:[#allocation86_spill] sm:$0xff] %v5154_v37  ;;  %6324 = vst [vmem:[#allocation87_spill] sm:$0xff] %v5157_v13 }
 0x631   :  { %2255 = vmatpush1.bf16.msra.mxu0 %v5142_v57  ;;  %2296 = vmatpush1.bf16.msra.mxu1 %v5145_v12  ;;  %v5160_v57 = vld [vmem:[#allocation12 + $0xc4] ss:$16 sps:$4 sm:$0xff]   ;;  %v5163_v12 = vld [vmem:[#allocation12 + $0xcc] ss:$16 sps:$4 sm:$0xff]  }
 0x632   :  { %2256 = vmatprep.subr.bf16.mxu0 %v5148_v36  ;;  %2297 = vmatprep.subr.bf16.mxu1 %v5151_v54  ;;  %6325 = vst [vmem:[#allocation36_spill] sm:$0xff] %v5160_v57  ;;  %6326 = vst [vmem:[#allocation37_spill] sm:$0xff] %v5163_v12  ;;  %v5166_v36 = vld [vmem:[#allocation12 + $0xc0] ss:$16 sps:$4 sm:$0xff]   ;;  %v5169_v54 = vld [vmem:[#allocation12 + $0xc8] ss:$16 sps:$4 sm:$0xff]  }
 0x635   :  { %2257 = vmatpush1.bf16.msra.mxu0 %v5154_v37  ;;  %2298 = vmatpush1.bf16.msra.mxu1 %v5157_v13  ;;  %v5172_v37 = vld [vmem:[#allocation12 + $0xe4] ss:$16 sps:$4 sm:$0xff]   ;;  %v5175_v13 = vld [vmem:[#allocation12 + $0xec] ss:$16 sps:$4 sm:$0xff]  }
 0x636   :  { %2258 = vmatprep.subr.bf16.mxu0 %v5160_v57  ;;  %2299 = vmatprep.subr.bf16.mxu1 %v5163_v12  ;;  %v5178_v57 = vld [vmem:[#allocation12 + $0xe0] ss:$16 sps:$4 sm:$0xff]   ;;  %v5181_v12 = vld [vmem:[#allocation12 + $0xe8] ss:$16 sps:$4 sm:$0xff]  }
 0x639   :  { %2259 = vmatpush1.bf16.msra.mxu0 %v5166_v36  ;;  %2300 = vmatpush1.bf16.msra.mxu1 %v5169_v54 }
 0x63a   :  { %2260 = vmatprep.subr.bf16.mxu0 %v5172_v37  ;;  %2301 = vmatprep.subr.bf16.mxu1 %v5175_v13 }
 0x63d   :  { %2261 = vmatpush1.bf16.msra.mxu0 %v5178_v57  ;;  %2302 = vmatpush1.bf16.msra.mxu1 %v5181_v12 }
 0x63e   :  { %2357 = vmatprep.subr.bf16.mxu0 %v4760_v1  ;;  %2398 = vmatprep.subr.bf16.mxu1 %v4763_v2  ;;  %v6327_v1 = vld [vmem:[#allocation61_spill] sm:$0xff]  ;;  %v6328_v2 = vld [vmem:[#allocation62_spill] sm:$0xff] }
 0x640   :  { %2279 = vmatmul.mubr.bf16.vlgmr.msra.gmra.mrb[56].mxu0 %v5088_v47  ;;  %2320 = vmatmul.mubr.bf16.vlgmr.msra.gmra.mrb[56].mxu1 %v5088_v47  ;;  %v6355_v47 = vld [vmem:[#allocation24_spill] sm:$0xff] }
 0x641   :  { %2358 = vmatpush1.bf16.msra.mxu0 %v4766_v3  ;;  %2399 = vmatpush1.bf16.msra.mxu1 %v4769_v4  ;;  %v6329_v3 = vld [vmem:[#allocation63_spill] sm:$0xff]  ;;  %v6330_v4 = vld [vmem:[#allocation64_spill] sm:$0xff] }
 0x642   :  { %2359 = vmatprep.subr.bf16.mxu0 %v4772_v5  ;;  %2400 = vmatprep.subr.bf16.mxu1 %v4775_v29  ;;  %v6331_v5 = vld [vmem:[#allocation65_spill] sm:$0xff]  ;;  %v6332_v29 = vld [vmem:[#allocation66_spill] sm:$0xff] }
 0x645   :  { %2360 = vmatpush1.bf16.msra.mxu0 %v4778_v7  ;;  %2401 = vmatpush1.bf16.msra.mxu1 %v4781_v8  ;;  %v6333_v7 = vld [vmem:[#allocation67_spill] sm:$0xff]  ;;  %v6334_v8 = vld [vmem:[#allocation68_spill] sm:$0xff] }
 0x646   :  { %2361 = vmatprep.subr.bf16.mxu0 %v4784_v10  ;;  %2402 = vmatprep.subr.bf16.mxu1 %v4787_v11  ;;  %v6335_v10 = vld [vmem:[#allocation69_spill] sm:$0xff]  ;;  %v6336_v11 = vld [vmem:[#allocation70_spill] sm:$0xff] }
 0x649   :  { %2362 = vmatpush1.bf16.msra.mxu0 %v6253_v24  ;;  %2403 = vmatpush1.bf16.msra.mxu1 %v6254_v32  ;;  %v6337_v24 = vld [vmem:[#allocation71_spill] sm:$0xff]  ;;  %v6338_v32 = vld [vmem:[#allocation72_spill] sm:$0xff] }
 0x64a   :  { %2363 = vmatprep.subr.bf16.mxu0 %v6255_v16  ;;  %2404 = vmatprep.subr.bf16.mxu1 %v6256_v62  ;;  %v6339_v16 = vld [vmem:[#allocation73_spill] sm:$0xff]  ;;  %v6340_v62 = vld [vmem:[#allocation74_spill] sm:$0xff] }
 0x64d   :  { %2364 = vmatpush1.bf16.msra.mxu0 %v6257_v18  ;;  %2405 = vmatpush1.bf16.msra.mxu1 %v6258_v22  ;;  %v6341_v18 = vld [vmem:[#allocation20_spill] sm:$0xff]  ;;  %v6342_v22 = vld [vmem:[#allocation21_spill] sm:$0xff] }
 0x64e   :  { %2365 = vmatprep.subr.bf16.mxu0 %v6259_v19  ;;  %2406 = vmatprep.subr.bf16.mxu1 %v6260_v31  ;;  %v6343_v19 = vld [vmem:[#allocation26_spill] sm:$0xff]  ;;  %v6344_v31 = vld [vmem:[#allocation80_spill] sm:$0xff] }
 0x651   :  { %2366 = vmatpush1.bf16.msra.mxu0 %v6261_v6  ;;  %2407 = vmatpush1.bf16.msra.mxu1 %v6262_v53  ;;  %v6345_v6 = vld [vmem:[#allocation81_spill] sm:$0xff]  ;;  %v6346_v53 = vld [vmem:[#allocation82_spill] sm:$0xff] }
 0x652   :  { %2367 = vmatprep.subr.bf16.mxu0 %v6263_v0  ;;  %2408 = vmatprep.subr.bf16.mxu1 %v6264_v28  ;;  %v6347_v0 = vld [vmem:[#allocation83_spill] sm:$0xff] }
 0x653   :  { %v6348_v28 = vld [vmem:[#allocation27_spill] sm:$0xff] }
 0x655   :  { %2368 = vmatpush1.bf16.msra.mxu0 %v6265_v35  ;;  %2409 = vmatpush1.bf16.msra.mxu1 %v6266_v34  ;;  %v6349_v35 = vld [vmem:[#allocation28_spill] sm:$0xff]  ;;  %v6350_v34 = vld [vmem:[#allocation29_spill] sm:$0xff] }
 0x656   :  { %2369 = vmatprep.subr.bf16.mxu0 %v6267_v33  ;;  %2410 = vmatprep.subr.bf16.mxu1 %v6268_v44  ;;  %v6351_v33 = vld [vmem:[#allocation30_spill] sm:$0xff]  ;;  %v6352_v44 = vld [vmem:[#allocation31_spill] sm:$0xff] }
 0x659   :  { %2370 = vmatpush1.bf16.msra.mxu0 %v6269_v27  ;;  %2411 = vmatpush1.bf16.msra.mxu1 %v6270_v23 }
 0x65a   :  { %2371 = vmatprep.subr.bf16.mxu0 %v6271_v26  ;;  %2412 = vmatprep.subr.bf16.mxu1 %v6272_v30  ;;  %v6353_v26 = vld [vmem:[#allocation22_spill] sm:$0xff] }
 0x65d   :  { %2372 = vmatpush1.bf16.msra.mxu0 %v6273_v25  ;;  %2413 = vmatpush1.bf16.msra.mxu1 %v6274_v43 }
 0x65e   :  { %2373 = vmatprep.subr.bf16.mxu0 %v6275_v21  ;;  %2414 = vmatprep.subr.bf16.mxu1 %v6276_v50  ;;  %v6354_v21 = vld [vmem:[#allocation23_spill] sm:$0xff] }
 0x661   :  { %2374 = vmatpush1.bf16.msra.mxu0 %v6277_v51  ;;  %2415 = vmatpush1.bf16.msra.mxu1 %v6278_v55 }
 0x662   :  { %2375 = vmatprep.subr.bf16.mxu0 %v6279_v56  ;;  %2416 = vmatprep.subr.bf16.mxu1 %v6280_v58 }
 0x665   :  { %2376 = vmatpush1.bf16.msra.mxu0 %v6281_v59  ;;  %2417 = vmatpush1.bf16.msra.mxu1 %v6282_v60 }
 0x666   :  { %2377 = vmatprep.subr.bf16.mxu0 %v6327_v1  ;;  %2418 = vmatprep.subr.bf16.mxu1 %v6328_v2 }
 0x669   :  { %2378 = vmatpush1.bf16.msra.mxu0 %v6329_v3  ;;  %2419 = vmatpush1.bf16.msra.mxu1 %v6330_v4  ;;  %v6356_v3 = vld [vmem:[#allocation25_spill] sm:$0xff] }
 0x66a   :  { %2379 = vmatprep.subr.bf16.mxu0 %v6331_v5  ;;  %2420 = vmatprep.subr.bf16.mxu1 %v6332_v29 }
 0x66d   :  { %2380 = vmatpush1.bf16.msra.mxu0 %v6333_v7  ;;  %2421 = vmatpush1.bf16.msra.mxu1 %v6334_v8 }
 0x66e   :  { %2381 = vmatprep.subr.bf16.mxu0 %v6335_v10  ;;  %2422 = vmatprep.subr.bf16.mxu1 %v6336_v11 }
 0x671   :  { %2382 = vmatpush1.bf16.msra.mxu0 %v6337_v24  ;;  %2423 = vmatpush1.bf16.msra.mxu1 %v6338_v32 }
 0x672   :  { %2383 = vmatprep.subr.bf16.mxu0 %v6339_v16  ;;  %2424 = vmatprep.subr.bf16.mxu1 %v6340_v62 }
 0x675   :  { %2384 = vmatpush1.bf16.msra.mxu0 %v6341_v18  ;;  %2425 = vmatpush1.bf16.msra.mxu1 %v6342_v22 }
 0x676   :  { %2385 = vmatprep.subr.bf16.mxu0 %v6343_v19  ;;  %2426 = vmatprep.subr.bf16.mxu1 %v6344_v31 }
 0x679   :  { %2386 = vmatpush1.bf16.msra.mxu0 %v6345_v6  ;;  %2427 = vmatpush1.bf16.msra.mxu1 %v6346_v53  ;;  %v6357_v6 = vld [vmem:[#allocation92_spill] sm:$0xff] }
 0x67a   :  { %2387 = vmatprep.subr.bf16.mxu0 %v6347_v0  ;;  %2428 = vmatprep.subr.bf16.mxu1 %v6348_v28  ;;  %v6358_v0 = vld [vmem:[#allocation93_spill] sm:$0xff] }
 0x67d   :  { %2388 = vmatpush1.bf16.msra.mxu0 %v6349_v35  ;;  %2429 = vmatpush1.bf16.msra.mxu1 %v6350_v34 }
 0x67e   :  { %2471 = vmatprep.subr.bf16.mxu0 %v6351_v33  ;;  %2512 = vmatprep.subr.bf16.mxu1 %v6352_v44 }
 0x6f3   :  { %v2166_v27 = vpop.f32.mrb[52].mxu0  ;;  %v2207_v23 = vpop.f32.mrb[52].mxu1 }
 0x6f4   :  { %v2167_v30 = vadd.f32 %v2166_v27, %v6353_v26  ;;  %v2168_v25 = vpop.f32.mrb[53].mxu0  ;;  %v2209_v43 = vpop.f32.mrb[53].mxu1  ;;  %v2208_v4 = vadd.f32 %v2207_v23, %v6356_v3  ;;  %v6359_v27 = vld [vmem:[#allocation94_spill] sm:$0xff] }
 0x6f5   :  { %v2169_v50 = vadd.f32 %v2168_v25, %v6354_v21  ;;  %v2170_v51 = vpop.f32.mrb[54].mxu0  ;;  %v2211_v55 = vpop.f32.mrb[54].mxu1  ;;  %v2210_v1 = vadd.f32 %v2209_v43, %v6355_v47 }
 0x6f6   :  { %v3106_v56 = vmul.f32 -1.442695, %v2167_v30  ;;  %v2171_v58 = vpop.f32.mrb[55].mxu0  ;;  %v2212_v59 = vpop.f32.mrb[55].mxu1  ;;  %v6360_v30 = vld [vmem:[#allocation95_spill] sm:$0xff] }
 0x6f7   :  { %v3107_v60 = vmul.f32 -1.442695, %v2169_v50  ;;  %v3108_v2 = vmul.f32 -1.442695, %v2210_v1 }
 0x6f8   :  { %3477 = vpow2.f32 %v3106_v56 }
 0x6f9   :  { %3479 = vpow2.f32 %v3107_v60 }
 0x6fa   :  { %3481 = vpow2.f32 %v3108_v2 }
 0x6fb   :  { %3483 = vtanh.f32 %v2208_v4 }
 0x702   :  { %v3478_v5 = vpop.eup %3477 }
 0x703   :  { %v3480_v29 = vpop.eup %3479  ;;  %v2217_v7 = vadd.f32 1.0, %v3478_v5 }
 0x704   :  { %v2223_v8 = vadd.f32 1.0, %v3480_v29  ;;  %v3482_v10 = vpop.eup %3481 }
 0x705   :  { %3485 = vrcp.f32 %v2217_v7  ;;  %v3484_v11 = vpop.eup %3483  ;;  %v2230_v62 = vadd.f32 1.0, %v3482_v10 }
 0x706   :  { %3487 = vrcp.f32 %v2223_v8 }
 0x707   :  { %3489 = vrcp.f32 %v2230_v62 }
 0x70f   :  { %v3486_v24 = vpop.eup %3485 }
 0x710   :  { %v3488_v32 = vpop.eup %3487  ;;  %v2234_v16 = vmul.f32 %v3486_v24, %v3484_v11 }
 0x711   :  { %v2233_v18 = vmul.f32 %v3488_v32, %v5077_v40  ;;  %v3490_v58 = vpop.eup %3489 }
 0x713   :  { %v2280_v22 = vpop.f32.mrb[56].mxu0  ;;  %v2321_v19 = vpop.f32.mrb[56].mxu1  ;;  %v5257_v31 = vadd.f32 %v2234_v16, %v2233_v18 }
 0x714   :  { %v2328_v53 = vadd.f32 %v2280_v22, %v6357_v6  ;;  %v2330_v28 = vadd.f32 %v2321_v19, %v6358_v0  ;;  %v2282_v35 = vpop.f32.mrb[57].mxu0  ;;  %v2323_v34 = vpop.f32.mrb[57].mxu1  ;;  %v6362_v0 = vld [vmem:[#allocation33_spill] sm:$0xff] }
 0x715   :  { %v2329_v23 = vadd.f32 %v2282_v35, %v6359_v27  ;;  %v2331_v25 = vadd.f32 %v2323_v34, %v6360_v30  ;;  %v2284_v43 = vpop.f32.mrb[58].mxu0  ;;  %v2325_v50 = vpop.f32.mrb[58].mxu1  ;;  %3491 = vtanh.f32 %v5257_v31  ;;  %v6364_v35 = vld [vmem:[#allocation35_spill] sm:$0xff]  ;;  %v6365_v34 = vld [vmem:[#allocation84_spill] sm:$0xff]  ;;  %v6366_v27 = vld [vmem:[#allocation85_spill] sm:$0xff] }
 0x716   :  { %v3109_v40 = vmul.f32 -1.442695, %v2328_v53  ;;  %v2285_v51 = vpop.f32.mrb[59].mxu0  ;;  %v2326_v55 = vpop.f32.mrb[59].mxu1  ;;  %v6368_v30 = vld [vmem:[#allocation87_spill] sm:$0xff]  ;;  %v6370_v43 = vld [vmem:[#allocation37_spill] sm:$0xff] }
 0x717   :  { %v3110_v56 = vmul.f32 -1.442695, %v2329_v23  ;;  %v3111_v60 = vmul.f32 -1.442695, %v2331_v25  ;;  %v6367_v23 = vld [vmem:[#allocation86_spill] sm:$0xff]  ;;  %v6369_v25 = vld [vmem:[#allocation36_spill] sm:$0xff] }
 0x718   :  { %3493 = vpow2.f32 %v3109_v40  ;;  %v5300_v50 = vld [vmem:[#allocation13 + $0x4] ss:$16 sps:$4 sm:$0xff]   ;;  %v5303_v40 = vld [vmem:[#allocation13 + $0xc] ss:$16 sps:$4 sm:$0xff]   ;;  %v5306_v51 = vld [vmem:[#allocation13] ss:$16 sps:$4 sm:$0xff]  }
 0x719   :  { %3495 = vpow2.f32 %v3110_v56  ;;  %v5309_v55 = vld [vmem:[#allocation13 + $0x8] ss:$16 sps:$4 sm:$0xff]   ;;  %v5312_v56 = vld [vmem:[#allocation13 + $0x24] ss:$16 sps:$4 sm:$0xff]  }
 0x71a   :  { %3497 = vpow2.f32 %v3111_v60  ;;  %v5321_v60 = vld [vmem:[#allocation13 + $0x28] ss:$16 sps:$4 sm:$0xff]  }
 0x71b   :  { %3499 = vtanh.f32 %v2330_v28  ;;  %v6363_v28 = vld [vmem:[#allocation34_spill] sm:$0xff] }
 0x71f   :  { %v3492_v59 = vpop.eup %3491 }
 0x720   :  { %v2237_v1 = vmul.f32 %v3492_v59, %v3490_v58  ;;  %v5315_v58 = vld [vmem:[#allocation13 + $0x2c] ss:$16 sps:$4 sm:$0xff]   ;;  %v5318_v59 = vld [vmem:[#allocation13 + $0x20] ss:$16 sps:$4 sm:$0xff]  }
 0x722   :  { %v3494_v2 = vpop.eup %3493  ;;  %v2238_v4 = vpack.c.bf16 %v2237_v1, %v2237_v1  ;;  %v5324_v1 = vld [vmem:[#allocation13 + $0x44] ss:$16 sps:$4 sm:$0xff]  }
 0x723   :  { %v3496_v5 = vpop.eup %3495  ;;  %v2335_v29 = vadd.f32 1.0, %v3494_v2  ;;  %v5327_v2 = vld [vmem:[#allocation13 + $0x4c] ss:$16 sps:$4 sm:$0xff]  }
 0x724   :  { %v2341_v7 = vadd.f32 1.0, %v3496_v5  ;;  %2389 = vmatprep.mubr.bf16.mxu0 %v2238_v4  ;;  %2430 = vmatprep.mubr.bf16.mxu1 %v2238_v4  ;;  %v3498_v8 = vpop.eup %3497  ;;  %v5330_v4 = vld [vmem:[#allocation13 + $0x40] ss:$16 sps:$4 sm:$0xff]   ;;  %v5333_v5 = vld [vmem:[#allocation13 + $0x48] ss:$16 sps:$4 sm:$0xff]  }
 0x725   :  { %3501 = vrcp.f32 %v2335_v29  ;;  %v3500_v10 = vpop.eup %3499  ;;  %v2348_v16 = vadd.f32 1.0, %v3498_v8  ;;  %6371 = vst [vmem:[#allocation38_spill] sm:$0xff] %v5330_v4  ;;  %6372 = vst [vmem:[#allocation39_spill] sm:$0xff] %v5333_v5  ;;  %v5336_v29 = vld [vmem:[#allocation13 + $0x64] ss:$16 sps:$4 sm:$0xff]  }
 0x726   :  { %3503 = vrcp.f32 %v2341_v7  ;;  %6373 = vst [vmem:[#allocation40_spill] sm:$0xff] %v5336_v29  ;;  %v5339_v7 = vld [vmem:[#allocation13 + $0x6c] ss:$16 sps:$4 sm:$0xff]   ;;  %v5342_v8 = vld [vmem:[#allocation13 + $0x60] ss:$16 sps:$4 sm:$0xff]  }
 0x727   :  { %3505 = vrcp.f32 %v2348_v16  ;;  %6374 = vst [vmem:[#allocation41_spill] sm:$0xff] %v5339_v7  ;;  %6375 = vst [vmem:[#allocation42_spill] sm:$0xff] %v5342_v8  ;;  %v5357_v16 = vld [vmem:[#allocation13 + $0x88] ss:$16 sps:$4 sm:$0xff]  }
 0x728   :  { %6380 = vst [vmem:[#allocation47_spill] sm:$0xff] %v5357_v16 }
 0x72f   :  { %v3502_v11 = vpop.eup %3501 }
 0x730   :  { %v3504_v24 = vpop.eup %3503  ;;  %v2352_v32 = vmul.f32 %v3502_v11, %v3500_v10  ;;  %v5345_v10 = vld [vmem:[#allocation13 + $0x68] ss:$16 sps:$4 sm:$0xff]   ;;  %v5348_v11 = vld [vmem:[#allocation13 + $0x84] ss:$16 sps:$4 sm:$0xff]  }
 0x731   :  { %v2351_v62 = vmul.f32 %v3504_v24, %v5085_v49  ;;  %v3506_v22 = vpop.eup %3505  ;;  %v6361_v49 = vld [vmem:[#allocation32_spill] sm:$0xff]  ;;  %6376 = vst [vmem:[#allocation43_spill] sm:$0xff] %v5345_v10  ;;  %6377 = vst [vmem:[#allocation44_spill] sm:$0xff] %v5348_v11 }
 0x732   :  { %v5351_v24 = vld [vmem:[#allocation13 + $0x8c] ss:$16 sps:$4 sm:$0xff]  }
 0x733   :  { %v5265_v18 = vadd.f32 %v2352_v32, %v2351_v62  ;;  %6378 = vst [vmem:[#allocation45_spill] sm:$0xff] %v5351_v24  ;;  %v5354_v32 = vld [vmem:[#allocation13 + $0x80] ss:$16 sps:$4 sm:$0xff]   ;;  %v5360_v62 = vld [vmem:[#allocation13 + $0xa4] ss:$16 sps:$4 sm:$0xff]  }
 0x734   :  { %6379 = vst [vmem:[#allocation46_spill] sm:$0xff] %v5354_v32  ;;  %6381 = vst [vmem:[#allocation48_spill] sm:$0xff] %v5360_v62 }
 0x735   :  { %3507 = vtanh.f32 %v5265_v18 }
 0x73f   :  { %v3508_v19 = vpop.eup %3507 }
 0x740   :  { %v2355_v6 = vmul.f32 %v3508_v19, %v3506_v22  ;;  %v5363_v22 = vld [vmem:[#allocation13 + $0xac] ss:$16 sps:$4 sm:$0xff]   ;;  %v5366_v19 = vld [vmem:[#allocation13 + $0xa0] ss:$16 sps:$4 sm:$0xff]  }
 0x741   :  { %6382 = vst [vmem:[#allocation49_spill] sm:$0xff] %v5363_v22  ;;  %6383 = vst [vmem:[#allocation50_spill] sm:$0xff] %v5366_v19 }
 0x742   :  { %v2356_v53 = vpack.c.bf16 %v2355_v6, %v2355_v6  ;;  %v5369_v6 = vld [vmem:[#allocation13 + $0xa8] ss:$16 sps:$4 sm:$0xff]  }
 0x743   :  { %6384 = vst [vmem:[#allocation75_spill] sm:$0xff] %v5369_v6 }
 0x744   :  { %2390 = vmatmul.mubr.bf16.vlgmr.msra.gmra.mrb[60].mxu0 %v2356_v53  ;;  %2431 = vmatmul.mubr.bf16.vlgmr.msra.gmra.mrb[60].mxu1 %v2356_v53 }
 0x745   :  { %2472 = vmatpush1.bf16.msra.mxu0 %v5092_v9  ;;  %2513 = vmatpush1.bf16.msra.mxu1 %v5095_v45 }
 0x746   :  { %2473 = vmatprep.subr.bf16.mxu0 %v5098_v46  ;;  %2514 = vmatprep.subr.bf16.mxu1 %v5101_v42 }
 0x747   :  { %2503 = vmatprep.mubr.bf16.mxu0 %v6070_v20  ;;  %2544 = vmatprep.mubr.bf16.mxu1 %v6070_v20 }
 0x749   :  { %2474 = vmatpush1.bf16.msra.mxu0 %v5106_v48  ;;  %2515 = vmatpush1.bf16.msra.mxu1 %v5109_v39 }
 0x74a   :  { %2475 = vmatprep.subr.bf16.mxu0 %v5112_v52  ;;  %2516 = vmatprep.subr.bf16.mxu1 %v5115_v14 }
 0x74d   :  { %2476 = vmatpush1.bf16.msra.mxu0 %v5118_v63  ;;  %2517 = vmatpush1.bf16.msra.mxu1 %v5121_v61 }
 0x74e   :  { %2477 = vmatprep.subr.bf16.mxu0 %v5124_v38  ;;  %2518 = vmatprep.subr.bf16.mxu1 %v5127_v41 }
 0x751   :  { %2478 = vmatpush1.bf16.msra.mxu0 %v5130_v15  ;;  %2519 = vmatpush1.bf16.msra.mxu1 %v5133_v17 }
 0x752   :  { %2479 = vmatprep.subr.bf16.mxu0 %v6361_v49  ;;  %2520 = vmatprep.subr.bf16.mxu1 %v6362_v0 }
 0x755   :  { %2480 = vmatpush1.bf16.msra.mxu0 %v6363_v28  ;;  %2521 = vmatpush1.bf16.msra.mxu1 %v6364_v35 }
 0x756   :  { %2481 = vmatprep.subr.bf16.mxu0 %v6365_v34  ;;  %2522 = vmatprep.subr.bf16.mxu1 %v6366_v27 }
 0x759   :  { %2482 = vmatpush1.bf16.msra.mxu0 %v6367_v23  ;;  %2523 = vmatpush1.bf16.msra.mxu1 %v6368_v30 }
 0x75a   :  { %2483 = vmatprep.subr.bf16.mxu0 %v6369_v25  ;;  %2524 = vmatprep.subr.bf16.mxu1 %v6370_v43 }
 0x75d   :  { %2484 = vmatpush1.bf16.msra.mxu0 %v5166_v36  ;;  %2525 = vmatpush1.bf16.msra.mxu1 %v5169_v54 }
 0x75e   :  { %2485 = vmatprep.subr.bf16.mxu0 %v5172_v37  ;;  %2526 = vmatprep.subr.bf16.mxu1 %v5175_v13 }
 0x761   :  { %2486 = vmatpush1.bf16.msra.mxu0 %v5178_v57  ;;  %2527 = vmatpush1.bf16.msra.mxu1 %v5181_v12 }
 0x762   :  { %2582 = vmatprep.subr.bf16.mxu0 %v5300_v50  ;;  %2623 = vmatprep.subr.bf16.mxu1 %v5303_v40 }
 0x764   :  { %2504 = vmatmul.mubr.bf16.vlgmr.msra.gmra.mrb[64].mxu0 %v2356_v53  ;;  %2545 = vmatmul.mubr.bf16.vlgmr.msra.gmra.mrb[64].mxu1 %v2356_v53  ;;  %v5372_v53 = vld [vmem:[#allocation13 + $0xc4] ss:$16 sps:$4 sm:$0xff]  }
 0x765   :  { %2583 = vmatpush1.bf16.msra.mxu0 %v5306_v51  ;;  %2624 = vmatpush1.bf16.msra.mxu1 %v5309_v55  ;;  %6385 = vst [vmem:[#allocation76_spill] sm:$0xff] %v5372_v53 }
 0x766   :  { %2584 = vmatprep.subr.bf16.mxu0 %v5312_v56  ;;  %2625 = vmatprep.subr.bf16.mxu1 %v5315_v58 }
 0x769   :  { %2585 = vmatpush1.bf16.msra.mxu0 %v5318_v59  ;;  %2626 = vmatpush1.bf16.msra.mxu1 %v5321_v60 }
 0x76a   :  { %2586 = vmatprep.subr.bf16.mxu0 %v5324_v1  ;;  %2627 = vmatprep.subr.bf16.mxu1 %v5327_v2 }
 0x76d   :  { %2587 = vmatpush1.bf16.msra.mxu0 %v5330_v4  ;;  %2628 = vmatpush1.bf16.msra.mxu1 %v5333_v5 }
 0x76e   :  { %2588 = vmatprep.subr.bf16.mxu0 %v5336_v29  ;;  %2629 = vmatprep.subr.bf16.mxu1 %v5339_v7 }
 0x771   :  { %2589 = vmatpush1.bf16.msra.mxu0 %v5342_v8  ;;  %2630 = vmatpush1.bf16.msra.mxu1 %v5345_v10 }
 0x772   :  { %2590 = vmatprep.subr.bf16.mxu0 %v5348_v11  ;;  %2631 = vmatprep.subr.bf16.mxu1 %v5351_v24 }
 0x775   :  { %2591 = vmatpush1.bf16.msra.mxu0 %v5354_v32  ;;  %2632 = vmatpush1.bf16.msra.mxu1 %v5357_v16  ;;  %v5375_v16 = vld [vmem:[#allocation13 + $0xcc] ss:$16 sps:$4 sm:$0xff]  }
 0x776   :  { %2592 = vmatprep.subr.bf16.mxu0 %v5360_v62  ;;  %2633 = vmatprep.subr.bf16.mxu1 %v5363_v22  ;;  %6386 = vst [vmem:[#allocation77_spill] sm:$0xff] %v5375_v16  ;;  %v5378_v62 = vld [vmem:[#allocation13 + $0xc0] ss:$16 sps:$4 sm:$0xff]   ;;  %v5381_v22 = vld [vmem:[#allocation13 + $0xc8] ss:$16 sps:$4 sm:$0xff]  }
 0x777   :  { %6387 = vst [vmem:[#allocation78_spill] sm:$0xff] %v5378_v62  ;;  %6388 = vst [vmem:[#allocation79_spill] sm:$0xff] %v5381_v22 }
 0x779   :  { %2593 = vmatpush1.bf16.msra.mxu0 %v5366_v19  ;;  %2634 = vmatpush1.bf16.msra.mxu1 %v5369_v6  ;;  %v5384_v19 = vld [vmem:[#allocation13 + $0xe4] ss:$16 sps:$4 sm:$0xff]   ;;  %v5387_v6 = vld [vmem:[#allocation13 + $0xec] ss:$16 sps:$4 sm:$0xff]  }
 0x77a   :  { %2594 = vmatprep.subr.bf16.mxu0 %v5372_v53  ;;  %2635 = vmatprep.subr.bf16.mxu1 %v5375_v16  ;;  %6389 = vst [vmem:[#allocation51_spill] sm:$0xff] %v5384_v19  ;;  %6390 = vst [vmem:[#allocation52_spill] sm:$0xff] %v5387_v6  ;;  %v5390_v53 = vld [vmem:[#allocation13 + $0xe0] ss:$16 sps:$4 sm:$0xff]   ;;  %v5393_v16 = vld [vmem:[#allocation13 + $0xe8] ss:$16 sps:$4 sm:$0xff]  }
 0x77b   :  { %6391 = vst [vmem:[#allocation53_spill] sm:$0xff] %v5390_v53  ;;  %6392 = vst [vmem:[#allocation54_spill] sm:$0xff] %v5393_v16 }
 0x77d   :  { %2595 = vmatpush1.bf16.msra.mxu0 %v5378_v62  ;;  %2636 = vmatpush1.bf16.msra.mxu1 %v5381_v22  ;;  %v5396_v62 = vld [vmem:[#allocation13 + $0x104] ss:$16 sps:$4 sm:$0xff]   ;;  %v5399_v22 = vld [vmem:[#allocation13 + $0x10c] ss:$16 sps:$4 sm:$0xff]  }
 0x77e   :  { %2596 = vmatprep.subr.bf16.mxu0 %v5384_v19  ;;  %2637 = vmatprep.subr.bf16.mxu1 %v5387_v6  ;;  %6393 = vst [vmem:[#allocation55_spill] sm:$0xff] %v5396_v62  ;;  %6394 = vst [vmem:[#allocation56_spill] sm:$0xff] %v5399_v22  ;;  %v5402_v19 = vld [vmem:[#allocation13 + $0x100] ss:$16 sps:$4 sm:$0xff]   ;;  %v5405_v6 = vld [vmem:[#allocation13 + $0x108] ss:$16 sps:$4 sm:$0xff]  }
 0x77f   :  { %6395 = vst [vmem:[#allocation57_spill] sm:$0xff] %v5402_v19  ;;  %6396 = vst [vmem:[#allocation58_spill] sm:$0xff] %v5405_v6 }
 0x781   :  { %2597 = vmatpush1.bf16.msra.mxu0 %v5390_v53  ;;  %2638 = vmatpush1.bf16.msra.mxu1 %v5393_v16  ;;  %v5408_v53 = vld [vmem:[#allocation13 + $0x124] ss:$16 sps:$4 sm:$0xff]   ;;  %v5411_v16 = vld [vmem:[#allocation13 + $0x12c] ss:$16 sps:$4 sm:$0xff]  }
 0x782   :  { %2598 = vmatprep.subr.bf16.mxu0 %v5396_v62  ;;  %2639 = vmatprep.subr.bf16.mxu1 %v5399_v22  ;;  %6397 = vst [vmem:[#allocation59_spill] sm:$0xff] %v5408_v53  ;;  %6398 = vst [vmem:[#allocation60_spill] sm:$0xff] %v5411_v16  ;;  %v5414_v62 = vld [vmem:[#allocation13 + $0x120] ss:$16 sps:$4 sm:$0xff]   ;;  %v5417_v22 = vld [vmem:[#allocation13 + $0x128] ss:$16 sps:$4 sm:$0xff]  }
 0x783   :  { %6399 = vst [vmem:[#allocation88_spill] sm:$0xff] %v5414_v62  ;;  %6400 = vst [vmem:[#allocation89_spill] sm:$0xff] %v5417_v22 }
 0x785   :  { %2599 = vmatpush1.bf16.msra.mxu0 %v5402_v19  ;;  %2640 = vmatpush1.bf16.msra.mxu1 %v5405_v6  ;;  %v5420_v19 = vld [vmem:[#allocation13 + $0x144] ss:$16 sps:$4 sm:$0xff]   ;;  %v5423_v6 = vld [vmem:[#allocation13 + $0x14c] ss:$16 sps:$4 sm:$0xff]  }
 0x786   :  { %2600 = vmatprep.subr.bf16.mxu0 %v5408_v53  ;;  %2641 = vmatprep.subr.bf16.mxu1 %v5411_v16  ;;  %6401 = vst [vmem:[#allocation90_spill] sm:$0xff] %v5420_v19  ;;  %6402 = vst [vmem:[#allocation91_spill] sm:$0xff] %v5423_v6  ;;  %v5426_v53 = vld [vmem:[#allocation13 + $0x140] ss:$16 sps:$4 sm:$0xff]   ;;  %v5429_v16 = vld [vmem:[#allocation13 + $0x148] ss:$16 sps:$4 sm:$0xff]  }
 0x787   :  { %6403 = vst [vmem:[#allocation61_spill] sm:$0xff] %v5426_v53  ;;  %6404 = vst [vmem:[#allocation62_spill] sm:$0xff] %v5429_v16 }
 0x789   :  { %2601 = vmatpush1.bf16.msra.mxu0 %v5414_v62  ;;  %2642 = vmatpush1.bf16.msra.mxu1 %v5417_v22  ;;  %v5432_v62 = vld [vmem:[#allocation13 + $0x164] ss:$16 sps:$4 sm:$0xff]   ;;  %v5435_v22 = vld [vmem:[#allocation13 + $0x16c] ss:$16 sps:$4 sm:$0xff]  }
 0x78a   :  { %2602 = vmatprep.subr.bf16.mxu0 %v5420_v19  ;;  %2643 = vmatprep.subr.bf16.mxu1 %v5423_v6  ;;  %6405 = vst [vmem:[#allocation63_spill] sm:$0xff] %v5432_v62  ;;  %6406 = vst [vmem:[#allocation64_spill] sm:$0xff] %v5435_v22  ;;  %v5438_v19 = vld [vmem:[#allocation13 + $0x160] ss:$16 sps:$4 sm:$0xff]   ;;  %v5441_v6 = vld [vmem:[#allocation13 + $0x168] ss:$16 sps:$4 sm:$0xff]  }
 0x78b   :  { %6407 = vst [vmem:[#allocation65_spill] sm:$0xff] %v5438_v19  ;;  %6408 = vst [vmem:[#allocation66_spill] sm:$0xff] %v5441_v6 }
 0x78d   :  { %2603 = vmatpush1.bf16.msra.mxu0 %v5426_v53  ;;  %2644 = vmatpush1.bf16.msra.mxu1 %v5429_v16  ;;  %v5444_v53 = vld [vmem:[#allocation13 + $0x184] ss:$16 sps:$4 sm:$0xff]   ;;  %v5447_v16 = vld [vmem:[#allocation13 + $0x18c] ss:$16 sps:$4 sm:$0xff]  }
 0x78e   :  { %2604 = vmatprep.subr.bf16.mxu0 %v5432_v62  ;;  %2645 = vmatprep.subr.bf16.mxu1 %v5435_v22  ;;  %6409 = vst [vmem:[#allocation67_spill] sm:$0xff] %v5444_v53  ;;  %6410 = vst [vmem:[#allocation68_spill] sm:$0xff] %v5447_v16  ;;  %v5450_v62 = vld [vmem:[#allocation13 + $0x180] ss:$16 sps:$4 sm:$0xff]   ;;  %v5453_v22 = vld [vmem:[#allocation13 + $0x188] ss:$16 sps:$4 sm:$0xff]  }
 0x78f   :  { %6411 = vst [vmem:[#allocation69_spill] sm:$0xff] %v5450_v62  ;;  %6412 = vst [vmem:[#allocation70_spill] sm:$0xff] %v5453_v22 }
 0x791   :  { %2605 = vmatpush1.bf16.msra.mxu0 %v5438_v19  ;;  %2646 = vmatpush1.bf16.msra.mxu1 %v5441_v6  ;;  %v5456_v19 = vld [vmem:[#allocation13 + $0x1a4] ss:$16 sps:$4 sm:$0xff]   ;;  %v5459_v6 = vld [vmem:[#allocation13 + $0x1ac] ss:$16 sps:$4 sm:$0xff]  }
 0x792   :  { %2606 = vmatprep.subr.bf16.mxu0 %v5444_v53  ;;  %2647 = vmatprep.subr.bf16.mxu1 %v5447_v16  ;;  %6413 = vst [vmem:[#allocation71_spill] sm:$0xff] %v5456_v19  ;;  %6414 = vst [vmem:[#allocation72_spill] sm:$0xff] %v5459_v6  ;;  %v5462_v53 = vld [vmem:[#allocation13 + $0x1a0] ss:$16 sps:$4 sm:$0xff]   ;;  %v5465_v16 = vld [vmem:[#allocation13 + $0x1a8] ss:$16 sps:$4 sm:$0xff]  }
 0x793   :  { %6415 = vst [vmem:[#allocation73_spill] sm:$0xff] %v5462_v53  ;;  %6416 = vst [vmem:[#allocation74_spill] sm:$0xff] %v5465_v16 }
 0x795   :  { %2607 = vmatpush1.bf16.msra.mxu0 %v5450_v62  ;;  %2648 = vmatpush1.bf16.msra.mxu1 %v5453_v22  ;;  %v5468_v62 = vld [vmem:[#allocation13 + $0x1c4] ss:$16 sps:$4 sm:$0xff]   ;;  %v5471_v22 = vld [vmem:[#allocation13 + $0x1cc] ss:$16 sps:$4 sm:$0xff]  }
 0x796   :  { %2608 = vmatprep.subr.bf16.mxu0 %v5456_v19  ;;  %2649 = vmatprep.subr.bf16.mxu1 %v5459_v6  ;;  %6417 = vst [vmem:[#allocation20_spill] sm:$0xff] %v5468_v62  ;;  %6418 = vst [vmem:[#allocation21_spill] sm:$0xff] %v5471_v22  ;;  %v5474_v19 = vld [vmem:[#allocation13 + $0x1c0] ss:$16 sps:$4 sm:$0xff]   ;;  %v5477_v6 = vld [vmem:[#allocation13 + $0x1c8] ss:$16 sps:$4 sm:$0xff]  }
 0x797   :  { %6419 = vst [vmem:[#allocation26_spill] sm:$0xff] %v5474_v19  ;;  %6420 = vst [vmem:[#allocation80_spill] sm:$0xff] %v5477_v6 }
 0x799   :  { %2609 = vmatpush1.bf16.msra.mxu0 %v5462_v53  ;;  %2650 = vmatpush1.bf16.msra.mxu1 %v5465_v16  ;;  %v5480_v53 = vld [vmem:[#allocation13 + $0x1e4] ss:$16 sps:$4 sm:$0xff]   ;;  %v5483_v16 = vld [vmem:[#allocation13 + $0x1ec] ss:$16 sps:$4 sm:$0xff]  }
 0x79a   :  { %2610 = vmatprep.subr.bf16.mxu0 %v5468_v62  ;;  %2651 = vmatprep.subr.bf16.mxu1 %v5471_v22  ;;  %6421 = vst [vmem:[#allocation81_spill] sm:$0xff] %v5480_v53  ;;  %6422 = vst [vmem:[#allocation82_spill] sm:$0xff] %v5483_v16  ;;  %v5486_v62 = vld [vmem:[#allocation13 + $0x1e0] ss:$16 sps:$4 sm:$0xff]   ;;  %v5489_v22 = vld [vmem:[#allocation13 + $0x1e8] ss:$16 sps:$4 sm:$0xff]  }
 0x79b   :  { %6423 = vst [vmem:[#allocation83_spill] sm:$0xff] %v5486_v62  ;;  %6424 = vst [vmem:[#allocation27_spill] sm:$0xff] %v5489_v22 }
 0x79d   :  { %2611 = vmatpush1.bf16.msra.mxu0 %v5474_v19  ;;  %2652 = vmatpush1.bf16.msra.mxu1 %v5477_v6 }
 0x79e   :  { %2612 = vmatprep.subr.bf16.mxu0 %v5480_v53  ;;  %2653 = vmatprep.subr.bf16.mxu1 %v5483_v16 }
 0x7a1   :  { %2613 = vmatpush1.bf16.msra.mxu0 %v5486_v62  ;;  %2654 = vmatpush1.bf16.msra.mxu1 %v5489_v22 }
 0x7a2   :  { %2696 = vmatprep.subr.bf16.mxu0 %v6351_v33  ;;  %2737 = vmatprep.subr.bf16.mxu1 %v6352_v44 }
 0x817   :  { %v2391_v6 = vpop.f32.mrb[60].mxu0  ;;  %v2432_v19 = vpop.f32.mrb[60].mxu1 }
 0x818   :  { %v2392_v53 = vadd.f32 %v2391_v6, %v6353_v26  ;;  %v2393_v32 = vpop.f32.mrb[61].mxu0  ;;  %v2434_v24 = vpop.f32.mrb[61].mxu1  ;;  %v2433_v44 = vadd.f32 %v2432_v19, %v6356_v3  ;;  %v6425_v19 = vld [vmem:[#allocation96_spill] sm:$0xff]  ;;  %v6428_v3 = vld [vmem:[#allocation99_spill] sm:$0xff] }
 0x819   :  { %v2394_v16 = vadd.f32 %v2393_v32, %v6354_v21  ;;  %v2395_v11 = vpop.f32.mrb[62].mxu0  ;;  %v2436_v10 = vpop.f32.mrb[62].mxu1  ;;  %v2435_v33 = vadd.f32 %v2434_v24, %v6355_v47 }
 0x81a   :  { %v3112_v8 = vmul.f32 -1.442695, %v2392_v53  ;;  %v2396_v62 = vpop.f32.mrb[63].mxu0  ;;  %v2437_v7 = vpop.f32.mrb[63].mxu1 }
 0x81b   :  { %v3113_v29 = vmul.f32 -1.442695, %v2394_v16  ;;  %v3114_v22 = vmul.f32 -1.442695, %v2435_v33 }
 0x81c   :  { %3509 = vpow2.f32 %v3112_v8 }
 0x81d   :  { %3511 = vpow2.f32 %v3113_v29 }
 0x81e   :  { %3513 = vpow2.f32 %v3114_v22  ;;  %v6426_v22 = vld [vmem:[#allocation97_spill] sm:$0xff] }
 0x81f   :  { %3515 = vtanh.f32 %v2433_v44 }
 0x826   :  { %v3510_v5 = vpop.eup %3509 }
 0x827   :  { %v3512_v4 = vpop.eup %3511  ;;  %v2442_v6 = vadd.f32 1.0, %v3510_v5 }
 0x828   :  { %v2448_v26 = vadd.f32 1.0, %v3512_v4  ;;  %v3514_v10 = vpop.eup %3513 }
 0x829   :  { %3517 = vrcp.f32 %v2442_v6  ;;  %v3516_v11 = vpop.eup %3515  ;;  %v2455_v8 = vadd.f32 1.0, %v3514_v10 }
 0x82a   :  { %3519 = vrcp.f32 %v2448_v26  ;;  %v6427_v26 = vld [vmem:[#allocation98_spill] sm:$0xff] }
 0x82b   :  { %3521 = vrcp.f32 %v2455_v8 }
 0x833   :  { %v3518_v32 = vpop.eup %3517 }
 0x834   :  { %v3520_v7 = vpop.eup %3519  ;;  %v2459_v16 = vmul.f32 %v3518_v32, %v3516_v11 }
 0x835   :  { %v2458_v29 = vmul.f32 %v3520_v7, %v5257_v31 }
 0x837   :  { %v2505_v24 = vpop.f32.mrb[64].mxu0  ;;  %v2546_v62 = vpop.f32.mrb[64].mxu1  ;;  %v5499_v53 = vadd.f32 %v2459_v16, %v2458_v29 }
 0x838   :  { %v2553_v5 = vadd.f32 %v2505_v24, %v6425_v19  ;;  %v2555_v33 = vadd.f32 %v2546_v62, %v6426_v22  ;;  %v2507_v4 = vpop.f32.mrb[65].mxu0  ;;  %v2548_v44 = vpop.f32.mrb[65].mxu1 }
 0x839   :  { %v2554_v6 = vadd.f32 %v2507_v4, %v6427_v26  ;;  %v2556_v47 = vadd.f32 %v2548_v44, %v6428_v3  ;;  %v2509_v21 = vpop.f32.mrb[66].mxu0  ;;  %v2550_v11 = vpop.f32.mrb[66].mxu1  ;;  %3523 = vtanh.f32 %v5499_v53 }
 0x83a   :  { %v3115_v31 = vmul.f32 -1.442695, %v2553_v5  ;;  %v2510_v10 = vpop.f32.mrb[67].mxu0  ;;  %v2551_v32 = vpop.f32.mrb[67].mxu1 }
 0x83b   :  { %v3116_v7 = vmul.f32 -1.442695, %v2554_v6  ;;  %v3522_v16 = vpop.eup %3521  ;;  %v3117_v29 = vmul.f32 -1.442695, %v2556_v47 }
 0x83c   :  { %3525 = vpow2.f32 %v3115_v31 }
 0x83d   :  { %3527 = vpow2.f32 %v3116_v7 }
 0x83e   :  { %3529 = vpow2.f32 %v3117_v29  ;;  %v6473_v29 = vld [vmem:[#allocation73_spill] sm:$0xff] }
 0x83f   :  { %3531 = vtanh.f32 %v2555_v33 }
 0x843   :  { %v3524_v8 = vpop.eup %3523 }
 0x844   :  { %v2462_v24 = vmul.f32 %v3524_v8, %v3522_v16  ;;  %v6471_v16 = vld [vmem:[#allocation71_spill] sm:$0xff]  ;;  %v6472_v8 = vld [vmem:[#allocation72_spill] sm:$0xff] }
 0x846   :  { %v3526_v62 = vpop.eup %3525  ;;  %v2463_v19 = vpack.c.bf16 %v2462_v24, %v2462_v24  ;;  %v6474_v24 = vld [vmem:[#allocation74_spill] sm:$0xff] }
 0x847   :  { %v3528_v22 = vpop.eup %3527  ;;  %v2560_v4 = vadd.f32 1.0, %v3526_v62  ;;  %v6475_v62 = vld [vmem:[#allocation20_spill] sm:$0xff] }
 0x848   :  { %v2566_v21 = vadd.f32 1.0, %v3528_v22  ;;  %2614 = vmatprep.mubr.bf16.mxu0 %v2463_v19  ;;  %2655 = vmatprep.mubr.bf16.mxu1 %v2463_v19  ;;  %v3530_v3 = vpop.eup %3529  ;;  %v6476_v19 = vld [vmem:[#allocation21_spill] sm:$0xff]  ;;  %v6477_v22 = vld [vmem:[#allocation26_spill] sm:$0xff] }
 0x849   :  { %3533 = vrcp.f32 %v2560_v4  ;;  %v3532_v5 = vpop.eup %3531  ;;  %v2573_v11 = vadd.f32 1.0, %v3530_v3  ;;  %v6478_v4 = vld [vmem:[#allocation80_spill] sm:$0xff]  ;;  %v6480_v3 = vld [vmem:[#allocation82_spill] sm:$0xff] }
 0x84a   :  { %3535 = vrcp.f32 %v2566_v21  ;;  %v6479_v21 = vld [vmem:[#allocation81_spill] sm:$0xff] }
 0x84b   :  { %3537 = vrcp.f32 %v2573_v11  ;;  %v6483_v11 = vld [vmem:[#allocation22_spill] sm:$0xff] }
 0x853   :  { %v3534_v44 = vpop.eup %3533 }
 0x854   :  { %v3536_v26 = vpop.eup %3535  ;;  %v2577_v6 = vmul.f32 %v3534_v44, %v3532_v5  ;;  %v6481_v5 = vld [vmem:[#allocation83_spill] sm:$0xff] }
 0x855   :  { %v2576_v47 = vmul.f32 %v3536_v26, %v5265_v18  ;;  %v3538_v10 = vpop.eup %3537  ;;  %v6450_v18 = vld [vmem:[#allocation54_spill] sm:$0xff]  ;;  %v6482_v44 = vld [vmem:[#allocation27_spill] sm:$0xff] }
 0x857   :  { %v5507_v31 = vadd.f32 %v2577_v6, %v2576_v47 }
 0x859   :  { %3539 = vtanh.f32 %v5507_v31 }
 0x863   :  { %v3540_v33 = vpop.eup %3539 }
 0x864   :  { %v2580_v32 = vmul.f32 %v3540_v33, %v3538_v10 }
 0x866   :  { %v2581_v7 = vpack.c.bf16 %v2580_v32, %v2580_v32  ;;  %v6484_v32 = vld [vmem:[#allocation23_spill] sm:$0xff] }
 0x868   :  { %2615 = vmatmul.mubr.bf16.vlgmr.msra.gmra.mrb[68].mxu0 %v2581_v7  ;;  %2656 = vmatmul.mubr.bf16.vlgmr.msra.gmra.mrb[68].mxu1 %v2581_v7 }
 0x869   :  { %2697 = vmatpush1.bf16.msra.mxu0 %v5092_v9  ;;  %2738 = vmatpush1.bf16.msra.mxu1 %v5095_v45  ;;  %v6430_v9 = vld [vmem:[#allocation39_spill] sm:$0xff]  ;;  %v6431_v45 = vld [vmem:[#allocation40_spill] sm:$0xff] }
 0x86a   :  { %2698 = vmatprep.subr.bf16.mxu0 %v5098_v46  ;;  %2739 = vmatprep.subr.bf16.mxu1 %v5101_v42  ;;  %v6432_v46 = vld [vmem:[#allocation41_spill] sm:$0xff]  ;;  %v6433_v42 = vld [vmem:[#allocation42_spill] sm:$0xff] }
 0x86b   :  { %2728 = vmatprep.mubr.bf16.mxu0 %v6070_v20  ;;  %2769 = vmatprep.mubr.bf16.mxu1 %v6070_v20  ;;  %v6429_v20 = vld [vmem:[#allocation38_spill] sm:$0xff] }
 0x86d   :  { %2699 = vmatpush1.bf16.msra.mxu0 %v5106_v48  ;;  %2740 = vmatpush1.bf16.msra.mxu1 %v5109_v39  ;;  %v6434_v48 = vld [vmem:[#allocation43_spill] sm:$0xff]  ;;  %v6435_v39 = vld [vmem:[#allocation44_spill] sm:$0xff] }
 0x86e   :  { %2700 = vmatprep.subr.bf16.mxu0 %v5112_v52  ;;  %2741 = vmatprep.subr.bf16.mxu1 %v5115_v14  ;;  %v6436_v52 = vld [vmem:[#allocation45_spill] sm:$0xff]  ;;  %v6437_v14 = vld [vmem:[#allocation46_spill] sm:$0xff] }
 0x871   :  { %2701 = vmatpush1.bf16.msra.mxu0 %v5118_v63  ;;  %2742 = vmatpush1.bf16.msra.mxu1 %v5121_v61  ;;  %v6438_v63 = vld [vmem:[#allocation47_spill] sm:$0xff]  ;;  %v6439_v61 = vld [vmem:[#allocation48_spill] sm:$0xff] }
 0x872   :  { %2702 = vmatprep.subr.bf16.mxu0 %v5124_v38  ;;  %2743 = vmatprep.subr.bf16.mxu1 %v5127_v41  ;;  %v6440_v38 = vld [vmem:[#allocation49_spill] sm:$0xff]  ;;  %v6441_v41 = vld [vmem:[#allocation50_spill] sm:$0xff] }
 0x875   :  { %2703 = vmatpush1.bf16.msra.mxu0 %v5130_v15  ;;  %2744 = vmatpush1.bf16.msra.mxu1 %v5133_v17  ;;  %v6442_v15 = vld [vmem:[#allocation75_spill] sm:$0xff]  ;;  %v6443_v17 = vld [vmem:[#allocation76_spill] sm:$0xff] }
 0x876   :  { %2704 = vmatprep.subr.bf16.mxu0 %v6361_v49  ;;  %2745 = vmatprep.subr.bf16.mxu1 %v6362_v0  ;;  %v6451_v49 = vld [vmem:[#allocation55_spill] sm:$0xff]  ;;  %v6452_v0 = vld [vmem:[#allocation56_spill] sm:$0xff] }
 0x879   :  { %2705 = vmatpush1.bf16.msra.mxu0 %v6363_v28  ;;  %2746 = vmatpush1.bf16.msra.mxu1 %v6364_v35  ;;  %v6453_v28 = vld [vmem:[#allocation57_spill] sm:$0xff]  ;;  %v6454_v35 = vld [vmem:[#allocation58_spill] sm:$0xff] }
 0x87a   :  { %2706 = vmatprep.subr.bf16.mxu0 %v6365_v34  ;;  %2747 = vmatprep.subr.bf16.mxu1 %v6366_v27  ;;  %v6455_v34 = vld [vmem:[#allocation59_spill] sm:$0xff]  ;;  %v6456_v27 = vld [vmem:[#allocation60_spill] sm:$0xff] }
 0x87d   :  { %2707 = vmatpush1.bf16.msra.mxu0 %v6367_v23  ;;  %2748 = vmatpush1.bf16.msra.mxu1 %v6368_v30  ;;  %v6457_v23 = vld [vmem:[#allocation88_spill] sm:$0xff]  ;;  %v6458_v30 = vld [vmem:[#allocation89_spill] sm:$0xff] }
 0x87e   :  { %2708 = vmatprep.subr.bf16.mxu0 %v6369_v25  ;;  %2749 = vmatprep.subr.bf16.mxu1 %v6370_v43  ;;  %v6459_v25 = vld [vmem:[#allocation90_spill] sm:$0xff]  ;;  %v6460_v43 = vld [vmem:[#allocation91_spill] sm:$0xff] }
 0x881   :  { %2709 = vmatpush1.bf16.msra.mxu0 %v5166_v36  ;;  %2750 = vmatpush1.bf16.msra.mxu1 %v5169_v54  ;;  %v6448_v36 = vld [vmem:[#allocation52_spill] sm:$0xff]  ;;  %v6449_v54 = vld [vmem:[#allocation53_spill] sm:$0xff] }
 0x882   :  { %2710 = vmatprep.subr.bf16.mxu0 %v5172_v37  ;;  %2751 = vmatprep.subr.bf16.mxu1 %v5175_v13  ;;  %v6444_v37 = vld [vmem:[#allocation77_spill] sm:$0xff]  ;;  %v6445_v13 = vld [vmem:[#allocation78_spill] sm:$0xff] }
 0x885   :  { %2711 = vmatpush1.bf16.msra.mxu0 %v5178_v57  ;;  %2752 = vmatpush1.bf16.msra.mxu1 %v5181_v12  ;;  %v6446_v57 = vld [vmem:[#allocation79_spill] sm:$0xff] }
 0x886   :  { %2807 = vmatprep.subr.bf16.mxu0 %v5300_v50  ;;  %2848 = vmatprep.subr.bf16.mxu1 %v5303_v40  ;;  %v6447_v12 = vld [vmem:[#allocation51_spill] sm:$0xff]  ;;  %v6461_v50 = vld [vmem:[#allocation61_spill] sm:$0xff]  ;;  %v6462_v40 = vld [vmem:[#allocation62_spill] sm:$0xff] }
 0x888   :  { %2729 = vmatmul.mubr.bf16.vlgmr.msra.gmra.mrb[72].mxu0 %v2581_v7  ;;  %2770 = vmatmul.mubr.bf16.vlgmr.msra.gmra.mrb[72].mxu1 %v2581_v7 }
 0x889   :  { %2808 = vmatpush1.bf16.msra.mxu0 %v5306_v51  ;;  %2849 = vmatpush1.bf16.msra.mxu1 %v5309_v55  ;;  %v6463_v51 = vld [vmem:[#allocation63_spill] sm:$0xff]  ;;  %v6464_v55 = vld [vmem:[#allocation64_spill] sm:$0xff] }
 0x88a   :  { %2809 = vmatprep.subr.bf16.mxu0 %v5312_v56  ;;  %2850 = vmatprep.subr.bf16.mxu1 %v5315_v58  ;;  %v6465_v56 = vld [vmem:[#allocation65_spill] sm:$0xff]  ;;  %v6466_v58 = vld [vmem:[#allocation66_spill] sm:$0xff] }
 0x88d   :  { %2810 = vmatpush1.bf16.msra.mxu0 %v5318_v59  ;;  %2851 = vmatpush1.bf16.msra.mxu1 %v5321_v60  ;;  %v6467_v59 = vld [vmem:[#allocation67_spill] sm:$0xff]  ;;  %v6468_v60 = vld [vmem:[#allocation68_spill] sm:$0xff] }
 0x88e   :  { %2811 = vmatprep.subr.bf16.mxu0 %v5324_v1  ;;  %2852 = vmatprep.subr.bf16.mxu1 %v5327_v2  ;;  %v6469_v1 = vld [vmem:[#allocation69_spill] sm:$0xff]  ;;  %v6470_v2 = vld [vmem:[#allocation70_spill] sm:$0xff] }
 0x891   :  { %2812 = vmatpush1.bf16.msra.mxu0 %v6429_v20  ;;  %2853 = vmatpush1.bf16.msra.mxu1 %v6430_v9 }
 0x892   :  { %2813 = vmatprep.subr.bf16.mxu0 %v6431_v45  ;;  %2854 = vmatprep.subr.bf16.mxu1 %v6432_v46 }
 0x895   :  { %2814 = vmatpush1.bf16.msra.mxu0 %v6433_v42  ;;  %2855 = vmatpush1.bf16.msra.mxu1 %v6434_v48 }
 0x896   :  { %2815 = vmatprep.subr.bf16.mxu0 %v6435_v39  ;;  %2856 = vmatprep.subr.bf16.mxu1 %v6436_v52  ;;  %v6485_v39 = vld [vmem:[#allocation24_spill] sm:$0xff] }
 0x899   :  { %2816 = vmatpush1.bf16.msra.mxu0 %v6437_v14  ;;  %2857 = vmatpush1.bf16.msra.mxu1 %v6438_v63  ;;  %v6486_v63 = vld [vmem:[#allocation25_spill] sm:$0xff] }
 0x89a   :  { %2817 = vmatprep.subr.bf16.mxu0 %v6439_v61  ;;  %2858 = vmatprep.subr.bf16.mxu1 %v6440_v38 }
 0x89d   :  { %2818 = vmatpush1.bf16.msra.mxu0 %v6441_v41  ;;  %2859 = vmatpush1.bf16.msra.mxu1 %v6442_v15 }
 0x89e   :  { %2819 = vmatprep.subr.bf16.mxu0 %v6443_v17  ;;  %2860 = vmatprep.subr.bf16.mxu1 %v6444_v37 }
 0x8a1   :  { %2820 = vmatpush1.bf16.msra.mxu0 %v6445_v13  ;;  %2861 = vmatpush1.bf16.msra.mxu1 %v6446_v57 }
 0x8a2   :  { %2821 = vmatprep.subr.bf16.mxu0 %v6447_v12  ;;  %2862 = vmatprep.subr.bf16.mxu1 %v6448_v36 }
 0x8a5   :  { %2822 = vmatpush1.bf16.msra.mxu0 %v6449_v54  ;;  %2863 = vmatpush1.bf16.msra.mxu1 %v6450_v18 }
 0x8a6   :  { %2823 = vmatprep.subr.bf16.mxu0 %v6451_v49  ;;  %2864 = vmatprep.subr.bf16.mxu1 %v6452_v0 }
 0x8a9   :  { %2824 = vmatpush1.bf16.msra.mxu0 %v6453_v28  ;;  %2865 = vmatpush1.bf16.msra.mxu1 %v6454_v35  ;;  %v6487_v35 = vld [vmem:[#allocation100_spill] sm:$0xff] }
 0x8aa   :  { %2825 = vmatprep.subr.bf16.mxu0 %v6455_v34  ;;  %2866 = vmatprep.subr.bf16.mxu1 %v6456_v27  ;;  %v6488_v27 = vld [vmem:[#allocation101_spill] sm:$0xff] }
 0x8ad   :  { %2826 = vmatpush1.bf16.msra.mxu0 %v6457_v23  ;;  %2867 = vmatpush1.bf16.msra.mxu1 %v6458_v30 }
 0x8ae   :  { %2827 = vmatprep.subr.bf16.mxu0 %v6459_v25  ;;  %2868 = vmatprep.subr.bf16.mxu1 %v6460_v43  ;;  %v6489_v43 = vld [vmem:[#allocation102_spill] sm:$0xff] }
 0x8b1   :  { %2828 = vmatpush1.bf16.msra.mxu0 %v6461_v50  ;;  %2869 = vmatpush1.bf16.msra.mxu1 %v6462_v40  ;;  %v6490_v40 = vld [vmem:[#allocation103_spill] sm:$0xff] }
 0x8b2   :  { %2829 = vmatprep.subr.bf16.mxu0 %v6463_v51  ;;  %2870 = vmatprep.subr.bf16.mxu1 %v6464_v55 }
 0x8b5   :  { %2830 = vmatpush1.bf16.msra.mxu0 %v6465_v56  ;;  %2871 = vmatpush1.bf16.msra.mxu1 %v6466_v58 }
 0x8b6   :  { %2831 = vmatprep.subr.bf16.mxu0 %v6467_v59  ;;  %2872 = vmatprep.subr.bf16.mxu1 %v6468_v60 }
 0x8b9   :  { %2832 = vmatpush1.bf16.msra.mxu0 %v6469_v1  ;;  %2873 = vmatpush1.bf16.msra.mxu1 %v6470_v2 }
 0x8ba   :  { %2833 = vmatprep.subr.bf16.mxu0 %v6471_v16  ;;  %2874 = vmatprep.subr.bf16.mxu1 %v6472_v8 }
 0x8bd   :  { %2834 = vmatpush1.bf16.msra.mxu0 %v6473_v29  ;;  %2875 = vmatpush1.bf16.msra.mxu1 %v6474_v24 }
 0x8be   :  { %2835 = vmatprep.subr.bf16.mxu0 %v6475_v62  ;;  %2876 = vmatprep.subr.bf16.mxu1 %v6476_v19 }
 0x8c1   :  { %2836 = vmatpush1.bf16.msra.mxu0 %v6477_v22  ;;  %2877 = vmatpush1.bf16.msra.mxu1 %v6478_v4 }
 0x8c2   :  { %2837 = vmatprep.subr.bf16.mxu0 %v6479_v21  ;;  %2878 = vmatprep.subr.bf16.mxu1 %v6480_v3 }
 0x8c5   :  { %2838 = vmatpush1.bf16.msra.mxu0 %v6481_v5  ;;  %2879 = vmatpush1.bf16.msra.mxu1 %v6482_v44 }
 0x93b   :  { %v2616_v26 = vpop.f32.mrb[68].mxu0  ;;  %v2657_v6 = vpop.f32.mrb[68].mxu1 }
 0x93c   :  { %v2617_v47 = vadd.f32 %v2616_v26, %v6483_v11  ;;  %v2618_v10 = vpop.f32.mrb[69].mxu0  ;;  %v2659_v33 = vpop.f32.mrb[69].mxu1  ;;  %v2658_v61 = vadd.f32 %v2657_v6, %v6486_v63 }
 0x93d   :  { %v2619_v7 = vadd.f32 %v2618_v10, %v6484_v32  ;;  %v2620_v20 = vpop.f32.mrb[70].mxu0  ;;  %v2661_v9 = vpop.f32.mrb[70].mxu1  ;;  %v2660_v52 = vadd.f32 %v2659_v33, %v6485_v39 }
 0x93e   :  { %v3118_v45 = vmul.f32 -1.442695, %v2617_v47  ;;  %v2621_v46 = vpop.f32.mrb[71].mxu0  ;;  %v2662_v42 = vpop.f32.mrb[71].mxu1 }
 0x93f   :  { %v3119_v48 = vmul.f32 -1.442695, %v2619_v7  ;;  %v3120_v14 = vmul.f32 -1.442695, %v2660_v52 }
 0x940   :  { %3541 = vpow2.f32 %v3118_v45 }
 0x941   :  { %3543 = vpow2.f32 %v3119_v48 }
 0x942   :  { %3545 = vpow2.f32 %v3120_v14 }
 0x943   :  { %3547 = vtanh.f32 %v2658_v61 }
 0x94a   :  { %v3542_v38 = vpop.eup %3541 }
 0x94b   :  { %v3544_v41 = vpop.eup %3543  ;;  %v2667_v15 = vadd.f32 1.0, %v3542_v38 }
 0x94c   :  { %v2673_v17 = vadd.f32 1.0, %v3544_v41  ;;  %v3546_v37 = vpop.eup %3545 }
 0x94d   :  { %3549 = vrcp.f32 %v2667_v15  ;;  %v3548_v13 = vpop.eup %3547  ;;  %v2680_v54 = vadd.f32 1.0, %v3546_v37 }
 0x94e   :  { %3551 = vrcp.f32 %v2673_v17 }
 0x94f   :  { %3553 = vrcp.f32 %v2680_v54 }
 0x957   :  { %v3550_v57 = vpop.eup %3549 }
 0x958   :  { %v3552_v12 = vpop.eup %3551  ;;  %v2684_v36 = vmul.f32 %v3550_v57, %v3548_v13 }
 0x959   :  { %v2683_v18 = vmul.f32 %v3552_v12, %v5499_v53  ;;  %v3554_v1 = vpop.eup %3553 }
 0x95b   :  { %v2730_v49 = vpop.f32.mrb[72].mxu0  ;;  %v2771_v0 = vpop.f32.mrb[72].mxu1  ;;  %v5611_v28 = vadd.f32 %v2684_v36, %v2683_v18 }
 0x95c   :  { %v2778_v34 = vadd.f32 %v2730_v49, %v6487_v35  ;;  %v2780_v23 = vadd.f32 %v2771_v0, %v6488_v27  ;;  %v2732_v30 = vpop.f32.mrb[73].mxu0  ;;  %v2773_v25 = vpop.f32.mrb[73].mxu1 }
 0x95d   :  { %v2779_v50 = vadd.f32 %v2732_v30, %v6489_v43  ;;  %v2781_v51 = vadd.f32 %v2773_v25, %v6490_v40  ;;  %v2734_v55 = vpop.f32.mrb[74].mxu0  ;;  %v2775_v56 = vpop.f32.mrb[74].mxu1  ;;  %3555 = vtanh.f32 %v5611_v28 }
 0x95e   :  { %v3121_v53 = vmul.f32 -1.442695, %v2778_v34  ;;  %v2735_v58 = vpop.f32.mrb[75].mxu0  ;;  %v2776_v59 = vpop.f32.mrb[75].mxu1 }
 0x95f   :  { %v3122_v60 = vmul.f32 -1.442695, %v2779_v50  ;;  %v3123_v16 = vmul.f32 -1.442695, %v2781_v51 }
 0x960   :  { %3557 = vpow2.f32 %v3121_v53 }
 0x961   :  { %3559 = vpow2.f32 %v3122_v60 }
 0x962   :  { %3561 = vpow2.f32 %v3123_v16 }
 0x963   :  { %3563 = vtanh.f32 %v2780_v23 }
 0x967   :  { %v3556_v2 = vpop.eup %3555 }
 0x968   :  { %v2687_v8 = vmul.f32 %v3556_v2, %v3554_v1 }
 0x96a   :  { %v3558_v29 = vpop.eup %3557  ;;  %v2688_v24 = vpack.c.bf16 %v2687_v8, %v2687_v8 }
 0x96b   :  { %v3560_v62 = vpop.eup %3559  ;;  %v2785_v19 = vadd.f32 1.0, %v3558_v29 }
 0x96c   :  { %v2791_v22 = vadd.f32 1.0, %v3560_v62  ;;  %2839 = vmatprep.mubr.bf16.mxu0 %v2688_v24  ;;  %2880 = vmatprep.mubr.bf16.mxu1 %v2688_v24  ;;  %v3562_v4 = vpop.eup %3561 }
 0x96d   :  { %3565 = vrcp.f32 %v2785_v19  ;;  %v3564_v21 = vpop.eup %3563  ;;  %v2798_v26 = vadd.f32 1.0, %v3562_v4 }
 0x96e   :  { %3567 = vrcp.f32 %v2791_v22 }
 0x96f   :  { %3569 = vrcp.f32 %v2798_v26 }
 0x977   :  { %v3566_v3 = vpop.eup %3565 }
 0x978   :  { %v3568_v5 = vpop.eup %3567  ;;  %v2802_v44 = vmul.f32 %v3566_v3, %v3564_v21 }
 0x979   :  { %v2801_v6 = vmul.f32 %v3568_v5, %v5507_v31  ;;  %v3570_v10 = vpop.eup %3569 }
 0x97b   :  { %v2803_v47 = vadd.f32 %v2802_v44, %v2801_v6 }
 0x97d   :  { %3571 = vtanh.f32 %v2803_v47 }
 0x987   :  { %v3572_v33 = vpop.eup %3571 }
 0x988   :  { %v2805_v7 = vmul.f32 %v3572_v33, %v3570_v10 }
 0x98a   :  { %v2806_v20 = vpack.c.bf16 %v2805_v7, %v2805_v7 }
 0x98c   :  { %2840 = vmatmul.mubr.bf16.vlgmr.msra.gmra.mrb[76].mxu0 %v2806_v20  ;;  %2914 = vst [vmem:[#allocation3] sm:$0xf] %v2806_v20  ;;  %2881 = vmatmul.mubr.bf16.vlgmr.msra.gmra.mrb[76].mxu1 %v2806_v20 }
 0xa5f   :  { %v2841_v9 = vpop.f32.mrb[76].mxu0  ;;  %v2882_v45 = vpop.f32.mrb[76].mxu1 }
 0xa60   :  { %v2842_v46 = vadd.f32 %v2841_v9, %v6483_v11  ;;  %v2843_v42 = vpop.f32.mrb[77].mxu0  ;;  %v2884_v48 = vpop.f32.mrb[77].mxu1  ;;  %v2883_v13 = vadd.f32 %v2882_v45, %v6486_v63 }
 0xa61   :  { %v2844_v52 = vadd.f32 %v2843_v42, %v6484_v32  ;;  %v2845_v14 = vpop.f32.mrb[78].mxu0  ;;  %v2886_v31 = vpop.f32.mrb[78].mxu1  ;;  %v2885_v17 = vadd.f32 %v2884_v48, %v6485_v39 }
 0xa62   :  { %v3124_v61 = vmul.f32 -1.442695, %v2842_v46  ;;  %v2846_v38 = vpop.f32.mrb[79].mxu0  ;;  %v2887_v41 = vpop.f32.mrb[79].mxu1 }
 0xa63   :  { %v3125_v15 = vmul.f32 -1.442695, %v2844_v52  ;;  %v3126_v37 = vmul.f32 -1.442695, %v2885_v17 }
 0xa64   :  { %3573 = vpow2.f32 %v3124_v61 }
 0xa65   :  { %3575 = vpow2.f32 %v3125_v15 }
 0xa66   :  { %3577 = vpow2.f32 %v3126_v37 }
 0xa67   :  { %3579 = vtanh.f32 %v2883_v13 }
 0xa6e   :  { %v3574_v57 = vpop.eup %3573 }
 0xa6f   :  { %v3576_v12 = vpop.eup %3575  ;;  %v2892_v11 = vadd.f32 1.0, %v3574_v57 }
 0xa70   :  { %v2898_v36 = vadd.f32 1.0, %v3576_v12  ;;  %v3578_v32 = vpop.eup %3577 }
 0xa71   :  { %3581 = vrcp.f32 %v2892_v11  ;;  %v3580_v54 = vpop.eup %3579  ;;  %v2905_v35 = vadd.f32 1.0, %v3578_v32 }
 0xa72   :  { %3583 = vrcp.f32 %v2898_v36 }
 0xa73   :  { %3585 = vrcp.f32 %v2905_v35 }
 0xa7b   :  { %v3582_v18 = vpop.eup %3581 }
 0xa7c   :  { %v3584_v49 = vpop.eup %3583  ;;  %v2909_v0 = vmul.f32 %v3582_v18, %v3580_v54 }
 0xa7d   :  { %v2908_v34 = vmul.f32 %v3584_v49, %v5611_v28  ;;  %v3586_v63 = vpop.eup %3585 }
 0xa7f   :  { %v2910_v39 = vadd.f32 %v2909_v0, %v2908_v34 }
 0xa81   :  { %3587 = vtanh.f32 %v2910_v39 }
 0xa8b   :  { %v3588_v27 = vpop.eup %3587 }
 0xa8c   :  { %v2912_v23 = vmul.f32 %v3588_v27, %v3586_v63 }
 0xa8e   :  { %v2913_v30 = vpack.c.bf16 %v2912_v23, %v2912_v23 }
 0xa90   :  { %2916 = vst [vmem:[#allocation5] sm:$0xf] %v2913_v30  ;;  %v2921_v25 = vunpack.c.l.bf16 %v2913_v30 }
 0xa92   :  { %2922 = vst [vmem:[#allocation15] sm:$0xff] %v2921_v25 }
 0xa93   :  { %3880 = shalt.err (!%p3877_p8)
}
 0xa94   :  { %s3881_s27 = scalar_lea.hbm %s5642_s6, 128 }
 0xa95   :  { %p3882_p9 = scmp.ne.s32.totalorder %s5642_s6, %s3881_s27  ;;  %p3885_p10 = scmp.lt.u32.totalorder %s3881_s27, %s5642_s6 }
 0xa97   :  { %p3887_p11 = pnand %p3885_p10, %p3882_p9 }
 0xa99   :  { %3890 = shalt.err (!%p3887_p11)
}
 0xa9a   :  { %2932 = dma.vmem_to_hbm [thread:$0]  %s2930_s23, 128, %s5642_s6, [#allocation9]  }
 0xa9b   :  { %3897 = dma.done.wait [#allocation9], 128  }
 0xa9c   :  { %3898 = vsyncadd [#allocation9], 4294967168 }
 0xa9d   :  { %2936 = vsyncpa [#allocation8], 1 }
 0xa9e   :  { %2937 = vsyncpa [#allocation11], 1 }
 0xa9f   :  { %2938 = vsyncpa [#allocation14], 1 }
 0xaa0   :  { %2939 = vsyncpa [#allocation9], 1 }

</bundles_post_ra>
